<compile_context>
chip_gen: v7x
topology: tpu7x:2x2x1
jax: 0.10.0
libtpu: 0.0.40
codegen_flags: <defaults>
</compile_context>

<pallas_src>
import jax
import jax.numpy as jnp
from jax.experimental import pallas as pl
from jax.experimental.pallas import tpu as pltpu

# ---- logical architecture sizes (as in the reference module) ----------------
IMG_H, IMG_W = 28, 28
IN_DIM = IMG_H * IMG_W          # 784
HID_DIM = 128
LATENT_DIM = 32

# ---- padded / tiled sizes for the TPU kernel --------------------------------
PAD_IN = 896                    # 7 * 128  (lane-dense loads/stores)
PAD_LATENT = 128                # full lane width for the latent matmuls
TILE_B = 256                    # batch tile (MXU-height friendly on v6e/v7x)


def _autoencoder_kernel(x_ref,
                        w1_ref, b1_ref, w2_ref, b2_ref,
                        w3_ref, b3_ref, w4_ref, b4_ref,
                        out_ref):
    """Fused encoder+decoder MLP forward on one batch tile.

    x_ref:   (TILE_B, 896)  bf16   (zero-padded 784 -> 896)
    w1/b1:   896->128  (ReLU)      } encoder
    w2/b2:   128->128  (identity)  }   (latent zero-padded 32 -> 128)
    w3/b3:   128->128  (ReLU)      } decoder
    w4/b4:   128->896  (Sigmoid)   }
    out_ref: (TILE_B, 896)  f32
    """
    x = x_ref[...]

    # --- encoder ---
    h = jnp.dot(x, w1_ref[...], preferred_element_type=jnp.float32) + b1_ref[...]
    h = jnp.maximum(h, 0.0).astype(jnp.bfloat16)
    z = jnp.dot(h, w2_ref[...], preferred_element_type=jnp.float32) + b2_ref[...]
    z = z.astype(jnp.bfloat16)

    # --- decoder ---
    d = jnp.dot(z, w3_ref[...], preferred_element_type=jnp.float32) + b3_ref[...]
    d = jnp.maximum(d, 0.0).astype(jnp.bfloat16)
    y = jnp.dot(d, w4_ref[...], preferred_element_type=jnp.float32) + b4_ref[...]

    # Sigmoid: exp on the EUP, approx reciprocal on the EUP (VALU stays free
    # for the bias adds / ReLUs on the 896-wide output stage).
    out_ref[...] = pl.reciprocal(1.0 + jnp.exp(-y), approx=True)


def _pad_params(params):
    """Zero-pad the logical (784/128/32) parameters to kernel shapes (bf16 W, f32 b)."""
    (w1, b1), (w2, b2), (w3, b3), (w4, b4) = params
    bf16, f32 = jnp.bfloat16, jnp.float32

    w1p = jnp.zeros((PAD_IN, HID_DIM), bf16).at[:IN_DIM, :].set(w1.astype(bf16))
    b1p = b1.astype(f32)                                                   # (1, 128)

    w2p = jnp.zeros((HID_DIM, PAD_LATENT), bf16).at[:, :LATENT_DIM].set(w2.astype(bf16))
    b2p = jnp.zeros((1, PAD_LATENT), f32).at[:, :LATENT_DIM].set(b2.astype(f32))

    w3p = jnp.zeros((PAD_LATENT, HID_DIM), bf16).at[:LATENT_DIM, :].set(w3.astype(bf16))
    b3p = b3.astype(f32)                                                   # (1, 128)

    w4p = jnp.zeros((HID_DIM, PAD_IN), bf16).at[:, :IN_DIM].set(w4.astype(bf16))
    b4p = jnp.zeros((1, PAD_IN), f32).at[:, :IN_DIM].set(b4.astype(f32))

    return (w1p, b1p, w2p, b2p, w3p, b3p, w4p, b4p)


def deterministic_model_forward(x_nchw, params):
    """Mirror of DeterministicModel.forward.

    x_nchw: (B, 1, 28, 28) float32  (NCHW, like the PyTorch module)
    returns: (B, 1, 28, 28) float32
    """
    B = x_nchw.shape[0]
    x_flat = x_nchw.reshape(B, -1).astype(jnp.float32)        # x.reshape(B, -1)

    # Pad batch to a multiple of TILE_B and features 784 -> 896 (zeros).
    b_pad = ((B + TILE_B - 1) // TILE_B) * TILE_B
    x_p = jnp.zeros((b_pad, PAD_IN), jnp.bfloat16)
    x_p = x_p.at[:B, :IN_DIM].set(x_flat.astype(jnp.bfloat16))

    w1p, b1p, w2p, b2p, w3p, b3p, w4p, b4p = _pad_params(params)
    weights = (w1p, b1p, w2p, b2p, w3p, b3p, w4p, b4p)

    n_tiles = b_pad // TILE_B

    # Batch-tiled x / out; weights VMEM-resident (constant block index).
    x_spec = pl.BlockSpec((TILE_B, PAD_IN), lambda i: (i, 0))
    out_spec = pl.BlockSpec((TILE_B, PAD_IN), lambda i: (i, 0))
    const_spec = lambda arr: pl.BlockSpec(arr.shape, lambda i: (0,) * arr.ndim)

    flops = 2 * b_pad * (PAD_IN * HID_DIM + HID_DIM * PAD_LATENT
                         + PAD_LATENT * HID_DIM + HID_DIM * PAD_IN)
    weight_bytes = sum(int(w.size) * w.dtype.itemsize for w in weights)
    bytes_accessed = b_pad * PAD_IN * (2 + 4) + weight_bytes   # bf16 in + f32 out
    cost = pl.CostEstimate(flops=flops,
                           transcendentals=b_pad * PAD_IN,
                           bytes_accessed=bytes_accessed)

    out_flat = pl.pallas_call(
        _autoencoder_kernel,
        out_shape=jax.ShapeDtypeStruct((b_pad, PAD_IN), jnp.float32),
        grid=(n_tiles,),
        in_specs=[x_spec] + [const_spec(w) for w in weights],
        out_specs=out_spec,
        compiler_params=pltpu.CompilerParams(
            dimension_semantics=("parallel",),
            vmem_limit_bytes=32 << 20,
        ),
        cost_estimate=cost,
    )(x_p, *weights)

    # Slice off batch/feature padding, then reshape to (B, 1, 28, 28).
    return out_flat[:B, :IN_DIM].reshape(B, 1, IMG_H, IMG_W)


def init_params(key):
    """Deterministic parameter init (uniform, PyTorch-Linear-style bounds)."""
    def linear(key, fan_in, fan_out):
        kw, kb = jax.random.split(key)
        bound = 1.0 / jnp.sqrt(fan_in)
        w = jax.random.uniform(kw, (fan_in, fan_out), jnp.float32, -bound, bound)
        b = jax.random.uniform(kb, (1, fan_out), jnp.float32, -bound, bound)
        return w, b

    k1, k2, k3, k4 = jax.random.split(key, 4)
    return (
        linear(k1, IN_DIM, HID_DIM),      # encoder layer 1
        linear(k2, HID_DIM, LATENT_DIM),  # encoder layer 2 (latent)
        linear(k3, LATENT_DIM, HID_DIM),  # decoder layer 1
        linear(k4, HID_DIM, IN_DIM),      # decoder layer 2 (output)
    )


if __name__ == "__main__":
    key = jax.random.PRNGKey(0)
    k_x, k_p = jax.random.split(key)

    B = 2
    x = jax.random.uniform(k_x, (B, 1, IMG_H, IMG_W), jnp.float32)  # NCHW images
    params = init_params(k_p)

    out = deterministic_model_forward(x, params)
    out = jax.block_until_ready(out)

    assert out.shape == (B, 1, IMG_H, IMG_W), out.shape
    assert out.dtype == jnp.float32
    assert bool(jnp.all(jnp.isfinite(out)))
    assert bool(jnp.all((out >= 0.0) & (out <= 1.0)))   # sigmoid range
    print("KERNEL_OK")
</pallas_src>

<mosaic_0001>
module attributes {stable_mosaic.version = 11 : i64} {
  func.func @_autoencoder_kernel(%arg0: i32, %arg1: memref<256x896xbf16, #tpu.memory_space<vmem>>, %arg2: memref<896x128xbf16, #tpu.memory_space<vmem>>, %arg3: memref<1x128xf32, #tpu.memory_space<vmem>>, %arg4: memref<128x128xbf16, #tpu.memory_space<vmem>>, %arg5: memref<1x128xf32, #tpu.memory_space<vmem>>, %arg6: memref<128x128xbf16, #tpu.memory_space<vmem>>, %arg7: memref<1x128xf32, #tpu.memory_space<vmem>>, %arg8: memref<128x896xbf16, #tpu.memory_space<vmem>>, %arg9: memref<1x896xf32, #tpu.memory_space<vmem>>, %arg10: memref<256x896xf32, #tpu.memory_space<vmem>>) attributes {dimension_semantics = [#tpu.dimension_semantics<parallel>], iteration_bounds = array<i64: 1>, scalar_prefetch = 0 : i64, scratch_operands = 0 : i64, tpu.core_type = #tpu.core_type<tc>, window_params = [{transform_indices = @transform_0, window_bounds = array<i64: 256, 896>}, {pipeline_mode = #tpu.pipeline_mode<synchronous>, transform_indices = @transform_1, window_bounds = array<i64: 896, 128>}, {pipeline_mode = #tpu.pipeline_mode<synchronous>, transform_indices = @transform_2, window_bounds = array<i64: 1, 128>}, {pipeline_mode = #tpu.pipeline_mode<synchronous>, transform_indices = @transform_3, window_bounds = array<i64: 128, 128>}, {pipeline_mode = #tpu.pipeline_mode<synchronous>, transform_indices = @transform_4, window_bounds = array<i64: 1, 128>}, {pipeline_mode = #tpu.pipeline_mode<synchronous>, transform_indices = @transform_5, window_bounds = array<i64: 128, 128>}, {pipeline_mode = #tpu.pipeline_mode<synchronous>, transform_indices = @transform_6, window_bounds = array<i64: 1, 128>}, {pipeline_mode = #tpu.pipeline_mode<synchronous>, transform_indices = @transform_7, window_bounds = array<i64: 128, 896>}, {pipeline_mode = #tpu.pipeline_mode<synchronous>, transform_indices = @transform_8, window_bounds = array<i64: 1, 896>}, {transform_indices = @transform_9, window_bounds = array<i64: 256, 896>}]} {
    %c0 = arith.constant 0 : index
    %c0_0 = arith.constant 0 : index
    %0 = vector.load %arg1[%c0, %c0_0] : memref<256x896xbf16, #tpu.memory_space<vmem>>, vector<256x896xbf16>
    %c0_1 = arith.constant 0 : index
    %c0_2 = arith.constant 0 : index
    %1 = vector.load %arg2[%c0_1, %c0_2] : memref<896x128xbf16, #tpu.memory_space<vmem>>, vector<896x128xbf16>
    %cst = arith.constant dense<0.000000e+00> : vector<256x128xf32>
    %2 = tpu.matmul %0, %1, %cst {dimension_numbers = #tpu.dot_dimension_numbers<[1], [0], [0], [1], [0, 0, 1, 1], [], []>} : vector<256x896xbf16>, vector<896x128xbf16>, vector<256x128xf32> -> vector<256x128xf32>
    %c0_3 = arith.constant 0 : index
    %c0_4 = arith.constant 0 : index
    %3 = vector.load %arg3[%c0_3, %c0_4] : memref<1x128xf32, #tpu.memory_space<vmem>>, vector<1x128xf32>
    %4 = vector.broadcast %3 : vector<1x128xf32> to vector<256x128xf32>
    %5 = arith.addf %2, %4 : vector<256x128xf32>
    %cst_5 = arith.constant 0.000000e+00 : f32
    %6 = vector.broadcast %cst_5 : f32 to vector<256x128xf32>
    %7 = arith.maximumf %5, %6 : vector<256x128xf32>
    %8 = arith.truncf %7 : vector<256x128xf32> to vector<256x128xbf16>
    %c0_6 = arith.constant 0 : index
    %c0_7 = arith.constant 0 : index
    %9 = vector.load %arg4[%c0_6, %c0_7] : memref<128x128xbf16, #tpu.memory_space<vmem>>, vector<128x128xbf16>
    %cst_8 = arith.constant dense<0.000000e+00> : vector<256x128xf32>
    %10 = tpu.matmul %8, %9, %cst_8 {dimension_numbers = #tpu.dot_dimension_numbers<[1], [0], [0], [1], [0, 0, 1, 1], [], []>} : vector<256x128xbf16>, vector<128x128xbf16>, vector<256x128xf32> -> vector<256x128xf32>
    %c0_9 = arith.constant 0 : index
    %c0_10 = arith.constant 0 : index
    %11 = vector.load %arg5[%c0_9, %c0_10] : memref<1x128xf32, #tpu.memory_space<vmem>>, vector<1x128xf32>
    %12 = vector.broadcast %11 : vector<1x128xf32> to vector<256x128xf32>
    %13 = arith.addf %10, %12 : vector<256x128xf32>
    %14 = arith.truncf %13 : vector<256x128xf32> to vector<256x128xbf16>
    %c0_11 = arith.constant 0 : index
    %c0_12 = arith.constant 0 : index
    %15 = vector.load %arg6[%c0_11, %c0_12] : memref<128x128xbf16, #tpu.memory_space<vmem>>, vector<128x128xbf16>
    %cst_13 = arith.constant dense<0.000000e+00> : vector<256x128xf32>
    %16 = tpu.matmul %14, %15, %cst_13 {dimension_numbers = #tpu.dot_dimension_numbers<[1], [0], [0], [1], [0, 0, 1, 1], [], []>} : vector<256x128xbf16>, vector<128x128xbf16>, vector<256x128xf32> -> vector<256x128xf32>
    %c0_14 = arith.constant 0 : index
    %c0_15 = arith.constant 0 : index
    %17 = vector.load %arg7[%c0_14, %c0_15] : memref<1x128xf32, #tpu.memory_space<vmem>>, vector<1x128xf32>
    %18 = vector.broadcast %17 : vector<1x128xf32> to vector<256x128xf32>
    %19 = arith.addf %16, %18 : vector<256x128xf32>
    %cst_16 = arith.constant 0.000000e+00 : f32
    %20 = vector.broadcast %cst_16 : f32 to vector<256x128xf32>
    %21 = arith.maximumf %19, %20 : vector<256x128xf32>
    %22 = arith.truncf %21 : vector<256x128xf32> to vector<256x128xbf16>
    %c0_17 = arith.constant 0 : index
    %c0_18 = arith.constant 0 : index
    %23 = vector.load %arg8[%c0_17, %c0_18] : memref<128x896xbf16, #tpu.memory_space<vmem>>, vector<128x896xbf16>
    %cst_19 = arith.constant dense<0.000000e+00> : vector<256x896xf32>
    %24 = tpu.matmul %22, %23, %cst_19 {dimension_numbers = #tpu.dot_dimension_numbers<[1], [0], [0], [1], [0, 0, 1, 1], [], []>} : vector<256x128xbf16>, vector<128x896xbf16>, vector<256x896xf32> -> vector<256x896xf32>
    %c0_20 = arith.constant 0 : index
    %c0_21 = arith.constant 0 : index
    %25 = vector.load %arg9[%c0_20, %c0_21] : memref<1x896xf32, #tpu.memory_space<vmem>>, vector<1x896xf32>
    %26 = vector.broadcast %25 : vector<1x896xf32> to vector<256x896xf32>
    %27 = arith.addf %24, %26 : vector<256x896xf32>
    %cst_22 = arith.constant 0.000000e+00 : f32
    %28 = vector.broadcast %cst_22 : f32 to vector<256x896xf32>
    %29 = arith.subf %28, %27 : vector<256x896xf32>
    %30 = math.exp %29 : vector<256x896xf32>
    %cst_23 = arith.constant 1.000000e+00 : f32
    %31 = vector.broadcast %cst_23 : f32 to vector<256x896xf32>
    %32 = arith.addf %31, %30 : vector<256x896xf32>
    %33 = tpu.reciprocal %32 {approx = true} : vector<256x896xf32> -> vector<256x896xf32>
    %c0_24 = arith.constant 0 : index
    %c0_25 = arith.constant 0 : index
    %34 = vector.load %arg10[%c0_24, %c0_25] : memref<256x896xf32, #tpu.memory_space<vmem>>, vector<256x896xf32>
    tpu.vector_store %arg10[%c0_24, %c0_25], %33 {strides = array<i32>} : memref<256x896xf32, #tpu.memory_space<vmem>>, vector<256x896xf32>,
    return
  }
  func.func @transform_0(%arg0: i32) -> (i32, i32) {
    %c0_i32 = arith.constant 0 : i32
    %c0_i32_0 = arith.constant 0 : i32
    return %arg0, %c0_i32 : i32, i32
  }
  func.func @transform_1(%arg0: i32) -> (i32, i32) {
    %c0_i32 = arith.constant 0 : i32
    %c0_i32_0 = arith.constant 0 : i32
    %c0_i32_1 = arith.constant 0 : i32
    return %c0_i32, %c0_i32_0 : i32, i32
  }
  func.func @transform_2(%arg0: i32) -> (i32, i32) {
    %c0_i32 = arith.constant 0 : i32
    %c0_i32_0 = arith.constant 0 : i32
    %c0_i32_1 = arith.constant 0 : i32
    return %c0_i32, %c0_i32_0 : i32, i32
  }
  func.func @transform_3(%arg0: i32) -> (i32, i32) {
    %c0_i32 = arith.constant 0 : i32
    %c0_i32_0 = arith.constant 0 : i32
    %c0_i32_1 = arith.constant 0 : i32
    return %c0_i32, %c0_i32_0 : i32, i32
  }
  func.func @transform_4(%arg0: i32) -> (i32, i32) {
    %c0_i32 = arith.constant 0 : i32
    %c0_i32_0 = arith.constant 0 : i32
    %c0_i32_1 = arith.constant 0 : i32
    return %c0_i32, %c0_i32_0 : i32, i32
  }
  func.func @transform_5(%arg0: i32) -> (i32, i32) {
    %c0_i32 = arith.constant 0 : i32
    %c0_i32_0 = arith.constant 0 : i32
    %c0_i32_1 = arith.constant 0 : i32
    return %c0_i32, %c0_i32_0 : i32, i32
  }
  func.func @transform_6(%arg0: i32) -> (i32, i32) {
    %c0_i32 = arith.constant 0 : i32
    %c0_i32_0 = arith.constant 0 : i32
    %c0_i32_1 = arith.constant 0 : i32
    return %c0_i32, %c0_i32_0 : i32, i32
  }
  func.func @transform_7(%arg0: i32) -> (i32, i32) {
    %c0_i32 = arith.constant 0 : i32
    %c0_i32_0 = arith.constant 0 : i32
    %c0_i32_1 = arith.constant 0 : i32
    return %c0_i32, %c0_i32_0 : i32, i32
  }
  func.func @transform_8(%arg0: i32) -> (i32, i32) {
    %c0_i32 = arith.constant 0 : i32
    %c0_i32_0 = arith.constant 0 : i32
    %c0_i32_1 = arith.constant 0 : i32
    return %c0_i32, %c0_i32_0 : i32, i32
  }
  func.func @transform_9(%arg0: i32) -> (i32, i32) {
    %c0_i32 = arith.constant 0 : i32
    %c0_i32_0 = arith.constant 0 : i32
    return %arg0, %c0_i32 : i32, i32
  }
}

</mosaic_0001>

<bundles_post_ra>
// kernel: tpu_custom_call.1
= control target key start
LH: loop header
LB: loop body
LE: loop exit
PB: predicated region body
PF: predicated region fallthrough
CT: control target
= control target key end

     0   :  { %14 = vsyncpa [#allocation3], 0  ;;  %s8618_s0 = inlined_call_operand.hbm [shape: bf16[256,896], index: 0, kind: input, shape index: {}]   ;;  %s8619_s1 = inlined_call_operand.hbm [shape: bf16[896,128], index: 1, kind: input, shape index: {}]   ;;  %s8620_s2 = inlined_call_operand.vmem [shape: f32[1,128], index: 2, kind: input, shape index: {}]   ;;  %s8621_s3 = inlined_call_operand.hbm [shape: bf16[128,128], index: 3, kind: input, shape index: {}]   ;;  %s8622_s4 = inlined_call_operand.vmem [shape: f32[1,128], index: 4, kind: input, shape index: {}]   ;;  %s8623_s5 = inlined_call_operand.hbm [shape: bf16[128,128], index: 5, kind: input, shape index: {}]   ;;  %s8624_s6 = inlined_call_operand.vmem [shape: f32[1,128], index: 6, kind: input, shape index: {}]   ;;  %s8625_s7 = inlined_call_operand.hbm [shape: bf16[128,896], index: 7, kind: input, shape index: {}]   ;;  %s8626_s8 = inlined_call_operand.vmem [shape: f32[1,896], index: 8, kind: input, shape index: {}]   ;;  %s8627_s9 = inlined_call_operand.hbm [shape: f32[256,896], index: 9, kind: output, shape index: {}]  }
   0x1   :  { %15 = vsyncpa [#allocation6], 0 }
   0x2   :  { %16 = vsyncpa [#allocation9], 0 }
   0x3   :  { %17 = vsyncpa [#allocation4], 0  ;;  %s7202_s30 = smov [#allocation5]   ;;  %s7062_s13 = scalar_lea.hbm %s8619_s1, 7168 }
   0x4   :  { %s35_s10 = sshll.u32 %s7202_s30, 4  ;;  %p7063_p0 = scmp.ne.s32.totalorder %s8619_s1, %s7062_s13  ;;  %s36_s10 = int_to_ptr.vmem [resolvable:$true] %s35_s10 }
   0x5   :  { %p7066_p1 = scmp.lt.u32.totalorder %s7062_s13, %s8619_s1 }
   0x7   :  { %p7068_p2 = pnand %p7066_p1, %p7063_p0 }
   0x9   :  { %7071 = shalt.err (!%p7068_p2)
}
   0xa   :  { %s7072_s18 = scalar_lea.vmem %s36_s10, 7168  ;;  %p7077_p4 = scmp.lt.s32.totalorder %s36_s10, %s36_s10 }
   0xb   :  { %p7073_p3 = scmp.ne.s32.totalorder %s36_s10, %s7072_s18  ;;  %p7078_p5 = scmp.lt.s32.totalorder %s7072_s18, %s7072_s18 }
   0xd   :  { %p7079_p6 = por %p7078_p5, %p7077_p4 }
   0xf   :  { %p7080_p7 = pnand %p7079_p6, %p7073_p3 }
  0x11   :  { %7083 = shalt.err (!%p7080_p7)
}
  0x12   :  { %s7203_s19 = smov 64   ;;  %s7204_s20 = smov 4  }
  0x13   :  { %41 = dma.hbm_to_vmem [thread:$0]  %s8619_s1, 7168, %s36_s10, [#allocation6], %s7203_s19, %s7203_s19, %s7204_s20  }
  0x14   :  { %s7205_s23 = smov [#allocation8]   ;;  %s7206_s25 = smov [#allocation2]  }
  0x15   :  { %s63_s24 = sshll.u32 %s7205_s23, 4  ;;  %s23_s26 = sshll.u32 %s7206_s25, 4  ;;  %s64_s24 = int_to_ptr.vmem [resolvable:$true] %s63_s24  ;;  %s24_s26 = int_to_ptr.vmem [resolvable:$true] %s23_s26 }
  0x16   :  { %s7084_s29 = scalar_lea.hbm %s8623_s5, 1024 }
  0x17   :  { %p7085_p8 = scmp.ne.s32.totalorder %s8623_s5, %s7084_s29  ;;  %p7088_p9 = scmp.lt.u32.totalorder %s7084_s29, %s8623_s5 }
  0x19   :  { %p7090_p10 = pnand %p7088_p9, %p7085_p8 }
  0x1b   :  { %7093 = shalt.err (!%p7090_p10)
}
  0x1c   :  { %s7094_s1 = scalar_lea.vmem %s64_s24, 1024  ;;  %p7099_p12 = scmp.lt.s32.totalorder %s64_s24, %s64_s24 }
  0x1d   :  { %p7095_p11 = scmp.ne.s32.totalorder %s64_s24, %s7094_s1  ;;  %p7100_p13 = scmp.lt.s32.totalorder %s7094_s1, %s7094_s1 }
  0x1f   :  { %p7101_p0 = por %p7100_p13, %p7099_p12 }
  0x21   :  { %p7102_p1 = pnand %p7101_p0, %p7095_p11 }
  0x23   :  { %7105 = shalt.err (!%p7102_p1)
}
  0x24   :  { %69 = dma.hbm_to_vmem [thread:$0]  %s8623_s5, 1024, %s64_s24, [#allocation9], %s7203_s19, %s7203_s19, %s7204_s20  }
  0x25   :  { %s7106_s17 = scalar_lea.hbm %s8618_s0, 14336 }
  0x26   :  { %p7107_p2 = scmp.ne.s32.totalorder %s8618_s0, %s7106_s17  ;;  %p7110_p3 = scmp.lt.u32.totalorder %s7106_s17, %s8618_s0 }
  0x28   :  { %p7112_p4 = pnand %p7110_p3, %p7107_p2 }
  0x2a   :  { %7115 = shalt.err (!%p7112_p4)
}
  0x2b   :  { %s7116_s25 = scalar_lea.vmem %s24_s26, 14336  ;;  %p7121_p6 = scmp.lt.s32.totalorder %s24_s26, %s24_s26 }
  0x2c   :  { %p7117_p5 = scmp.ne.s32.totalorder %s24_s26, %s7116_s25  ;;  %p7122_p7 = scmp.lt.s32.totalorder %s7116_s25, %s7116_s25 }
  0x2e   :  { %p7123_p8 = por %p7122_p7, %p7121_p6 }
  0x30   :  { %p7124_p9 = pnand %p7123_p8, %p7117_p5 }
  0x32   :  { %7127 = shalt.err (!%p7124_p9)
}
  0x33   :  { %s7207_s5 = smov 448   ;;  %s7208_s24 = smov 28  }
  0x34   :  { %29 = dma.hbm_to_vmem [thread:$0]  %s8618_s0, 14336, %s24_s26, [#allocation3], %s7207_s5, %s7207_s5, %s7208_s24  }
  0x35   :  { %s7209_s29 = smov [#allocation7]   ;;  %s7210_s11 = smov [#allocation10]  }
  0x36   :  { %s49_s30 = sshll.u32 %s7209_s29, 4  ;;  %s77_s12 = sshll.u32 %s7210_s11, 4  ;;  %s50_s30 = int_to_ptr.vmem [resolvable:$true] %s49_s30  ;;  %s78_s12 = int_to_ptr.vmem [resolvable:$true] %s77_s12 }
  0x37   :  { %s7128_s10 = scalar_lea.hbm %s8621_s3, 1024 }
  0x38   :  { %p7129_p10 = scmp.ne.s32.totalorder %s8621_s3, %s7128_s10  ;;  %p7132_p11 = scmp.lt.u32.totalorder %s7128_s10, %s8621_s3 }
  0x3a   :  { %p7134_p12 = pnand %p7132_p11, %p7129_p10 }
  0x3c   :  { %7137 = shalt.err (!%p7134_p12)
}
  0x3d   :  { %s7138_s0 = scalar_lea.vmem %s50_s30, 1024  ;;  %p7143_p0 = scmp.lt.s32.totalorder %s50_s30, %s50_s30 }
  0x3e   :  { %p7139_p13 = scmp.ne.s32.totalorder %s50_s30, %s7138_s0  ;;  %p7144_p1 = scmp.lt.s32.totalorder %s7138_s0, %s7138_s0 }
  0x40   :  { %p7145_p2 = por %p7144_p1, %p7143_p0 }
  0x42   :  { %p7146_p3 = pnand %p7145_p2, %p7139_p13 }
  0x44   :  { %7149 = shalt.err (!%p7146_p3)
}
  0x45   :  { %55 = dma.hbm_to_vmem [thread:$0]  %s8621_s3, 1024, %s50_s30, [#allocation6], %s7203_s19, %s7203_s19, %s7204_s20  }
  0x46   :  { %s7150_s23 = scalar_lea.hbm %s8625_s7, 7168 }
  0x47   :  { %p7151_p4 = scmp.ne.s32.totalorder %s8625_s7, %s7150_s23  ;;  %p7154_p5 = scmp.lt.u32.totalorder %s7150_s23, %s8625_s7 }
  0x49   :  { %p7156_p6 = pnand %p7154_p5, %p7151_p4 }
  0x4b   :  { %7159 = shalt.err (!%p7156_p6)
}
  0x4c   :  { %s7160_s11 = scalar_lea.vmem %s78_s12, 7168  ;;  %p7165_p8 = scmp.lt.s32.totalorder %s78_s12, %s78_s12 }
  0x4d   :  { %p7161_p7 = scmp.ne.s32.totalorder %s78_s12, %s7160_s11  ;;  %p7166_p9 = scmp.lt.s32.totalorder %s7160_s11, %s7160_s11 }
  0x4f   :  { %p7167_p10 = por %p7166_p9, %p7165_p8 }
  0x51   :  { %p7168_p11 = pnand %p7167_p10, %p7161_p7 }
  0x53   :  { %7171 = shalt.err (!%p7168_p11)
}
  0x54   :  { %83 = dma.hbm_to_vmem [thread:$0]  %s8625_s7, 7168, %s78_s12, [#allocation9], %s7207_s5, %s7207_s5, %s7208_s24  }
  0x55   :  { %7194 = dma.done.wait [#allocation3], 14336  }
  0x56   :  { %7195 = vsyncadd [#allocation3], 4294952960 }
  0x57   :  { %7196 = dma.done.wait [#allocation6], 8192  }
  0x58   :  { %7197 = vsyncadd [#allocation6], 4294959104 }
  0x59   :  { %7198 = dma.done.wait [#allocation9], 8192  }
  0x5a   :  { %7199 = vsyncadd [#allocation9], 4294959104  ;;  %v5853_v0 = vld [vmem:[#allocation5 + $0x40] sm:$0xff]   ;;  %v5857_v4 = vld [vmem:[#allocation5 + $0x48] sm:$0xff]  }
  0x5b   :  { %v5854_v1 = vld [vmem:[#allocation5] sm:$0xff]   ;;  %5216 = vmatprep.subr.bf16.mxu0 %v5853_v0  ;;  %v5858_v5 = vld [vmem:[#allocation5 + $0x8] sm:$0xff]   ;;  %v5861_v8 = vld [vmem:[#allocation5 + $0x50] sm:$0xff]  }
  0x5c   :  { %v5855_v2 = vld [vmem:[#allocation5 + $0xc0] sm:$0xff]   ;;  %5217 = vmatpush3.bf16.msra.mxu0 %v5854_v1  ;;  %v5859_v6 = vld [vmem:[#allocation5 + $0xc8] sm:$0xff]   ;;  %v5862_v9 = vld [vmem:[#allocation5 + $0x10] sm:$0xff]  }
  0x5d   :  { %v5856_v3 = vld [vmem:[#allocation5 + $0x80] sm:$0xff]   ;;  %5328 = vmatprep.subr.bf16.mxu1 %v5855_v2  ;;  %5218 = vmatprep.subr.bf16.mxu0 %v5857_v4  ;;  %v5860_v7 = vld [vmem:[#allocation5 + $0x88] sm:$0xff]   ;;  %v5863_v10 = vld [vmem:[#allocation5 + $0xd0] sm:$0xff]  }
  0x5e   :  { %5329 = vmatpush3.bf16.msra.mxu1 %v5856_v3  ;;  %v5864_v11 = vld [vmem:[#allocation5 + $0x90] sm:$0xff]   ;;  %v5865_v12 = vld [vmem:[#allocation5 + $0x58] sm:$0xff]   ;;  %v5869_v16 = vld [vmem:[#allocation5 + $0x60] sm:$0xff]  }
  0x5f   :  { %5330 = vmatprep.subr.bf16.mxu1 %v5859_v6  ;;  %v5866_v13 = vld [vmem:[#allocation5 + $0x18] sm:$0xff]   ;;  %v5870_v17 = vld [vmem:[#allocation5 + $0x20] sm:$0xff]   ;;  %v5873_v20 = vld [vmem:[#allocation5 + $0x68] sm:$0xff]  }
  0x60   :  { %5219 = vmatpush3.bf16.msra.mxu0 %v5858_v5  ;;  %v5867_v14 = vld [vmem:[#allocation5 + $0xd8] sm:$0xff]   ;;  %v5871_v18 = vld [vmem:[#allocation5 + $0xe0] sm:$0xff]   ;;  %v5874_v21 = vld [vmem:[#allocation5 + $0x28] sm:$0xff]  }
  0x61   :  { %5220 = vmatprep.subr.bf16.mxu0 %v5861_v8  ;;  %v5868_v15 = vld [vmem:[#allocation5 + $0x98] sm:$0xff]   ;;  %v5872_v19 = vld [vmem:[#allocation5 + $0xa0] sm:$0xff]   ;;  %v5875_v22 = vld [vmem:[#allocation5 + $0xe8] sm:$0xff]  }
  0x62   :  { %5331 = vmatpush3.bf16.msra.mxu1 %v5860_v7  ;;  %v5876_v23 = vld [vmem:[#allocation5 + $0xa8] sm:$0xff]   ;;  %v5877_v24 = vld [vmem:[#allocation5 + $0x70] sm:$0xff]   ;;  %v5881_v28 = vld [vmem:[#allocation5 + $0x78] sm:$0xff]  }
  0x63   :  { %5332 = vmatprep.subr.bf16.mxu1 %v5863_v10  ;;  %v5878_v25 = vld [vmem:[#allocation5 + $0x30] sm:$0xff]   ;;  %v5882_v29 = vld [vmem:[#allocation5 + $0x38] sm:$0xff]   ;;  %v5886_v32 = vld [vmem:[#allocation2 + $0x4] ss:$28 sps:$4 sm:$0xff]  }
  0x64   :  { %5221 = vmatpush3.bf16.msra.mxu0 %v5862_v9  ;;  %v5879_v26 = vld [vmem:[#allocation5 + $0xf0] sm:$0xff]   ;;  %v5883_v30 = vld [vmem:[#allocation5 + $0xf8] sm:$0xff]   ;;  %1293 = vmatprep.mubr.bf16.mxu0 %v5886_v32  ;;  %v5888_v34 = vld [vmem:[#allocation5 + $0x140] sm:$0xff]  }
  0x65   :  { %5222 = vmatprep.subr.bf16.mxu0 %v5865_v12  ;;  %v5880_v27 = vld [vmem:[#allocation5 + $0xb0] sm:$0xff]   ;;  %v5884_v31 = vld [vmem:[#allocation2] ss:$28 sps:$4 sm:$0xff]   ;;  %v5889_v35 = vld [vmem:[#allocation2 + $0x8] ss:$28 sps:$4 sm:$0xff]  }
  0x66   :  { %5333 = vmatpush3.bf16.msra.mxu1 %v5864_v11  ;;  %v5887_v33 = vld [vmem:[#allocation5 + $0xb8] sm:$0xff]   ;;  %v5891_v36 = vld [vmem:[#allocation2 + $0xc] ss:$28 sps:$4 sm:$0xff]   ;;  %v5892_v37 = vld [vmem:[#allocation5 + $0x100] sm:$0xff]  }
  0x67   :  { %5334 = vmatprep.subr.bf16.mxu1 %v5867_v14  ;;  %1454 = vmatprep.mubr.bf16.mxu1 %v5891_v36  ;;  %v5893_v38 = vld [vmem:[#allocation2 + $0x3c] ss:$28 sps:$4 sm:$0xff]   ;;  %v5896_v39 = vld [vmem:[#allocation2 + $0x44] ss:$28 sps:$4 sm:$0xff]   ;;  %v5900_v43 = vld [vmem:[#allocation2 + $0x74] ss:$28 sps:$4 sm:$0xff]  }
  0x68   :  { %5223 = vmatpush3.bf16.msra.mxu0 %v5866_v13  ;;  %v5895_v40 = vld [vmem:[#allocation2 + $0x38] ss:$28 sps:$4 sm:$0xff]   ;;  %v5899_v41 = vld [vmem:[#allocation5 + $0x180] sm:$0xff]   ;;  %v5903_v44 = vld [vmem:[#allocation5 + $0x148] sm:$0xff]  }
  0x69   :  { %5224 = vmatprep.subr.bf16.mxu0 %v5869_v16  ;;  %v5898_v42 = vld [vmem:[#allocation2 + $0x40] ss:$28 sps:$4 sm:$0xff]   ;;  %v5906_v46 = vld [vmem:[#allocation5 + $0x108] sm:$0xff]   ;;  %v5907_v50 = vld [vmem:[#allocation2 + $0x78] ss:$28 sps:$4 sm:$0xff]  }
  0x6a   :  { %5335 = vmatpush3.bf16.msra.mxu1 %v5868_v15  ;;  %v5904_v45 = vld [vmem:[#allocation2 + $0x7c] ss:$28 sps:$4 sm:$0xff]   ;;  %v5902_v47 = vld [vmem:[#allocation2 + $0x70] ss:$28 sps:$4 sm:$0xff]   ;;  %v5910_v54 = vld [vmem:[#allocation2 + $0xa8] ss:$28 sps:$4 sm:$0xff]  }
  0x6b   :  { %5336 = vmatprep.subr.bf16.mxu1 %v5871_v18  ;;  %v5908_v48 = vld [vmem:[#allocation2 + $0xac] ss:$28 sps:$4 sm:$0xff]   ;;  %v5918_v51 = vld [vmem:[#allocation5 + $0x150] sm:$0xff]   ;;  %v5915_v55 = vld [vmem:[#allocation2 + $0xe4] ss:$28 sps:$4 sm:$0xff]  }
  0x6c   :  { %5225 = vmatpush3.bf16.msra.mxu0 %v5870_v17  ;;  %v5914_v49 = vld [vmem:[#allocation5 + $0x188] sm:$0xff]   ;;  %v5911_v52 = vld [vmem:[#allocation2 + $0xb4] ss:$28 sps:$4 sm:$0xff]   ;;  %v5933_v59 = vld [vmem:[#allocation5 + $0x158] sm:$0xff]  }
  0x6d   :  { %5226 = vmatprep.subr.bf16.mxu0 %v5873_v20  ;;  %v5921_v53 = vld [vmem:[#allocation5 + $0x110] sm:$0xff]   ;;  %v5919_v58 = vld [vmem:[#allocation2 + $0xec] ss:$28 sps:$4 sm:$0xff]   ;;  %v5936_v60 = vld [vmem:[#allocation5 + $0x118] sm:$0xff]  }
  0x6e   :  { %5337 = vmatpush3.bf16.msra.mxu1 %v5872_v19  ;;  %v5929_v56 = vld [vmem:[#allocation5 + $0x190] sm:$0xff]   ;;  %v5917_v61 = vld [vmem:[#allocation2 + $0xe0] ss:$28 sps:$4 sm:$0xff]   ;;  %v5922_v0 = vld [vmem:[#allocation2 + $0xe8] ss:$28 sps:$4 sm:$0xff]  }
  0x6f   :  { %5338 = vmatprep.subr.bf16.mxu1 %v5875_v22  ;;  %v5913_v57 = vld [vmem:[#allocation2 + $0xb0] ss:$28 sps:$4 sm:$0xff]   ;;  %v5923_v62 = vld [vmem:[#allocation2 + $0x11c] ss:$28 sps:$4 sm:$0xff]   ;;  %v5926_v1 = vld [vmem:[#allocation2 + $0x124] ss:$28 sps:$4 sm:$0xff]  }
  0x70   :  { %5227 = vmatpush3.bf16.msra.mxu0 %v5874_v21  ;;  %v5944_v63 = vld [vmem:[#allocation5 + $0x198] sm:$0xff]   ;;  %v5948_v2 = vld [vmem:[#allocation5 + $0x160] sm:$0xff]   ;;  %v5930_v5 = vld [vmem:[#allocation2 + $0x154] ss:$28 sps:$4 sm:$0xff]  }
  0x71   :  { %5228 = vmatprep.subr.bf16.mxu0 %v5877_v24  ;;  %v5951_v3 = vld [vmem:[#allocation5 + $0x120] sm:$0xff]   ;;  %v5925_v4 = vld [vmem:[#allocation2 + $0x118] ss:$28 sps:$4 sm:$0xff]   ;;  %v5963_v9 = vld [vmem:[#allocation5 + $0x168] sm:$0xff]  }
  0x72   :  { %5339 = vmatpush3.bf16.msra.mxu1 %v5876_v23  ;;  %v5959_v6 = vld [vmem:[#allocation5 + $0x1a0] sm:$0xff]   ;;  %v5934_v8 = vld [vmem:[#allocation2 + $0x15c] ss:$28 sps:$4 sm:$0xff]   ;;  %v5966_v10 = vld [vmem:[#allocation5 + $0x128] sm:$0xff]  }
  0x73   :  { %5340 = vmatprep.subr.bf16.mxu1 %v5879_v26  ;;  %v5928_v7 = vld [vmem:[#allocation2 + $0x120] ss:$28 sps:$4 sm:$0xff]   ;;  %v5932_v11 = vld [vmem:[#allocation2 + $0x150] ss:$28 sps:$4 sm:$0xff]   ;;  %v5937_v14 = vld [vmem:[#allocation2 + $0x158] ss:$28 sps:$4 sm:$0xff]  }
  0x74   :  { %5229 = vmatpush3.bf16.msra.mxu0 %v5878_v25  ;;  %v5938_v12 = vld [vmem:[#allocation2 + $0x18c] ss:$28 sps:$4 sm:$0xff]   ;;  %v5941_v15 = vld [vmem:[#allocation2 + $0x194] ss:$28 sps:$4 sm:$0xff]   ;;  %v5945_v19 = vld [vmem:[#allocation2 + $0x1c4] ss:$28 sps:$4 sm:$0xff]  }
  0x75   :  { %5230 = vmatprep.subr.bf16.mxu0 %v5881_v28  ;;  %v5974_v13 = vld [vmem:[#allocation5 + $0x1a8] sm:$0xff]   ;;  %v5978_v16 = vld [vmem:[#allocation5 + $0x170] sm:$0xff]   ;;  %v5993_v23 = vld [vmem:[#allocation5 + $0x178] sm:$0xff]  }
  0x76   :  { %5341 = vmatpush3.bf16.msra.mxu1 %v5880_v27  ;;  %v5981_v17 = vld [vmem:[#allocation5 + $0x130] sm:$0xff]   ;;  %v5940_v18 = vld [vmem:[#allocation2 + $0x188] ss:$28 sps:$4 sm:$0xff]   ;;  %v5996_v24 = vld [vmem:[#allocation5 + $0x138] sm:$0xff]  }
  0x77   :  { %5342 = vmatprep.subr.bf16.mxu1 %v5883_v30  ;;  %v5943_v20 = vld [vmem:[#allocation2 + $0x190] ss:$28 sps:$4 sm:$0xff]   ;;  %v5947_v25 = vld [vmem:[#allocation2 + $0x1c0] ss:$28 sps:$4 sm:$0xff]   ;;  %v5952_v27 = vld [vmem:[#allocation2 + $0x1c8] ss:$28 sps:$4 sm:$0xff]  }
  0x78   :  { %5231 = vmatpush3.bf16.msra.mxu0 %v5882_v29  ;;  %v5989_v21 = vld [vmem:[#allocation5 + $0x1b0] sm:$0xff]   ;;  %v5949_v22 = vld [vmem:[#allocation2 + $0x1cc] ss:$28 sps:$4 sm:$0xff]   ;;  %v5953_v26 = vld [vmem:[#allocation2 + $0x1fc] ss:$28 sps:$4 sm:$0xff]  }
  0x79   :  { %5440 = vmatprep.subr.bf16.mxu0 %v5888_v34  ;;  %v6004_v28 = vld [vmem:[#allocation5 + $0x1b8] sm:$0xff]   ;;  %v5956_v29 = vld [vmem:[#allocation2 + $0x204] ss:$28 sps:$4 sm:$0xff]   ;;  %v5962_v34 = vld [vmem:[#allocation2 + $0x230] ss:$28 sps:$4 sm:$0xff]  }
  0x7a   :  { %5343 = vmatpush3.bf16.msra.mxu1 %v5887_v33  ;;  %v5955_v30 = vld [vmem:[#allocation2 + $0x1f8] ss:$28 sps:$4 sm:$0xff]   ;;  %v5958_v32 = vld [vmem:[#allocation2 + $0x200] ss:$28 sps:$4 sm:$0xff]  }
  0x7b   :  { %1294 = vmatmul.mubr.bf16.vlgmr.msra.gmra.mrb[0].mxu0 %v5884_v31  ;;  %5648 = vmatprep.subr.bf16.mxu1 %v5899_v41  ;;  %v5960_v31 = vld [vmem:[#allocation2 + $0x234] ss:$28 sps:$4 sm:$0xff]   ;;  %v5964_v33 = vld [vmem:[#allocation2 + $0x23c] ss:$28 sps:$4 sm:$0xff]  }
  0x7c   :  { %5441 = vmatpush3.bf16.msra.mxu0 %v5892_v37  ;;  %1301 = vmatprep.mubr.bf16.mxu0 %v5893_v38  ;;  %v5967_v36 = vld [vmem:[#allocation2 + $0x238] ss:$28 sps:$4 sm:$0xff]   ;;  %v5970_v38 = vld [vmem:[#allocation2 + $0x268] ss:$28 sps:$4 sm:$0xff]  }
  0x7d   :  { %1455 = vmatmul.mubr.bf16.vlgmr.msra.gmra.mrb[0].mxu1 %v5889_v35  ;;  %5442 = vmatprep.subr.bf16.mxu0 %v5903_v44  ;;  %v5968_v35 = vld [vmem:[#allocation2 + $0x26c] ss:$28 sps:$4 sm:$0xff]   ;;  %v5971_v37 = vld [vmem:[#allocation2 + $0x274] ss:$28 sps:$4 sm:$0xff]  }
  0x7e   :  { %1462 = vmatprep.mubr.bf16.mxu1 %v5896_v39  ;;  %5649 = vmatpush3.bf16.msra.mxu1 %v5899_v41  ;;  %v5975_v39 = vld [vmem:[#allocation2 + $0x2a4] ss:$28 sps:$4 sm:$0xff]   ;;  %v5979_v41 = vld [vmem:[#allocation2 + $0x2ac] ss:$28 sps:$4 sm:$0xff]  }
  0x7f   :  { %5650 = vmatprep.subr.bf16.mxu1 %v5914_v49  ;;  %v5982_v44 = vld [vmem:[#allocation2 + $0x2a8] ss:$28 sps:$4 sm:$0xff]  }
  0x80   :  { %5443 = vmatpush3.bf16.msra.mxu0 %v5906_v46  ;;  %v5985_v46 = vld [vmem:[#allocation2 + $0x2d8] ss:$28 sps:$4 sm:$0xff]  }
  0x81   :  { %5444 = vmatprep.subr.bf16.mxu0 %v5918_v51  ;;  %v5998_v51 = vld [vmem:[#allocation2 + $0x34c] ss:$28 sps:$4 sm:$0xff]  }
  0x82   :  { %5651 = vmatpush3.bf16.msra.mxu1 %v5914_v49  ;;  %v5994_v49 = vld [vmem:[#allocation2 + $0x31c] ss:$28 sps:$4 sm:$0xff]  }
  0x83   :  { %1302 = vmatmul.mubr.bf16.gmra.mrb[4].mxu0 %v5895_v40  ;;  %5652 = vmatprep.subr.bf16.mxu1 %v5929_v56  ;;  %v5973_v40 = vld [vmem:[#allocation2 + $0x270] ss:$28 sps:$4 sm:$0xff]  }
  0x84   :  { %1309 = vmatprep.mubr.bf16.mxu0 %v5900_v43  ;;  %5445 = vmatpush3.bf16.msra.mxu0 %v5921_v53  ;;  %v5983_v43 = vld [vmem:[#allocation2 + $0x2dc] ss:$28 sps:$4 sm:$0xff]   ;;  %v6001_v53 = vld [vmem:[#allocation2 + $0x354] ss:$28 sps:$4 sm:$0xff]  }
  0x85   :  { %1463 = vmatmul.mubr.bf16.gmra.mrb[4].mxu1 %v5898_v42  ;;  %5446 = vmatprep.subr.bf16.mxu0 %v5933_v59  ;;  %v5977_v42 = vld [vmem:[#allocation2 + $0x2a0] ss:$28 sps:$4 sm:$0xff]   ;;  %v6010_v59 = vld [vmem:[#allocation2 + $0x4c] ss:$28 sps:$4 sm:$0xff]  }
  0x86   :  { %1470 = vmatprep.mubr.bf16.mxu1 %v5904_v45  ;;  %5653 = vmatpush3.bf16.msra.mxu1 %v5929_v56  ;;  %v5986_v45 = vld [vmem:[#allocation2 + $0x2e4] ss:$28 sps:$4 sm:$0xff]   ;;  %v6003_v56 = vld [vmem:[#allocation2 + $0x350] ss:$28 sps:$4 sm:$0xff]  }
  0x87   :  { %5654 = vmatprep.subr.bf16.mxu1 %v5944_v63 }
  0x88   :  { %5447 = vmatpush3.bf16.msra.mxu0 %v5936_v60  ;;  %v6009_v60 = vld [vmem:[#allocation2 + $0x50] ss:$28 sps:$4 sm:$0xff]  }
  0x89   :  { %5448 = vmatprep.subr.bf16.mxu0 %v5948_v2  ;;  %v6015_v2 = vld [vmem:[#allocation2 + $0x80] ss:$28 sps:$4 sm:$0xff]  }
  0x8a   :  { %5655 = vmatpush3.bf16.msra.mxu1 %v5944_v63  ;;  %v6013_v63 = vld [vmem:[#allocation2 + $0x84] ss:$28 sps:$4 sm:$0xff]  }
  0x8b   :  { %1310 = vmatmul.mubr.bf16.gmra.mrb[8].mxu0 %v5902_v47  ;;  %5656 = vmatprep.subr.bf16.mxu1 %v5959_v6  ;;  %v5990_v47 = vld [vmem:[#allocation2 + $0x314] ss:$28 sps:$4 sm:$0xff]  }
  0x8c   :  { %1317 = vmatprep.mubr.bf16.mxu0 %v5908_v48  ;;  %5449 = vmatpush3.bf16.msra.mxu0 %v5951_v3  ;;  %v5988_v48 = vld [vmem:[#allocation2 + $0x2e0] ss:$28 sps:$4 sm:$0xff]  }
  0x8d   :  { %1471 = vmatmul.mubr.bf16.gmra.mrb[8].mxu1 %v5907_v50  ;;  %5450 = vmatprep.subr.bf16.mxu0 %v5963_v9  ;;  %v5992_v50 = vld [vmem:[#allocation2 + $0x310] ss:$28 sps:$4 sm:$0xff]   ;;  %v6018_v3 = vld [vmem:[#allocation2 + $0xbc] ss:$28 sps:$4 sm:$0xff]  }
  0x8e   :  { %1478 = vmatprep.mubr.bf16.mxu1 %v5911_v52  ;;  %5657 = vmatpush3.bf16.msra.mxu1 %v5959_v6  ;;  %v5997_v52 = vld [vmem:[#allocation2 + $0x318] ss:$28 sps:$4 sm:$0xff]  }
  0x8f   :  { %5658 = vmatprep.subr.bf16.mxu1 %v5974_v13  ;;  %v6020_v6 = vld [vmem:[#allocation2 + $0xb8] ss:$28 sps:$4 sm:$0xff]  }
  0x90   :  { %5451 = vmatpush3.bf16.msra.mxu0 %v5966_v10  ;;  %v6040_v9 = vld [vmem:[#allocation2 + $0x1d8] ss:$28 sps:$4 sm:$0xff]   ;;  %v6023_v10 = vld [vmem:[#allocation2 + $0xf0] ss:$28 sps:$4 sm:$0xff]  }
  0x91   :  { %5452 = vmatprep.subr.bf16.mxu0 %v5978_v16  ;;  %v6049_v16 = vld [vmem:[#allocation2 + $0x280] ss:$28 sps:$4 sm:$0xff]  }
  0x92   :  { %5659 = vmatpush3.bf16.msra.mxu1 %v5974_v13  ;;  %v6048_v13 = vld [vmem:[#allocation2 + $0x248] ss:$28 sps:$4 sm:$0xff]  }
  0x93   :  { %1318 = vmatmul.mubr.bf16.gmra.mrb[12].mxu0 %v5910_v54  ;;  %5660 = vmatprep.subr.bf16.mxu1 %v5989_v21  ;;  %v6000_v54 = vld [vmem:[#allocation2 + $0x348] ss:$28 sps:$4 sm:$0xff]  }
  0x94   :  { %1325 = vmatprep.mubr.bf16.mxu0 %v5915_v55  ;;  %5453 = vmatpush3.bf16.msra.mxu0 %v5981_v17  ;;  %v6007_v55 = vld [vmem:[#allocation2 + $0x14] ss:$28 sps:$4 sm:$0xff]  }
  0x95   :  { %1479 = vmatmul.mubr.bf16.gmra.mrb[12].mxu1 %v5913_v57  ;;  %5454 = vmatprep.subr.bf16.mxu0 %v5993_v23  ;;  %v6008_v57 = vld [vmem:[#allocation2 + $0x18] ss:$28 sps:$4 sm:$0xff]  }
  0x96   :  { %1486 = vmatprep.mubr.bf16.mxu1 %v5919_v58  ;;  %5661 = vmatpush3.bf16.msra.mxu1 %v5989_v21  ;;  %v6005_v58 = vld [vmem:[#allocation2 + $0x10] ss:$28 sps:$4 sm:$0xff]   ;;  %v6056_v17 = vld [vmem:[#allocation2 + $0x2b8] ss:$28 sps:$4 sm:$0xff]  }
  0x97   :  { %5662 = vmatprep.subr.bf16.mxu1 %v6004_v28  ;;  %v6057_v21 = vld [vmem:[#allocation2 + $0x2f0] ss:$28 sps:$4 sm:$0xff]   ;;  %v6036_v23 = vld [vmem:[#allocation2 + $0x198] ss:$28 sps:$4 sm:$0xff]  }
  0x98   :  { %5455 = vmatpush3.bf16.msra.mxu0 %v5996_v24  ;;  %v6070_v24 = vld [vmem:[#allocation7 + $0x8] sm:$0xff]  }
  0x9a   :  { %5663 = vmatpush3.bf16.msra.mxu1 %v6004_v28  ;;  %v6071_v28 = vld [vmem:[#allocation7 + $0x10] sm:$0xff]  }
  0x9b   :  { %1326 = vmatmul.mubr.bf16.gmra.mrb[16].mxu0 %v5917_v61  ;;  %v6016_v61 = vld [vmem:[#allocation2 + $0x88] ss:$28 sps:$4 sm:$0xff]  }
  0x9c   :  { %1333 = vmatprep.mubr.bf16.mxu0 %v5923_v62  ;;  %v6012_v62 = vld [vmem:[#allocation2 + $0x48] ss:$28 sps:$4 sm:$0xff]  }
  0x9d   :  { %1487 = vmatmul.mubr.bf16.gmra.mrb[16].mxu1 %v5922_v0  ;;  %v6017_v0 = vld [vmem:[#allocation2 + $0xc0] ss:$28 sps:$4 sm:$0xff]  }
  0x9e   :  { %1494 = vmatprep.mubr.bf16.mxu1 %v5926_v1  ;;  %v6024_v1 = vld [vmem:[#allocation2 + $0xf8] ss:$28 sps:$4 sm:$0xff]  }
  0xa3   :  { %1334 = vmatmul.mubr.bf16.gmra.mrb[20].mxu0 %v5925_v4  ;;  %v6025_v4 = vld [vmem:[#allocation2 + $0x130] ss:$28 sps:$4 sm:$0xff]  }
  0xa4   :  { %1341 = vmatprep.mubr.bf16.mxu0 %v5930_v5  ;;  %v6032_v5 = vld [vmem:[#allocation2 + $0x168] ss:$28 sps:$4 sm:$0xff]  }
  0xa5   :  { %1495 = vmatmul.mubr.bf16.gmra.mrb[20].mxu1 %v5928_v7  ;;  %v6021_v7 = vld [vmem:[#allocation2 + $0xf4] ss:$28 sps:$4 sm:$0xff]  }
  0xa6   :  { %1502 = vmatprep.mubr.bf16.mxu1 %v5934_v8  ;;  %v6033_v8 = vld [vmem:[#allocation2 + $0x1a0] ss:$28 sps:$4 sm:$0xff]  }
  0xab   :  { %1342 = vmatmul.mubr.bf16.gmra.mrb[24].mxu0 %v5932_v11  ;;  %v6026_v11 = vld [vmem:[#allocation2 + $0x12c] ss:$28 sps:$4 sm:$0xff]  }
  0xac   :  { %1349 = vmatprep.mubr.bf16.mxu0 %v5938_v12  ;;  %v6041_v12 = vld [vmem:[#allocation2 + $0x210] ss:$28 sps:$4 sm:$0xff]  }
  0xad   :  { %1503 = vmatmul.mubr.bf16.gmra.mrb[24].mxu1 %v5937_v14  ;;  %v6028_v14 = vld [vmem:[#allocation2 + $0x128] ss:$28 sps:$4 sm:$0xff]  }
  0xae   :  { %1510 = vmatprep.mubr.bf16.mxu1 %v5941_v15  ;;  %v6029_v15 = vld [vmem:[#allocation2 + $0x164] ss:$28 sps:$4 sm:$0xff]  }
  0xb3   :  { %1350 = vmatmul.mubr.bf16.gmra.mrb[28].mxu0 %v5940_v18  ;;  %v6031_v18 = vld [vmem:[#allocation2 + $0x160] ss:$28 sps:$4 sm:$0xff]  }
  0xb4   :  { %1357 = vmatprep.mubr.bf16.mxu0 %v5945_v19  ;;  %v6069_v19 = vld [vmem:[#allocation7] sm:$0xff]  }
  0xb5   :  { %1511 = vmatmul.mubr.bf16.gmra.mrb[28].mxu1 %v5943_v20  ;;  %v6034_v20 = vld [vmem:[#allocation2 + $0x19c] ss:$28 sps:$4 sm:$0xff]   ;;  %5696 = vmatprep.subr.bf16.mxu1 %v6069_v19 }
  0xb6   :  { %1518 = vmatprep.mubr.bf16.mxu1 %v5949_v22  ;;  %v6064_v22 = vld [vmem:[#allocation2 + $0x328] ss:$28 sps:$4 sm:$0xff]  }
  0xbb   :  { %1358 = vmatmul.mubr.bf16.gmra.mrb[32].mxu0 %v5947_v25  ;;  %v6037_v25 = vld [vmem:[#allocation2 + $0x1d4] ss:$28 sps:$4 sm:$0xff]  }
  0xbc   :  { %1365 = vmatprep.mubr.bf16.mxu0 %v5953_v26  ;;  %v6065_v26 = vld [vmem:[#allocation2 + $0x360] ss:$28 sps:$4 sm:$0xff]  }
  0xbd   :  { %1519 = vmatmul.mubr.bf16.gmra.mrb[32].mxu1 %v5952_v27  ;;  %v6039_v27 = vld [vmem:[#allocation2 + $0x1d0] ss:$28 sps:$4 sm:$0xff]  }
  0xbe   :  { %1526 = vmatprep.mubr.bf16.mxu1 %v5956_v29  ;;  %v6042_v29 = vld [vmem:[#allocation2 + $0x20c] ss:$28 sps:$4 sm:$0xff]  }
  0xc3   :  { %1366 = vmatmul.mubr.bf16.gmra.mrb[36].mxu0 %v5955_v30  ;;  %v6044_v30 = vld [vmem:[#allocation2 + $0x208] ss:$28 sps:$4 sm:$0xff]  }
  0xc4   :  { %1373 = vmatprep.mubr.bf16.mxu0 %v5960_v31  ;;  %v6072_v31 = vld [vmem:[#allocation7 + $0x18] sm:$0xff]  }
  0xc5   :  { %1527 = vmatmul.mubr.bf16.gmra.mrb[36].mxu1 %v5958_v32  ;;  %v6045_v32 = vld [vmem:[#allocation2 + $0x244] ss:$28 sps:$4 sm:$0xff]  }
  0xc6   :  { %1534 = vmatprep.mubr.bf16.mxu1 %v5964_v33  ;;  %v6047_v33 = vld [vmem:[#allocation2 + $0x240] ss:$28 sps:$4 sm:$0xff]  }
  0xcb   :  { %1374 = vmatmul.mubr.bf16.gmra.mrb[40].mxu0 %v5962_v34  ;;  %v6073_v34 = vld [vmem:[#allocation7 + $0x20] sm:$0xff]  }
  0xcc   :  { %1381 = vmatprep.mubr.bf16.mxu0 %v5968_v35  ;;  %v6050_v35 = vld [vmem:[#allocation2 + $0x27c] ss:$28 sps:$4 sm:$0xff]  }
  0xcd   :  { %1535 = vmatmul.mubr.bf16.gmra.mrb[40].mxu1 %v5967_v36 }
  0xce   :  { %1542 = vmatprep.mubr.bf16.mxu1 %v5971_v37  ;;  %v7343_v37 = vld [vmem:[%s8620_s2] ss:$0 sm:$0xff] }
  0xd3   :  { %1382 = vmatmul.mubr.bf16.gmra.mrb[44].mxu0 %v5970_v38 }
  0xd4   :  { %1389 = vmatprep.mubr.bf16.mxu0 %v5975_v39  ;;  %v6052_v39 = vld [vmem:[#allocation2 + $0x278] ss:$28 sps:$4 sm:$0xff]  }
  0xd5   :  { %1543 = vmatmul.mubr.bf16.gmra.mrb[44].mxu1 %v5973_v40  ;;  %v6074_v40 = vld [vmem:[#allocation7 + $0x28] sm:$0xff]  }
  0xd6   :  { %1550 = vmatprep.mubr.bf16.mxu1 %v5979_v41 }
  0xdb   :  { %1390 = vmatmul.mubr.bf16.gmra.mrb[48].mxu0 %v5977_v42 }
  0xdc   :  { %1397 = vmatprep.mubr.bf16.mxu0 %v5983_v43  ;;  %v6053_v43 = vld [vmem:[#allocation2 + $0x2b4] ss:$28 sps:$4 sm:$0xff]  }
  0xdd   :  { %1551 = vmatmul.mubr.bf16.gmra.mrb[48].mxu1 %v5982_v44 }
  0xde   :  { %1558 = vmatprep.mubr.bf16.mxu1 %v5986_v45 }
  0xe3   :  { %1398 = vmatmul.mubr.bf16.gmra.mrb[52].mxu0 %v5985_v46 }
  0xe4   :  { %1405 = vmatprep.mubr.bf16.mxu0 %v5990_v47 }
  0xe5   :  { %1559 = vmatmul.mubr.bf16.gmra.mrb[52].mxu1 %v5988_v48 }
  0xe6   :  { %1566 = vmatprep.mubr.bf16.mxu1 %v5994_v49 }
  0xeb   :  { %1406 = vmatmul.mubr.bf16.gmra.mrb[56].mxu0 %v5992_v50 }
  0xec   :  { %1413 = vmatprep.mubr.bf16.mxu0 %v5998_v51 }
  0xed   :  { %1567 = vmatmul.mubr.bf16.gmra.mrb[56].mxu1 %v5997_v52 }
  0xee   :  { %1574 = vmatprep.mubr.bf16.mxu1 %v6001_v53 }
  0xf3   :  { %1414 = vmatmul.mubr.bf16.gmra.mrb[60].mxu0 %v6000_v54 }
  0xf4   :  { %1615 = vmatprep.mubr.bf16.mxu0 %v6007_v55 }
  0xf5   :  { %1575 = vmatmul.mubr.bf16.gmra.mrb[60].mxu1 %v6003_v56  ;;  %v6075_v56 = vld [vmem:[#allocation7 + $0x30] sm:$0xff]  }
  0xf6   :  { %5664 = vmatprep.mubr.bf16.mxu1 %v6008_v57 }
  0xfb   :  { %1616 = vmatmul.mubr.bf16.vlgmr.msra.gmra.mrb[64].mxu0 %v6005_v58 }
  0xfc   :  { %1623 = vmatprep.mubr.bf16.mxu0 %v6010_v59  ;;  %v6055_v59 = vld [vmem:[#allocation2 + $0x2b0] ss:$28 sps:$4 sm:$0xff]  }
  0xfd   :  { %5665 = vmatmul.mubr.bf16.vlgmr.msra.gmra.mrb[64].mxu1 %v6009_v60 }
  0xfe   :  { %5668 = vmatprep.mubr.bf16.mxu1 %v6016_v61  ;;  %5697 = vmatpush3.bf16.msra.mxu1 %v6069_v19 }
  0xff   :  { %5698 = vmatprep.subr.bf16.mxu1 %v6070_v24 }
 0x102   :  { %5699 = vmatpush3.bf16.msra.mxu1 %v6070_v24 }
 0x103   :  { %1624 = vmatmul.mubr.bf16.gmra.mrb[68].mxu0 %v6012_v62  ;;  %5700 = vmatprep.subr.bf16.mxu1 %v6071_v28  ;;  %v6058_v62 = vld [vmem:[#allocation2 + $0x2ec] ss:$28 sps:$4 sm:$0xff]  }
 0x104   :  { %1631 = vmatprep.mubr.bf16.mxu0 %v6013_v63 }
 0x105   :  { %5669 = vmatmul.mubr.bf16.gmra.mrb[68].mxu1 %v6017_v0 }
 0x106   :  { %5672 = vmatprep.mubr.bf16.mxu1 %v6024_v1  ;;  %5701 = vmatpush3.bf16.msra.mxu1 %v6071_v28 }
 0x107   :  { %5702 = vmatprep.subr.bf16.mxu1 %v6072_v31 }
 0x10a   :  { %5703 = vmatpush3.bf16.msra.mxu1 %v6072_v31 }
 0x10b   :  { %1632 = vmatmul.mubr.bf16.gmra.mrb[72].mxu0 %v6015_v2  ;;  %5704 = vmatprep.subr.bf16.mxu1 %v6073_v34 }
 0x10c   :  { %1639 = vmatprep.mubr.bf16.mxu0 %v6018_v3 }
 0x10d   :  { %5673 = vmatmul.mubr.bf16.gmra.mrb[72].mxu1 %v6025_v4 }
 0x10e   :  { %5676 = vmatprep.mubr.bf16.mxu1 %v6032_v5  ;;  %5705 = vmatpush3.bf16.msra.mxu1 %v6073_v34 }
 0x10f   :  { %5706 = vmatprep.subr.bf16.mxu1 %v6074_v40 }
 0x112   :  { %5707 = vmatpush3.bf16.msra.mxu1 %v6074_v40 }
 0x113   :  { %1640 = vmatmul.mubr.bf16.gmra.mrb[76].mxu0 %v6020_v6  ;;  %5708 = vmatprep.subr.bf16.mxu1 %v6075_v56 }
 0x114   :  { %1647 = vmatprep.mubr.bf16.mxu0 %v6021_v7 }
 0x115   :  { %5677 = vmatmul.mubr.bf16.gmra.mrb[76].mxu1 %v6033_v8 }
 0x116   :  { %5680 = vmatprep.mubr.bf16.mxu1 %v6040_v9  ;;  %5709 = vmatpush3.bf16.msra.mxu1 %v6075_v56 }
 0x11b   :  { %1648 = vmatmul.mubr.bf16.gmra.mrb[80].mxu0 %v6023_v10 }
 0x11c   :  { %1655 = vmatprep.mubr.bf16.mxu0 %v6026_v11 }
 0x11d   :  { %5681 = vmatmul.mubr.bf16.gmra.mrb[80].mxu1 %v6041_v12 }
 0x11e   :  { %5684 = vmatprep.mubr.bf16.mxu1 %v6048_v13  ;;  %v6060_v13 = vld [vmem:[#allocation2 + $0x2e8] ss:$28 sps:$4 sm:$0xff]  }
 0x123   :  { %1656 = vmatmul.mubr.bf16.gmra.mrb[84].mxu0 %v6028_v14  ;;  %v6076_v14 = vld [vmem:[#allocation7 + $0x38] sm:$0xff]  }
 0x124   :  { %1663 = vmatprep.mubr.bf16.mxu0 %v6029_v15  ;;  %5710 = vmatprep.subr.bf16.mxu1 %v6076_v14 }
 0x125   :  { %5685 = vmatmul.mubr.bf16.gmra.mrb[84].mxu1 %v6049_v16 }
 0x126   :  { %5688 = vmatprep.mubr.bf16.mxu1 %v6056_v17  ;;  %v6061_v17 = vld [vmem:[#allocation2 + $0x324] ss:$28 sps:$4 sm:$0xff]   ;;  %5711 = vmatpush3.bf16.msra.mxu1 %v6076_v14 }
 0x12b   :  { %1664 = vmatmul.mubr.bf16.gmra.mrb[88].mxu0 %v6031_v18 }
 0x12c   :  { %1671 = vmatprep.mubr.bf16.mxu0 %v6034_v20 }
 0x12d   :  { %5689 = vmatmul.mubr.bf16.gmra.mrb[88].mxu1 %v6057_v21 }
 0x12e   :  { %5692 = vmatprep.mubr.bf16.mxu1 %v6064_v22 }
 0x133   :  { %1672 = vmatmul.mubr.bf16.gmra.mrb[92].mxu0 %v6036_v23 }
 0x134   :  { %1679 = vmatprep.mubr.bf16.mxu0 %v6037_v25 }
 0x135   :  { %5693 = vmatmul.mubr.bf16.gmra.mrb[92].mxu1 %v6065_v26 }
 0x13b   :  { %1680 = vmatmul.mubr.bf16.gmra.mrb[96].mxu0 %v6039_v27 }
 0x13c   :  { %1687 = vmatprep.mubr.bf16.mxu0 %v6042_v29 }
 0x143   :  { %1688 = vmatmul.mubr.bf16.gmra.mrb[100].mxu0 %v6044_v30 }
 0x144   :  { %1695 = vmatprep.mubr.bf16.mxu0 %v6045_v32  ;;  %v6063_v32 = vld [vmem:[#allocation2 + $0x320] ss:$28 sps:$4 sm:$0xff]  }
 0x14b   :  { %1696 = vmatmul.mubr.bf16.gmra.mrb[104].mxu0 %v6047_v33 }
 0x14c   :  { %1703 = vmatprep.mubr.bf16.mxu0 %v6050_v35  ;;  %v6066_v35 = vld [vmem:[#allocation2 + $0x35c] ss:$28 sps:$4 sm:$0xff]  }
 0x14e   :  { %v5232_v36 = vpop.f32.mrb[0].mxu0 }
 0x14f   :  { %v5233_v38 = vpop.f32.mrb[1].mxu0 }
 0x150   :  { %v5234_v41 = vadd.f32 %v5233_v38, %v5232_v36  ;;  %v5235_v42 = vpop.f32.mrb[2].mxu0  ;;  %v5344_v44 = vpop.f32.mrb[0].mxu1 }
 0x151   :  { %v5236_v45 = vpop.f32.mrb[3].mxu0  ;;  %v5345_v48 = vpop.f32.mrb[1].mxu1 }
 0x152   :  { %v1296_v46 = vadd.f32 %v5234_v41, %v7343_v37  ;;  %v5237_v47 = vadd.f32 %v5236_v45, %v5235_v42  ;;  %v5346_v49 = vadd.f32 %v5345_v48, %v5344_v44  ;;  %v5347_v50 = vpop.f32.mrb[2].mxu1 }
 0x153   :  { %1704 = vmatmul.mubr.bf16.gmra.mrb[108].mxu0 %v6052_v39  ;;  %v5348_v52 = vpop.f32.mrb[3].mxu1 }
 0x154   :  { %v1299_v51 = vadd.f32 %v5237_v47, %v7343_v37  ;;  %1711 = vmatprep.mubr.bf16.mxu0 %v6053_v43  ;;  %v7347_v53 = vadd.f32 %v5346_v49, %v1296_v46  ;;  %v5349_v54 = vadd.f32 %v5348_v52, %v5347_v50 }
 0x156   :  { %v5238_v55 = vpop.f32.mrb[4].mxu0  ;;  %v7349_v57 = vadd.f32 %v5349_v54, %v1299_v51  ;;  %v6068_v51 = vld [vmem:[#allocation2 + $0x358] ss:$28 sps:$4 sm:$0xff]  }
 0x157   :  { %v5239_v58 = vpop.f32.mrb[5].mxu0 }
 0x158   :  { %v5240_v60 = vadd.f32 %v5239_v58, %v5238_v55  ;;  %v5241_v61 = vpop.f32.mrb[6].mxu0  ;;  %v5350_v63 = vpop.f32.mrb[4].mxu1 }
 0x159   :  { %v5242_v0 = vpop.f32.mrb[7].mxu0  ;;  %v5351_v3 = vpop.f32.mrb[5].mxu1 }
 0x15a   :  { %v1304_v1 = vadd.f32 %v5240_v60, %v7343_v37  ;;  %v5243_v2 = vadd.f32 %v5242_v0, %v5241_v61  ;;  %v5352_v4 = vadd.f32 %v5351_v3, %v5350_v63  ;;  %v5353_v5 = vpop.f32.mrb[6].mxu1 }
 0x15b   :  { %1712 = vmatmul.mubr.bf16.gmra.mrb[112].mxu0 %v6055_v59  ;;  %v5354_v7 = vpop.f32.mrb[7].mxu1 }
 0x15c   :  { %v1307_v6 = vadd.f32 %v5243_v2, %v7343_v37  ;;  %1719 = vmatprep.mubr.bf16.mxu0 %v6058_v62  ;;  %v7353_v8 = vadd.f32 %v5352_v4, %v1304_v1  ;;  %v5355_v9 = vadd.f32 %v5354_v7, %v5353_v5 }
 0x15e   :  { %v5244_v10 = vpop.f32.mrb[8].mxu0  ;;  %v7355_v11 = vadd.f32 %v5355_v9, %v1307_v6 }
 0x15f   :  { %v5245_v12 = vpop.f32.mrb[9].mxu0 }
 0x160   :  { %v5246_v15 = vadd.f32 %v5245_v12, %v5244_v10  ;;  %v5247_v16 = vpop.f32.mrb[10].mxu0  ;;  %v5356_v18 = vpop.f32.mrb[8].mxu1 }
 0x161   :  { %v5248_v19 = vpop.f32.mrb[11].mxu0  ;;  %v5357_v22 = vpop.f32.mrb[9].mxu1 }
 0x162   :  { %v1312_v20 = vadd.f32 %v5246_v15, %v7343_v37  ;;  %v5249_v21 = vadd.f32 %v5248_v19, %v5247_v16  ;;  %v5358_v23 = vadd.f32 %v5357_v22, %v5356_v18  ;;  %v5359_v24 = vpop.f32.mrb[10].mxu1 }
 0x163   :  { %1720 = vmatmul.mubr.bf16.gmra.mrb[116].mxu0 %v6060_v13  ;;  %v5360_v26 = vpop.f32.mrb[11].mxu1 }
 0x164   :  { %v1315_v25 = vadd.f32 %v5249_v21, %v7343_v37  ;;  %1727 = vmatprep.mubr.bf16.mxu0 %v6061_v17  ;;  %v7359_v27 = vadd.f32 %v5358_v23, %v1312_v20  ;;  %v5361_v28 = vadd.f32 %v5360_v26, %v5359_v24 }
 0x166   :  { %v5250_v29 = vpop.f32.mrb[12].mxu0  ;;  %v7361_v30 = vadd.f32 %v5361_v28, %v1315_v25 }
 0x167   :  { %v5251_v31 = vpop.f32.mrb[13].mxu0 }
 0x168   :  { %v5252_v33 = vadd.f32 %v5251_v31, %v5250_v29  ;;  %v5253_v34 = vpop.f32.mrb[14].mxu0  ;;  %v5362_v36 = vpop.f32.mrb[12].mxu1 }
 0x169   :  { %v5254_v38 = vpop.f32.mrb[15].mxu0  ;;  %v5363_v41 = vpop.f32.mrb[13].mxu1 }
 0x16a   :  { %v1320_v39 = vadd.f32 %v5252_v33, %v7343_v37  ;;  %v5255_v40 = vadd.f32 %v5254_v38, %v5253_v34  ;;  %v5364_v42 = vadd.f32 %v5363_v41, %v5362_v36  ;;  %v5365_v43 = vpop.f32.mrb[14].mxu1 }
 0x16b   :  { %1728 = vmatmul.mubr.bf16.gmra.mrb[120].mxu0 %v6063_v32  ;;  %v5366_v45 = vpop.f32.mrb[15].mxu1 }
 0x16c   :  { %v1323_v44 = vadd.f32 %v5255_v40, %v7343_v37  ;;  %1735 = vmatprep.mubr.bf16.mxu0 %v6066_v35  ;;  %v7365_v46 = vadd.f32 %v5364_v42, %v1320_v39  ;;  %v5367_v47 = vadd.f32 %v5366_v45, %v5365_v43 }
 0x16e   :  { %v5256_v48 = vpop.f32.mrb[16].mxu0  ;;  %v7367_v49 = vadd.f32 %v5367_v47, %v1323_v44 }
 0x16f   :  { %v5257_v50 = vpop.f32.mrb[17].mxu0 }
 0x170   :  { %v5258_v52 = vadd.f32 %v5257_v50, %v5256_v48  ;;  %v5259_v54 = vpop.f32.mrb[18].mxu0  ;;  %v5368_v55 = vpop.f32.mrb[16].mxu1 }
 0x171   :  { %v5260_v56 = vpop.f32.mrb[19].mxu0  ;;  %v5369_v60 = vpop.f32.mrb[17].mxu1 }
 0x172   :  { %v1328_v58 = vadd.f32 %v5258_v52, %v7343_v37  ;;  %v5261_v59 = vadd.f32 %v5260_v56, %v5259_v54  ;;  %v5370_v61 = vadd.f32 %v5369_v60, %v5368_v55  ;;  %v5371_v62 = vpop.f32.mrb[18].mxu1 }
 0x173   :  { %1736 = vmatmul.mubr.bf16.gmra.mrb[124].mxu0 %v6068_v51  ;;  %v5372_v0 = vpop.f32.mrb[19].mxu1 }
 0x174   :  { %v1331_v63 = vadd.f32 %v5261_v59, %v7343_v37  ;;  %v7371_v1 = vadd.f32 %v5370_v61, %v1328_v58  ;;  %v5373_v2 = vadd.f32 %v5372_v0, %v5371_v62 }
 0x176   :  { %v5262_v3 = vpop.f32.mrb[20].mxu0  ;;  %v7373_v4 = vadd.f32 %v5373_v2, %v1331_v63 }
 0x177   :  { %v5263_v5 = vpop.f32.mrb[21].mxu0 }
 0x178   :  { %v5264_v6 = vadd.f32 %v5263_v5, %v5262_v3  ;;  %v5265_v7 = vpop.f32.mrb[22].mxu0  ;;  %v5374_v9 = vpop.f32.mrb[20].mxu1 }
 0x179   :  { %v5266_v10 = vpop.f32.mrb[23].mxu0  ;;  %v5375_v14 = vpop.f32.mrb[21].mxu1 }
 0x17a   :  { %v1336_v12 = vadd.f32 %v5264_v6, %v7343_v37  ;;  %v5267_v13 = vadd.f32 %v5266_v10, %v5265_v7  ;;  %v5376_v15 = vadd.f32 %v5375_v14, %v5374_v9  ;;  %v5377_v16 = vpop.f32.mrb[22].mxu1 }
 0x17b   :  { %v5378_v18 = vpop.f32.mrb[23].mxu1 }
 0x17c   :  { %v1339_v17 = vadd.f32 %v5267_v13, %v7343_v37  ;;  %v7377_v19 = vadd.f32 %v5376_v15, %v1336_v12  ;;  %v5379_v20 = vadd.f32 %v5378_v18, %v5377_v16 }
 0x17e   :  { %v5268_v21 = vpop.f32.mrb[24].mxu0  ;;  %v7379_v22 = vadd.f32 %v5379_v20, %v1339_v17 }
 0x17f   :  { %v5269_v23 = vpop.f32.mrb[25].mxu0 }
 0x180   :  { %v5270_v24 = vadd.f32 %v5269_v23, %v5268_v21  ;;  %v5271_v25 = vpop.f32.mrb[26].mxu0  ;;  %v5380_v26 = vpop.f32.mrb[24].mxu1 }
 0x181   :  { %v5272_v28 = vpop.f32.mrb[27].mxu0  ;;  %v5381_v32 = vpop.f32.mrb[25].mxu1 }
 0x182   :  { %v1344_v29 = vadd.f32 %v5270_v24, %v7343_v37  ;;  %v5273_v31 = vadd.f32 %v5272_v28, %v5271_v25  ;;  %v5382_v33 = vadd.f32 %v5381_v32, %v5380_v26  ;;  %v5383_v34 = vpop.f32.mrb[26].mxu1 }
 0x183   :  { %v5384_v36 = vpop.f32.mrb[27].mxu1 }
 0x184   :  { %v1347_v35 = vadd.f32 %v5273_v31, %v7343_v37  ;;  %v7383_v38 = vadd.f32 %v5382_v33, %v1344_v29  ;;  %v5385_v39 = vadd.f32 %v5384_v36, %v5383_v34 }
 0x186   :  { %v5274_v40 = vpop.f32.mrb[28].mxu0  ;;  %v7385_v41 = vadd.f32 %v5385_v39, %v1347_v35 }
 0x187   :  { %v5275_v42 = vpop.f32.mrb[29].mxu0 }
 0x188   :  { %v5276_v43 = vadd.f32 %v5275_v42, %v5274_v40  ;;  %v5277_v44 = vpop.f32.mrb[30].mxu0  ;;  %v5386_v45 = vpop.f32.mrb[28].mxu1 }
 0x189   :  { %v5278_v47 = vpop.f32.mrb[31].mxu0  ;;  %v5387_v51 = vpop.f32.mrb[29].mxu1 }
 0x18a   :  { %v1352_v48 = vadd.f32 %v5276_v43, %v7343_v37  ;;  %v5279_v50 = vadd.f32 %v5278_v47, %v5277_v44  ;;  %v5388_v52 = vadd.f32 %v5387_v51, %v5386_v45  ;;  %v5389_v54 = vpop.f32.mrb[30].mxu1 }
 0x18b   :  { %v5390_v56 = vpop.f32.mrb[31].mxu1 }
 0x18c   :  { %v1355_v55 = vadd.f32 %v5279_v50, %v7343_v37  ;;  %v7389_v58 = vadd.f32 %v5388_v52, %v1352_v48  ;;  %v5391_v59 = vadd.f32 %v5390_v56, %v5389_v54 }
 0x18e   :  { %v5280_v60 = vpop.f32.mrb[32].mxu0  ;;  %v7391_v61 = vadd.f32 %v5391_v59, %v1355_v55 }
 0x18f   :  { %v5281_v62 = vpop.f32.mrb[33].mxu0 }
 0x190   :  { %v5282_v63 = vadd.f32 %v5281_v62, %v5280_v60  ;;  %v5283_v0 = vpop.f32.mrb[34].mxu0  ;;  %v5392_v2 = vpop.f32.mrb[32].mxu1 }
 0x191   :  { %v5284_v3 = vpop.f32.mrb[35].mxu0  ;;  %v5393_v7 = vpop.f32.mrb[33].mxu1 }
 0x192   :  { %v1360_v5 = vadd.f32 %v5282_v63, %v7343_v37  ;;  %v5285_v6 = vadd.f32 %v5284_v3, %v5283_v0  ;;  %v5394_v9 = vadd.f32 %v5393_v7, %v5392_v2  ;;  %v5395_v10 = vpop.f32.mrb[34].mxu1 }
 0x193   :  { %v5396_v13 = vpop.f32.mrb[35].mxu1 }
 0x194   :  { %v1363_v12 = vadd.f32 %v5285_v6, %v7343_v37  ;;  %v7395_v14 = vadd.f32 %v5394_v9, %v1360_v5  ;;  %v5397_v15 = vadd.f32 %v5396_v13, %v5395_v10 }
 0x196   :  { %v5286_v16 = vpop.f32.mrb[36].mxu0  ;;  %v7397_v17 = vadd.f32 %v5397_v15, %v1363_v12 }
 0x197   :  { %v5287_v18 = vpop.f32.mrb[37].mxu0 }
 0x198   :  { %v5288_v20 = vadd.f32 %v5287_v18, %v5286_v16  ;;  %v5289_v21 = vpop.f32.mrb[38].mxu0  ;;  %v5398_v23 = vpop.f32.mrb[36].mxu1 }
 0x199   :  { %v5290_v24 = vpop.f32.mrb[39].mxu0  ;;  %v5399_v28 = vpop.f32.mrb[37].mxu1 }
 0x19a   :  { %v1368_v25 = vadd.f32 %v5288_v20, %v7343_v37  ;;  %v5291_v26 = vadd.f32 %v5290_v24, %v5289_v21  ;;  %v5400_v29 = vadd.f32 %v5399_v28, %v5398_v23  ;;  %v5401_v31 = vpop.f32.mrb[38].mxu1 }
 0x19b   :  { %v5402_v33 = vpop.f32.mrb[39].mxu1 }
 0x19c   :  { %v1371_v32 = vadd.f32 %v5291_v26, %v7343_v37  ;;  %v7401_v34 = vadd.f32 %v5400_v29, %v1368_v25  ;;  %v5403_v35 = vadd.f32 %v5402_v33, %v5401_v31 }
 0x19e   :  { %v5292_v36 = vpop.f32.mrb[40].mxu0  ;;  %v7403_v39 = vadd.f32 %v5403_v35, %v1371_v32 }
 0x19f   :  { %v5293_v40 = vpop.f32.mrb[41].mxu0 }
 0x1a0   :  { %v5294_v42 = vadd.f32 %v5293_v40, %v5292_v36  ;;  %v5295_v43 = vpop.f32.mrb[42].mxu0  ;;  %v5404_v44 = vpop.f32.mrb[40].mxu1 }
 0x1a1   :  { %v5296_v45 = vpop.f32.mrb[43].mxu0  ;;  %v5405_v50 = vpop.f32.mrb[41].mxu1 }
 0x1a2   :  { %v1376_v47 = vadd.f32 %v5294_v42, %v7343_v37  ;;  %v5297_v48 = vadd.f32 %v5296_v45, %v5295_v43  ;;  %v5406_v51 = vadd.f32 %v5405_v50, %v5404_v44  ;;  %v5407_v52 = vpop.f32.mrb[42].mxu1 }
 0x1a3   :  { %v5408_v55 = vpop.f32.mrb[43].mxu1 }
 0x1a4   :  { %v1379_v54 = vadd.f32 %v5297_v48, %v7343_v37  ;;  %v7407_v56 = vadd.f32 %v5406_v51, %v1376_v47  ;;  %v5409_v59 = vadd.f32 %v5408_v55, %v5407_v52 }
 0x1a6   :  { %v5298_v60 = vpop.f32.mrb[44].mxu0  ;;  %v7409_v62 = vadd.f32 %v5409_v59, %v1379_v54 }
 0x1a7   :  { %v5299_v63 = vpop.f32.mrb[45].mxu0 }
 0x1a8   :  { %v5300_v0 = vadd.f32 %v5299_v63, %v5298_v60  ;;  %v5301_v2 = vpop.f32.mrb[46].mxu0  ;;  %v5410_v3 = vpop.f32.mrb[44].mxu1 }
 0x1a9   :  { %v5302_v5 = vpop.f32.mrb[47].mxu0  ;;  %v5411_v9 = vpop.f32.mrb[45].mxu1 }
 0x1aa   :  { %v1384_v6 = vadd.f32 %v5300_v0, %v7343_v37  ;;  %v5303_v7 = vadd.f32 %v5302_v5, %v5301_v2  ;;  %v5412_v10 = vadd.f32 %v5411_v9, %v5410_v3  ;;  %v5413_v12 = vpop.f32.mrb[46].mxu1 }
 0x1ab   :  { %v5414_v15 = vpop.f32.mrb[47].mxu1 }
 0x1ac   :  { %v1387_v13 = vadd.f32 %v5303_v7, %v7343_v37  ;;  %v7413_v16 = vadd.f32 %v5412_v10, %v1384_v6  ;;  %v5415_v18 = vadd.f32 %v5414_v15, %v5413_v12 }
 0x1ae   :  { %v5304_v20 = vpop.f32.mrb[48].mxu0  ;;  %v7415_v21 = vadd.f32 %v5415_v18, %v1387_v13  ;;  %v6077_v13 = vld [vmem:[#allocation8] sm:$0xff]  }
 0x1af   :  { %v5305_v23 = vpop.f32.mrb[49].mxu0  ;;  %5744 = vmatprep.subr.bf16.mxu0 %v6077_v13 }
 0x1b0   :  { %v5306_v24 = vadd.f32 %v5305_v23, %v5304_v20  ;;  %v5307_v25 = vpop.f32.mrb[50].mxu0  ;;  %v5416_v26 = vpop.f32.mrb[48].mxu1  ;;  %5745 = vmatpush3.bf16.msra.mxu0 %v6077_v13 }
 0x1b1   :  { %v5308_v28 = vpop.f32.mrb[51].mxu0  ;;  %v5417_v32 = vpop.f32.mrb[49].mxu1 }
 0x1b2   :  { %v1392_v29 = vadd.f32 %v5306_v24, %v7343_v37  ;;  %v5309_v31 = vadd.f32 %v5308_v28, %v5307_v25  ;;  %v5418_v33 = vadd.f32 %v5417_v32, %v5416_v26  ;;  %v5419_v35 = vpop.f32.mrb[50].mxu1 }
 0x1b3   :  { %v5420_v40 = vpop.f32.mrb[51].mxu1 }
 0x1b4   :  { %v1395_v36 = vadd.f32 %v5309_v31, %v7343_v37  ;;  %v7419_v42 = vadd.f32 %v5418_v33, %v1392_v29  ;;  %v5421_v43 = vadd.f32 %v5420_v40, %v5419_v35 }
 0x1b6   :  { %v5310_v44 = vpop.f32.mrb[52].mxu0  ;;  %v7421_v45 = vadd.f32 %v5421_v43, %v1395_v36 }
 0x1b7   :  { %v5311_v47 = vpop.f32.mrb[53].mxu0 }
 0x1b8   :  { %v5312_v48 = vadd.f32 %v5311_v47, %v5310_v44  ;;  %v5313_v50 = vpop.f32.mrb[54].mxu0  ;;  %v5422_v51 = vpop.f32.mrb[52].mxu1 }
 0x1b9   :  { %v5314_v52 = vpop.f32.mrb[55].mxu0  ;;  %v5423_v59 = vpop.f32.mrb[53].mxu1 }
 0x1ba   :  { %v1400_v54 = vadd.f32 %v5312_v48, %v7343_v37  ;;  %v5315_v55 = vadd.f32 %v5314_v52, %v5313_v50  ;;  %v5424_v60 = vadd.f32 %v5423_v59, %v5422_v51  ;;  %v5425_v63 = vpop.f32.mrb[54].mxu1 }
 0x1bb   :  { %v5426_v2 = vpop.f32.mrb[55].mxu1 }
 0x1bc   :  { %v1403_v0 = vadd.f32 %v5315_v55, %v7343_v37  ;;  %v7425_v3 = vadd.f32 %v5424_v60, %v1400_v54  ;;  %v5427_v5 = vadd.f32 %v5426_v2, %v5425_v63 }
 0x1be   :  { %v5316_v6 = vpop.f32.mrb[56].mxu0  ;;  %v7427_v7 = vadd.f32 %v5427_v5, %v1403_v0 }
 0x1bf   :  { %v5317_v9 = vpop.f32.mrb[57].mxu0 }
 0x1c0   :  { %v5318_v10 = vadd.f32 %v5317_v9, %v5316_v6  ;;  %v5319_v12 = vpop.f32.mrb[58].mxu0  ;;  %v5428_v15 = vpop.f32.mrb[56].mxu1 }
 0x1c1   :  { %v5320_v18 = vpop.f32.mrb[59].mxu0  ;;  %v5429_v24 = vpop.f32.mrb[57].mxu1 }
 0x1c2   :  { %v1408_v20 = vadd.f32 %v5318_v10, %v7343_v37  ;;  %v5321_v23 = vadd.f32 %v5320_v18, %v5319_v12  ;;  %v5430_v25 = vadd.f32 %v5429_v24, %v5428_v15  ;;  %v5431_v26 = vpop.f32.mrb[58].mxu1  ;;  %v6078_v10 = vld [vmem:[#allocation8 + $0x8] sm:$0xff]  }
 0x1c3   :  { %v5432_v29 = vpop.f32.mrb[59].mxu1  ;;  %5746 = vmatprep.subr.bf16.mxu0 %v6078_v10 }
 0x1c4   :  { %v1411_v28 = vadd.f32 %v5321_v23, %v7343_v37  ;;  %v7431_v31 = vadd.f32 %v5430_v25, %v1408_v20  ;;  %v5433_v32 = vadd.f32 %v5432_v29, %v5431_v26  ;;  %5747 = vmatpush3.bf16.msra.mxu0 %v6078_v10  ;;  %v6079_v26 = vld [vmem:[#allocation8 + $0x10] sm:$0xff]  }
 0x1c5   :  { %5748 = vmatprep.subr.bf16.mxu0 %v6079_v26 }
 0x1c6   :  { %v5322_v33 = vpop.f32.mrb[60].mxu0  ;;  %v7433_v35 = vadd.f32 %v5433_v32, %v1411_v28  ;;  %v6080_v28 = vld [vmem:[#allocation8 + $0x18] sm:$0xff]  }
 0x1c7   :  { %v5323_v36 = vpop.f32.mrb[61].mxu0 }
 0x1c8   :  { %v5324_v40 = vadd.f32 %v5323_v36, %v5322_v33  ;;  %v5325_v43 = vpop.f32.mrb[62].mxu0  ;;  %v5434_v44 = vpop.f32.mrb[60].mxu1  ;;  %5749 = vmatpush3.bf16.msra.mxu0 %v6079_v26 }
 0x1c9   :  { %v5326_v47 = vpop.f32.mrb[63].mxu0  ;;  %v5435_v51 = vpop.f32.mrb[61].mxu1  ;;  %5750 = vmatprep.subr.bf16.mxu0 %v6080_v28 }
 0x1ca   :  { %v1416_v48 = vadd.f32 %v5324_v40, %v7343_v37  ;;  %v5327_v50 = vadd.f32 %v5326_v47, %v5325_v43  ;;  %v5436_v52 = vadd.f32 %v5435_v51, %v5434_v44  ;;  %v5437_v54 = vpop.f32.mrb[62].mxu1 }
 0x1cb   :  { %v5438_v59 = vpop.f32.mrb[63].mxu1 }
 0x1cc   :  { %v1419_v55 = vadd.f32 %v5327_v50, %v7343_v37  ;;  %v7437_v60 = vadd.f32 %v5436_v52, %v1416_v48  ;;  %v5439_v63 = vadd.f32 %v5438_v59, %v5437_v54  ;;  %5751 = vmatpush3.bf16.msra.mxu0 %v6080_v28 }
 0x1ce   :  { %v5456_v0 = vpop.f32.mrb[64].mxu0  ;;  %v7439_v2 = vadd.f32 %v5439_v63, %v1419_v55 }
 0x1cf   :  { %v5457_v5 = vpop.f32.mrb[65].mxu0 }
 0x1d0   :  { %v5458_v6 = vadd.f32 %v5457_v5, %v5456_v0  ;;  %v5459_v9 = vpop.f32.mrb[66].mxu0  ;;  %v5666_v13 = vpop.f32.mrb[64].mxu1  ;;  %v6082_v0 = vld [vmem:[#allocation8 + $0x28] sm:$0xff]  }
 0x1d1   :  { %v5460_v12 = vpop.f32.mrb[67].mxu0  ;;  %v1778_v20 = vpop.f32.mrb[65].mxu1 }
 0x1d2   :  { %v5461_v15 = vadd.f32 %v5460_v12, %v5459_v9  ;;  %v1618_v18 = vadd.f32 %v5458_v6, %v7347_v53  ;;  %v5667_v23 = vpop.f32.mrb[66].mxu1  ;;  %v6081_v53 = vld [vmem:[#allocation8 + $0x20] sm:$0xff]  }
 0x1d3   :  { %v1781_v25 = vpop.f32.mrb[67].mxu1  ;;  %5752 = vmatprep.subr.bf16.mxu0 %v6081_v53 }
 0x1d4   :  { %v1779_v37 = vadd.f32 %v1778_v20, %v1618_v18  ;;  %v1621_v24 = vadd.f32 %v5461_v15, %v7349_v57  ;;  %5753 = vmatpush3.bf16.msra.mxu0 %v6081_v53 }
 0x1d5   :  { %5754 = vmatprep.subr.bf16.mxu0 %v6082_v0 }
 0x1d6   :  { %v1782_v29 = vadd.f32 %v1781_v25, %v1621_v24  ;;  %v5462_v32 = vpop.f32.mrb[68].mxu0  ;;  %v1905_v36 = vmax.f32 %v1779_v37, 0.0 }
 0x1d7   :  { %v5463_v33 = vpop.f32.mrb[69].mxu0 }
 0x1d8   :  { %v1906_v40 = vmax.f32 %v1782_v29, 0.0  ;;  %v5464_v43 = vadd.f32 %v5463_v33, %v5462_v32  ;;  %v5465_v44 = vpop.f32.mrb[70].mxu0  ;;  %v5670_v48 = vpop.f32.mrb[68].mxu1  ;;  %5755 = vmatpush3.bf16.msra.mxu0 %v6082_v0  ;;  %v6084_v32 = vld [vmem:[#allocation8 + $0x38] sm:$0xff]  }
 0x1d9   :  { %v5466_v47 = vpop.f32.mrb[71].mxu0  ;;  %v1794_v52 = vpop.f32.mrb[69].mxu1 }
 0x1da   :  { %v1937_v50 = vpack.c.bf16 %v1906_v40, %v1905_v36  ;;  %v1626_v51 = vadd.f32 %v5464_v43, %v7353_v8  ;;  %v5467_v57 = vadd.f32 %v5466_v47, %v5465_v44  ;;  %v5671_v54 = vpop.f32.mrb[70].mxu1  ;;  %v6083_v8 = vld [vmem:[#allocation8 + $0x30] sm:$0xff]  }
 0x1db   :  { %v1797_v63 = vpop.f32.mrb[71].mxu1  ;;  %5756 = vmatprep.subr.bf16.mxu0 %v6083_v8 }
 0x1dc   :  { %v1787_v55 = vadd.f32 %v5666_v13, %v1626_v51  ;;  %v1629_v59 = vadd.f32 %v5467_v57, %v7355_v11  ;;  %5712 = vmatprep.mubr.bf16.mxu1 %v1937_v50  ;;  %5757 = vmatpush3.bf16.msra.mxu0 %v6083_v8 }
 0x1dd   :  { %5758 = vmatprep.subr.bf16.mxu0 %v6084_v32 }
 0x1de   :  { %v1790_v5 = vadd.f32 %v5667_v23, %v1629_v59  ;;  %v5468_v6 = vpop.f32.mrb[72].mxu0  ;;  %v1907_v10 = vmax.f32 %v1787_v55, 0.0 }
 0x1df   :  { %v5469_v9 = vpop.f32.mrb[73].mxu0 }
 0x1e0   :  { %v1908_v12 = vmax.f32 %v1790_v5, 0.0  ;;  %v5470_v15 = vadd.f32 %v5469_v9, %v5468_v6  ;;  %v5471_v18 = vpop.f32.mrb[74].mxu0  ;;  %v7445_v37 = vpop.f32.mrb[72].mxu1  ;;  %5759 = vmatpush3.bf16.msra.mxu0 %v6084_v32 }
 0x1e1   :  { %v5472_v20 = vpop.f32.mrb[75].mxu0  ;;  %v1810_v25 = vpop.f32.mrb[73].mxu1 }
 0x1e2   :  { %v1938_v13 = vpack.c.bf16 %v1908_v12, %v1907_v10  ;;  %v5473_v24 = vadd.f32 %v5472_v20, %v5471_v18  ;;  %v1634_v11 = vadd.f32 %v5470_v15, %v7359_v27  ;;  %v7448_v26 = vpop.f32.mrb[74].mxu1 }
 0x1e3   :  { %v1813_v29 = vpop.f32.mrb[75].mxu1 }
 0x1e4   :  { %v1795_v23 = vadd.f32 %v1794_v52, %v1634_v11  ;;  %5713 = vmatmul.mubr.bf16.vlgmr.msra.gmra.mrb[96].mxu1 %v1938_v13  ;;  %v1637_v28 = vadd.f32 %v5473_v24, %v7361_v30 }
 0x1e6   :  { %v1798_v33 = vadd.f32 %v1797_v63, %v1637_v28  ;;  %v5474_v36 = vpop.f32.mrb[76].mxu0  ;;  %v1909_v43 = vmax.f32 %v1795_v23, 0.0 }
 0x1e7   :  { %v5475_v40 = vpop.f32.mrb[77].mxu0 }
 0x1e8   :  { %v1910_v44 = vmax.f32 %v1798_v33, 0.0  ;;  %v5476_v53 = vadd.f32 %v5475_v40, %v5474_v36  ;;  %v5477_v47 = vpop.f32.mrb[78].mxu0  ;;  %v7451_v50 = vpop.f32.mrb[76].mxu1 }
 0x1e9   :  { %v5478_v27 = vpop.f32.mrb[79].mxu0  ;;  %v1826_v30 = vpop.f32.mrb[77].mxu1 }
 0x1ea   :  { %v1939_v51 = vpack.c.bf16 %v1910_v44, %v1909_v43  ;;  %v1642_v57 = vadd.f32 %v5476_v53, %v7365_v46  ;;  %v5479_v52 = vadd.f32 %v5478_v27, %v5477_v47  ;;  %v7454_v55 = vpop.f32.mrb[78].mxu1 }
 0x1eb   :  { %v1829_v0 = vpop.f32.mrb[79].mxu1 }
 0x1ec   :  { %v1803_v59 = vadd.f32 %v5670_v48, %v1642_v57  ;;  %v1645_v63 = vadd.f32 %v5479_v52, %v7367_v49  ;;  %5716 = vmatprep.mubr.bf16.mxu1 %v1939_v51 }
 0x1ee   :  { %v1806_v5 = vadd.f32 %v5671_v54, %v1645_v63  ;;  %v5480_v6 = vpop.f32.mrb[80].mxu0  ;;  %v1911_v10 = vmax.f32 %v1803_v59, 0.0 }
 0x1ef   :  { %v5481_v9 = vpop.f32.mrb[81].mxu0 }
 0x1f0   :  { %v1912_v12 = vmax.f32 %v1806_v5, 0.0  ;;  %v5482_v15 = vadd.f32 %v5481_v9, %v5480_v6  ;;  %v5483_v18 = vpop.f32.mrb[82].mxu0  ;;  %v7457_v20 = vpop.f32.mrb[80].mxu1 }
 0x1f1   :  { %v5484_v8 = vpop.f32.mrb[83].mxu0  ;;  %v7460_v11 = vpop.f32.mrb[81].mxu1 }
 0x1f2   :  { %v5485_v46 = vadd.f32 %v5484_v8, %v5483_v18  ;;  %v1650_v13 = vadd.f32 %v5482_v15, %v7371_v1  ;;  %v1940_v24 = vpack.c.bf16 %v1912_v12, %v1911_v10  ;;  %v7462_v48 = vpop.f32.mrb[82].mxu1 }
 0x1f3   :  { %v7465_v23 = vpop.f32.mrb[83].mxu1 }
 0x1f4   :  { %v1811_v49 = vadd.f32 %v1810_v25, %v1650_v13  ;;  %5717 = vmatmul.mubr.bf16.gmra.mrb[100].mxu1 %v1940_v24  ;;  %v1653_v54 = vadd.f32 %v5485_v46, %v7373_v4 }
 0x1f6   :  { %v1814_v28 = vadd.f32 %v1813_v29, %v1653_v54  ;;  %v5486_v32 = vpop.f32.mrb[84].mxu0  ;;  %v1913_v36 = vmax.f32 %v1811_v49, 0.0 }
 0x1f7   :  { %v5487_v33 = vpop.f32.mrb[85].mxu0 }
 0x1f8   :  { %v1914_v40 = vmax.f32 %v1814_v28, 0.0  ;;  %v5488_v43 = vadd.f32 %v5487_v33, %v5486_v32  ;;  %v5489_v44 = vpop.f32.mrb[86].mxu0  ;;  %v7467_v1 = vpop.f32.mrb[84].mxu1 }
 0x1f9   :  { %v5490_v53 = vpop.f32.mrb[87].mxu0  ;;  %v7470_v25 = vpop.f32.mrb[85].mxu1 }
 0x1fa   :  { %v1941_v47 = vpack.c.bf16 %v1914_v40, %v1913_v36  ;;  %v1658_v27 = vadd.f32 %v5488_v43, %v7377_v19  ;;  %v5491_v51 = vadd.f32 %v5490_v53, %v5489_v44  ;;  %v7472_v57 = vpop.f32.mrb[86].mxu1 }
 0x1fb   :  { %v7476_v52 = vpop.f32.mrb[87].mxu1 }
 0x1fc   :  { %v1819_v4 = vadd.f32 %v7445_v37, %v1658_v27  ;;  %v1661_v29 = vadd.f32 %v5491_v51, %v7379_v22  ;;  %5720 = vmatprep.mubr.bf16.mxu1 %v1941_v47 }
 0x1fe   :  { %v1822_v59 = vadd.f32 %v7448_v26, %v1661_v29  ;;  %v5492_v63 = vpop.f32.mrb[88].mxu0  ;;  %v1915_v6 = vmax.f32 %v1819_v4, 0.0 }
 0x1ff   :  { %v5493_v5 = vpop.f32.mrb[89].mxu0 }
 0x200   :  { %v1916_v9 = vmax.f32 %v1822_v59, 0.0  ;;  %v5494_v10 = vadd.f32 %v5493_v5, %v5492_v63  ;;  %v5495_v19 = vpop.f32.mrb[90].mxu0  ;;  %v7479_v15 = vpop.f32.mrb[88].mxu1 }
 0x201   :  { %v5496_v12 = vpop.f32.mrb[91].mxu0  ;;  %v7482_v46 = vpop.f32.mrb[89].mxu1 }
 0x202   :  { %v5497_v18 = vadd.f32 %v5496_v12, %v5495_v19  ;;  %v1666_v8 = vadd.f32 %v5494_v10, %v7383_v38  ;;  %v1942_v37 = vpack.c.bf16 %v1916_v9, %v1915_v6  ;;  %v7484_v22 = vpop.f32.mrb[90].mxu1 }
 0x203   :  { %v7487_v24 = vpop.f32.mrb[91].mxu1 }
 0x204   :  { %v1827_v13 = vadd.f32 %v1826_v30, %v1666_v8  ;;  %5721 = vmatmul.mubr.bf16.gmra.mrb[104].mxu1 %v1942_v37  ;;  %v1669_v26 = vadd.f32 %v5497_v18, %v7385_v41 }
 0x206   :  { %v1830_v49 = vadd.f32 %v1829_v0, %v1669_v26  ;;  %v5498_v54 = vpop.f32.mrb[92].mxu0  ;;  %v1917_v32 = vmax.f32 %v1827_v13, 0.0 }
 0x207   :  { %v5499_v28 = vpop.f32.mrb[93].mxu0 }
 0x208   :  { %v1918_v33 = vmax.f32 %v1830_v49, 0.0  ;;  %v5500_v36 = vadd.f32 %v5499_v28, %v5498_v54  ;;  %v5501_v40 = vpop.f32.mrb[94].mxu0  ;;  %v7489_v38 = vpop.f32.mrb[92].mxu1 }
 0x209   :  { %v5502_v43 = vpop.f32.mrb[95].mxu0  ;;  %v7492_v30 = vpop.f32.mrb[93].mxu1 }
 0x20a   :  { %v1943_v44 = vpack.c.bf16 %v1918_v33, %v1917_v32  ;;  %v1674_v53 = vadd.f32 %v5500_v36, %v7389_v58  ;;  %v5503_v47 = vadd.f32 %v5502_v43, %v5501_v40  ;;  %v7494_v27 = vpop.f32.mrb[94].mxu1 }
 0x20b   :  { %v7498_v51 = vpop.f32.mrb[95].mxu1 }
 0x20c   :  { %v1835_v41 = vadd.f32 %v7451_v50, %v1674_v53  ;;  %v1677_v0 = vadd.f32 %v5503_v47, %v7391_v61  ;;  %5724 = vmatprep.mubr.bf16.mxu1 %v1943_v44 }
 0x20e   :  { %v1838_v4 = vadd.f32 %v7454_v55, %v1677_v0  ;;  %v5504_v29 = vpop.f32.mrb[96].mxu0  ;;  %v1919_v63 = vmax.f32 %v1835_v41, 0.0 }
 0x20f   :  { %v5505_v59 = vpop.f32.mrb[97].mxu0 }
 0x210   :  { %v1920_v5 = vmax.f32 %v1838_v4, 0.0  ;;  %v5506_v6 = vadd.f32 %v5505_v59, %v5504_v29  ;;  %v5507_v58 = vpop.f32.mrb[98].mxu0 }
 0x211   :  { %v5508_v9 = vpop.f32.mrb[99].mxu0 }
 0x212   :  { %v5509_v10 = vadd.f32 %v5508_v9, %v5507_v58  ;;  %v1682_v19 = vadd.f32 %v5506_v6, %v7395_v14  ;;  %v1944_v12 = vpack.c.bf16 %v1920_v5, %v1919_v63 }
 0x214   :  { %v1843_v50 = vadd.f32 %v7460_v11, %v1682_v19  ;;  %5725 = vmatmul.mubr.bf16.gmra.mrb[108].mxu1 %v1944_v12  ;;  %v1685_v61 = vadd.f32 %v5509_v10, %v7397_v17 }
 0x216   :  { %v1846_v18 = vadd.f32 %v7465_v23, %v1685_v61  ;;  %v5510_v8 = vpop.f32.mrb[100].mxu0  ;;  %v1921_v37 = vmax.f32 %v1843_v50, 0.0 }
 0x217   :  { %v5511_v55 = vpop.f32.mrb[101].mxu0 }
 0x218   :  { %v1922_v13 = vmax.f32 %v1846_v18, 0.0  ;;  %v5512_v26 = vadd.f32 %v5511_v55, %v5510_v8  ;;  %v5513_v49 = vpop.f32.mrb[102].mxu0 }
 0x219   :  { %v5514_v54 = vpop.f32.mrb[103].mxu0 }
 0x21a   :  { %v1945_v28 = vpack.c.bf16 %v1922_v13, %v1921_v37  ;;  %v1690_v32 = vadd.f32 %v5512_v26, %v7401_v34  ;;  %v5515_v33 = vadd.f32 %v5514_v54, %v5513_v49 }
 0x21c   :  { %v1851_v14 = vadd.f32 %v7457_v20, %v1690_v32  ;;  %v1693_v11 = vadd.f32 %v5515_v33, %v7403_v39  ;;  %5728 = vmatprep.mubr.bf16.mxu1 %v1945_v28 }
 0x21e   :  { %v1854_v17 = vadd.f32 %v7462_v48, %v1693_v11  ;;  %v5516_v36 = vpop.f32.mrb[104].mxu0  ;;  %v1923_v40 = vmax.f32 %v1851_v14, 0.0 }
 0x21f   :  { %v5517_v23 = vpop.f32.mrb[105].mxu0 }
 0x220   :  { %v1924_v43 = vmax.f32 %v1854_v17, 0.0  ;;  %v5518_v44 = vadd.f32 %v5517_v23, %v5516_v36  ;;  %v5519_v53 = vpop.f32.mrb[106].mxu0 }
 0x221   :  { %v5520_v47 = vpop.f32.mrb[107].mxu0 }
 0x222   :  { %v5521_v41 = vadd.f32 %v5520_v47, %v5519_v53  ;;  %v1698_v0 = vadd.f32 %v5518_v44, %v7407_v56  ;;  %v1946_v4 = vpack.c.bf16 %v1924_v43, %v1923_v40 }
 0x224   :  { %v1859_v34 = vadd.f32 %v7470_v25, %v1698_v0  ;;  %5729 = vmatmul.mubr.bf16.gmra.mrb[112].mxu1 %v1946_v4  ;;  %v1701_v20 = vadd.f32 %v5521_v41, %v7409_v62 }
 0x226   :  { %v1862_v39 = vadd.f32 %v7476_v52, %v1701_v20  ;;  %v5522_v29 = vpop.f32.mrb[108].mxu0  ;;  %v1925_v59 = vmax.f32 %v1859_v34, 0.0 }
 0x227   :  { %v5523_v48 = vpop.f32.mrb[109].mxu0 }
 0x228   :  { %v1926_v63 = vmax.f32 %v1862_v39, 0.0  ;;  %v5524_v5 = vadd.f32 %v5523_v48, %v5522_v29  ;;  %v5525_v6 = vpop.f32.mrb[110].mxu0 }
 0x229   :  { %v5526_v58 = vpop.f32.mrb[111].mxu0 }
 0x22a   :  { %v1947_v9 = vpack.c.bf16 %v1926_v63, %v1925_v59  ;;  %v1706_v10 = vadd.f32 %v5524_v5, %v7413_v16  ;;  %v5527_v19 = vadd.f32 %v5526_v58, %v5525_v6 }
 0x22c   :  { %v1867_v56 = vadd.f32 %v7467_v1, %v1706_v10  ;;  %v1709_v25 = vadd.f32 %v5527_v19, %v7415_v21  ;;  %5732 = vmatprep.mubr.bf16.mxu1 %v1947_v9  ;;  %v6085_v10 = vld [vmem:[#allocation10] ss:$28 sps:$4 sm:$0xff]  }
 0x22d   :  { %v6087_v19 = vld [vmem:[#allocation10 + $0x4] ss:$28 sps:$4 sm:$0xff]  }
 0x22e   :  { %v1870_v62 = vadd.f32 %v7472_v57, %v1709_v25  ;;  %v5528_v12 = vpop.f32.mrb[112].mxu0  ;;  %v1927_v50 = vmax.f32 %v1867_v56, 0.0  ;;  %v6090_v56 = vld [vmem:[#allocation10 + $0x3c] ss:$28 sps:$4 sm:$0xff]   ;;  %2870 = vmatprep.subr.bf16.mxu1 %v6087_v19 }
 0x22f   :  { %v5529_v52 = vpop.f32.mrb[113].mxu0  ;;  %2871 = vmatpush1.bf16.msra.mxu1 %v6085_v10  ;;  %v6088_v25 = vld [vmem:[#allocation10 + $0x38] ss:$28 sps:$4 sm:$0xff]  }
 0x230   :  { %v1928_v61 = vmax.f32 %v1870_v62, 0.0  ;;  %v5530_v18 = vadd.f32 %v5529_v52, %v5528_v12  ;;  %v5531_v8 = vpop.f32.mrb[114].mxu0  ;;  %v6102_v62 = vld [vmem:[#allocation10 + $0xc] ss:$28 sps:$4 sm:$0xff]   ;;  %2872 = vmatprep.subr.bf16.mxu1 %v6090_v56 }
 0x231   :  { %v5532_v55 = vpop.f32.mrb[115].mxu0  ;;  %3063 = vmatprep.subr.bf16.mxu0 %v6102_v62  ;;  %v6096_v52 = vld [vmem:[#allocation10 + $0xac] ss:$28 sps:$4 sm:$0xff]  }
 0x232   :  { %v5533_v37 = vadd.f32 %v5532_v55, %v5531_v8  ;;  %v1714_v13 = vadd.f32 %v5530_v18, %v7419_v42  ;;  %v1948_v26 = vpack.c.bf16 %v1928_v61, %v1927_v50 }
 0x233   :  { %2873 = vmatpush1.bf16.msra.mxu1 %v6088_v25 }
 0x234   :  { %v1875_v16 = vadd.f32 %v7482_v46, %v1714_v13  ;;  %5733 = vmatmul.mubr.bf16.gmra.mrb[116].mxu1 %v1948_v26  ;;  %v1717_v1 = vadd.f32 %v5533_v37, %v7421_v45  ;;  %v6094_v13 = vld [vmem:[#allocation10 + $0xa8] ss:$28 sps:$4 sm:$0xff]  }
 0x236   :  { %v1878_v21 = vadd.f32 %v7487_v24, %v1717_v1  ;;  %v5534_v49 = vpop.f32.mrb[116].mxu0  ;;  %v1929_v54 = vmax.f32 %v1875_v16, 0.0  ;;  %v6099_v16 = vld [vmem:[#allocation10 + $0xe4] ss:$28 sps:$4 sm:$0xff]  }
 0x237   :  { %v5535_v57 = vpop.f32.mrb[117].mxu0 }
 0x238   :  { %v1930_v28 = vmax.f32 %v1878_v21, 0.0  ;;  %v5536_v32 = vadd.f32 %v5535_v57, %v5534_v49  ;;  %v5537_v33 = vpop.f32.mrb[118].mxu0  ;;  %v6100_v21 = vld [vmem:[#allocation10 + $0x8] ss:$28 sps:$4 sm:$0xff]   ;;  %v6097_v57 = vld [vmem:[#allocation10 + $0xe0] ss:$28 sps:$4 sm:$0xff]  }
 0x239   :  { %v5538_v14 = vpop.f32.mrb[119].mxu0  ;;  %v6105_v49 = vld [vmem:[#allocation10 + $0x44] ss:$28 sps:$4 sm:$0xff]  }
 0x23a   :  { %v1949_v11 = vpack.c.bf16 %v1930_v28, %v1929_v54  ;;  %v1722_v17 = vadd.f32 %v5536_v32, %v7425_v3  ;;  %v5539_v36 = vadd.f32 %v5538_v14, %v5537_v33  ;;  %v6108_v54 = vld [vmem:[#allocation10 + $0x11c] ss:$28 sps:$4 sm:$0xff]   ;;  %v6117_v14 = vld [vmem:[#allocation10 + $0x154] ss:$28 sps:$4 sm:$0xff]  }
 0x23b   :  { %v6103_v28 = vld [vmem:[#allocation10 + $0x40] ss:$28 sps:$4 sm:$0xff]   ;;  %v6106_v33 = vld [vmem:[#allocation10 + $0x118] ss:$28 sps:$4 sm:$0xff]  }
 0x23c   :  { %v1883_v42 = vadd.f32 %v7479_v15, %v1722_v17  ;;  %v1725_v46 = vadd.f32 %v5539_v36, %v7427_v7  ;;  %5736 = vmatprep.mubr.bf16.mxu1 %v1949_v11  ;;  %v6111_v32 = vld [vmem:[#allocation10 + $0x7c] ss:$28 sps:$4 sm:$0xff]   ;;  %v6114_v17 = vld [vmem:[#allocation10 + $0xb4] ss:$28 sps:$4 sm:$0xff]  }
 0x23d   :  { %v6109_v11 = vld [vmem:[#allocation10 + $0x78] ss:$28 sps:$4 sm:$0xff]  }
 0x23e   :  { %v1886_v45 = vadd.f32 %v7484_v22, %v1725_v46  ;;  %v5540_v23 = vpop.f32.mrb[120].mxu0  ;;  %v1931_v40 = vmax.f32 %v1883_v42, 0.0  ;;  %v6115_v42 = vld [vmem:[#allocation10 + $0x150] ss:$28 sps:$4 sm:$0xff]  }
 0x23f   :  { %v5541_v24 = vpop.f32.mrb[121].mxu0 }
 0x240   :  { %v1932_v43 = vmax.f32 %v1886_v45, 0.0  ;;  %v5542_v44 = vadd.f32 %v5541_v24, %v5540_v23  ;;  %v5543_v53 = vpop.f32.mrb[122].mxu0  ;;  %v6112_v23 = vld [vmem:[#allocation10 + $0xb0] ss:$28 sps:$4 sm:$0xff]  }
 0x241   :  { %v5544_v47 = vpop.f32.mrb[123].mxu0 }
 0x242   :  { %v5545_v41 = vadd.f32 %v5544_v47, %v5543_v53  ;;  %v1730_v0 = vadd.f32 %v5542_v44, %v7431_v31  ;;  %v1950_v4 = vpack.c.bf16 %v1932_v43, %v1931_v40  ;;  %v6120_v44 = vld [vmem:[#allocation10 + $0xec] ss:$28 sps:$4 sm:$0xff]  }
 0x244   :  { %v1891_v3 = vadd.f32 %v7492_v30, %v1730_v0  ;;  %5737 = vmatmul.mubr.bf16.gmra.mrb[120].mxu1 %v1950_v4  ;;  %v1733_v15 = vadd.f32 %v5545_v41, %v7433_v35  ;;  %v6118_v4 = vld [vmem:[#allocation10 + $0xe8] ss:$28 sps:$4 sm:$0xff]  }
 0x246   :  { %v1894_v7 = vadd.f32 %v7498_v51, %v1733_v15  ;;  %v5546_v34 = vpop.f32.mrb[124].mxu0  ;;  %v1933_v20 = vmax.f32 %v1891_v3, 0.0  ;;  %v6123_v3 = vld [vmem:[#allocation10 + $0x124] ss:$28 sps:$4 sm:$0xff]  }
 0x247   :  { %v5547_v22 = vpop.f32.mrb[125].mxu0  ;;  %v6121_v15 = vld [vmem:[#allocation10 + $0x120] ss:$28 sps:$4 sm:$0xff]  }
 0x248   :  { %v1934_v39 = vmax.f32 %v1894_v7, 0.0  ;;  %v5548_v29 = vadd.f32 %v5547_v22, %v5546_v34  ;;  %v5549_v48 = vpop.f32.mrb[126].mxu0 }
 0x249   :  { %v5550_v59 = vpop.f32.mrb[127].mxu0 }
 0x24a   :  { %v1951_v63 = vpack.c.bf16 %v1934_v39, %v1933_v20  ;;  %v1738_v5 = vadd.f32 %v5548_v29, %v7437_v60  ;;  %v5551_v6 = vadd.f32 %v5550_v59, %v5549_v48  ;;  %v6093_v60 = vld [vmem:[#allocation10 + $0x74] ss:$28 sps:$4 sm:$0xff]  }
 0x24b   :  { %2874 = vmatprep.subr.bf16.mxu1 %v6093_v60 }
 0x24c   :  { %v1899_v31 = vadd.f32 %v7489_v38, %v1738_v5  ;;  %v1741_v30 = vadd.f32 %v5551_v6, %v7439_v2  ;;  %5740 = vmatprep.mubr.bf16.mxu1 %v1951_v63  ;;  %v7536_v2 = vld [vmem:[%s8622_s4] ss:$0 sm:$0xff] }
 0x24e   :  { %v1902_v35 = vadd.f32 %v7494_v27, %v1741_v30  ;;  %v1935_v58 = vmax.f32 %v1899_v31, 0.0  ;;  %v6091_v27 = vld [vmem:[#allocation10 + $0x70] ss:$28 sps:$4 sm:$0xff]  }
 0x24f   :  { %2875 = vmatpush1.bf16.msra.mxu1 %v6091_v27 }
 0x250   :  { %v1936_v51 = vmax.f32 %v1902_v35, 0.0  ;;  %2876 = vmatprep.subr.bf16.mxu1 %v6096_v52 }
 0x252   :  { %v1952_v9 = vpack.c.bf16 %v1936_v51, %v1935_v58 }
 0x253   :  { %2877 = vmatpush1.bf16.msra.mxu1 %v6094_v13 }
 0x254   :  { %5741 = vmatmul.mubr.bf16.gmra.mrb[124].mxu1 %v1952_v9  ;;  %2878 = vmatprep.subr.bf16.mxu1 %v6099_v16 }
 0x257   :  { %2879 = vmatpush1.bf16.msra.mxu1 %v6097_v57 }
 0x258   :  { %2880 = vmatprep.subr.bf16.mxu1 %v6108_v54  ;;  %v6129_v54 = vld [vmem:[#allocation10 + $0x15c] ss:$28 sps:$4 sm:$0xff]  }
 0x25b   :  { %2881 = vmatpush1.bf16.msra.mxu1 %v6106_v33 }
 0x25c   :  { %2882 = vmatprep.subr.bf16.mxu1 %v6117_v14  ;;  %v6126_v14 = vld [vmem:[#allocation10 + $0x18c] ss:$28 sps:$4 sm:$0xff]  }
 0x25f   :  { %2883 = vmatpush1.bf16.msra.mxu1 %v6115_v42  ;;  %v6130_v42 = vld [vmem:[#allocation10 + $0x190] ss:$28 sps:$4 sm:$0xff]  }
 0x260   :  { %2884 = vmatprep.subr.bf16.mxu1 %v6126_v14 }
 0x2b7   :  { %v5714_v38 = vpop.f32.mrb[96].mxu1 }
 0x2b8   :  { %v2058_v12 = vpop.f32.mrb[97].mxu1  ;;  %v2067_v61 = vadd.f32 %v5714_v38, %v7536_v2 }
 0x2b9   :  { %v5715_v50 = vpop.f32.mrb[98].mxu1  ;;  %v2059_v55 = vadd.f32 %v7536_v2, %v2058_v12 }
 0x2ba   :  { %v2070_v18 = vadd.f32 %v5715_v50, %v7536_v2  ;;  %v2061_v8 = vpop.f32.mrb[99].mxu1 }
 0x2bb   :  { %v2062_v37 = vadd.f32 %v7536_v2, %v2061_v8 }
 0x2bc   :  { %v2186_v26 = vpack.c.bf16 %v2070_v18, %v2067_v61 }
 0x2bd   :  { %v2185_v1 = vpack.c.bf16 %v2062_v37, %v2059_v55 }
 0x2bf   :  { %5760 = vmatprep.mubr.bf16.mxu0 %v2185_v1 }
 0x2c0   :  { %5761 = vmatmul.mubr.bf16.vlgmr.msra.gmra.mrb[128].mxu0 %v2186_v26 }
 0x2c1   :  { %3064 = vmatpush1.bf16.msra.mxu0 %v6100_v21 }
 0x2c2   :  { %3065 = vmatprep.subr.bf16.mxu0 %v6105_v49 }
 0x2c5   :  { %3066 = vmatpush1.bf16.msra.mxu0 %v6103_v28  ;;  %v6127_v28 = vld [vmem:[#allocation10 + $0x158] ss:$28 sps:$4 sm:$0xff]  }
 0x2c6   :  { %3067 = vmatprep.subr.bf16.mxu0 %v6111_v32 }
 0x2c7   :  { %v5718_v36 = vpop.f32.mrb[100].mxu1 }
 0x2c8   :  { %v2074_v46 = vpop.f32.mrb[101].mxu1  ;;  %v2083_v24 = vadd.f32 %v5718_v36, %v7536_v2  ;;  %v6124_v36 = vld [vmem:[#allocation10 + $0x188] ss:$28 sps:$4 sm:$0xff]  }
 0x2c9   :  { %v5719_v45 = vpop.f32.mrb[102].mxu1  ;;  %3068 = vmatpush1.bf16.msra.mxu0 %v6109_v11  ;;  %v2075_v53 = vadd.f32 %v7536_v2, %v2074_v46  ;;  %v6132_v11 = vld [vmem:[#allocation10 + $0x194] ss:$28 sps:$4 sm:$0xff]   ;;  %2885 = vmatpush1.bf16.msra.mxu1 %v6124_v36  ;;  %v6151_v36 = vld [vmem:[#allocation10 + $0x12c] ss:$28 sps:$4 sm:$0xff]  }
 0x2ca   :  { %v2086_v40 = vadd.f32 %v5719_v45, %v7536_v2  ;;  %v2077_v43 = vpop.f32.mrb[103].mxu1  ;;  %3069 = vmatprep.subr.bf16.mxu0 %v6114_v17 }
 0x2cb   :  { %v2078_v47 = vadd.f32 %v7536_v2, %v2077_v43 }
 0x2cc   :  { %v2188_v41 = vpack.c.bf16 %v2086_v40, %v2083_v24 }
 0x2cd   :  { %v2187_v0 = vpack.c.bf16 %v2078_v47, %v2075_v53  ;;  %3070 = vmatpush1.bf16.msra.mxu0 %v6112_v23  ;;  %v6135_v47 = vld [vmem:[#allocation10 + $0x14] ss:$28 sps:$4 sm:$0xff]  }
 0x2ce   :  { %3071 = vmatprep.subr.bf16.mxu0 %v6120_v44  ;;  %v7211_v44 = vmov 0   ;;  %3256 = vmatprep.subr.bf16.mxu1 %v6135_v47  ;;  %v6160_v47 = vld [vmem:[#allocation10 + $0x19c] ss:$28 sps:$4 sm:$0xff]  }
 0x2cf   :  { %5764 = vmatprep.mubr.bf16.mxu0 %v2187_v0  ;;  %2902 = vmatprep.mubr.bf16.mxu1 %v7211_v44 }
 0x2d0   :  { %5765 = vmatmul.mubr.bf16.gmra.mrb[132].mxu0 %v2188_v41 }
 0x2d1   :  { %3072 = vmatpush1.bf16.msra.mxu0 %v6118_v4 }
 0x2d2   :  { %3073 = vmatprep.subr.bf16.mxu0 %v6123_v3 }
 0x2d5   :  { %3074 = vmatpush1.bf16.msra.mxu0 %v6121_v15 }
 0x2d6   :  { %3075 = vmatprep.subr.bf16.mxu0 %v6129_v54  ;;  %v6147_v54 = vld [vmem:[#allocation10 + $0xf4] ss:$28 sps:$4 sm:$0xff]  }
 0x2d7   :  { %v5722_v7 = vpop.f32.mrb[104].mxu1 }
 0x2d8   :  { %v2090_v34 = vpop.f32.mrb[105].mxu1  ;;  %v2099_v20 = vadd.f32 %v5722_v7, %v7536_v2 }
 0x2d9   :  { %v5723_v22 = vpop.f32.mrb[106].mxu1  ;;  %v2091_v48 = vadd.f32 %v7536_v2, %v2090_v34  ;;  %3076 = vmatpush1.bf16.msra.mxu0 %v6127_v28 }
 0x2da   :  { %v2102_v39 = vadd.f32 %v5723_v22, %v7536_v2  ;;  %v2093_v29 = vpop.f32.mrb[107].mxu1  ;;  %3077 = vmatprep.subr.bf16.mxu0 %v6132_v11  ;;  %v6145_v11 = vld [vmem:[#allocation10 + $0xf0] ss:$28 sps:$4 sm:$0xff]  }
 0x2db   :  { %v2094_v59 = vadd.f32 %v7536_v2, %v2093_v29  ;;  %v6148_v29 = vld [vmem:[#allocation10 + $0x18] ss:$28 sps:$4 sm:$0xff]  }
 0x2dc   :  { %v2190_v63 = vpack.c.bf16 %v2102_v39, %v2099_v20 }
 0x2dd   :  { %v2189_v5 = vpack.c.bf16 %v2094_v59, %v2091_v48  ;;  %3078 = vmatpush1.bf16.msra.mxu0 %v6130_v42  ;;  %v7575_v48 = vld [vmem:[%s8624_s6] ss:$0 sm:$0xff]  ;;  %v6162_v42 = vld [vmem:[#allocation10 + $0x130] ss:$28 sps:$4 sm:$0xff]  }
 0x2de   :  { %5792 = vmatprep.subr.bf16.mxu0 %v6148_v29 }
 0x2df   :  { %5768 = vmatprep.mubr.bf16.mxu0 %v2189_v5 }
 0x2e0   :  { %5769 = vmatmul.mubr.bf16.gmra.mrb[136].mxu0 %v2190_v63 }
 0x2e7   :  { %v5726_v6 = vpop.f32.mrb[108].mxu1 }
 0x2e8   :  { %v2106_v31 = vpop.f32.mrb[109].mxu1  ;;  %v2115_v35 = vadd.f32 %v5726_v6, %v7536_v2 }
 0x2e9   :  { %v5727_v30 = vpop.f32.mrb[110].mxu1  ;;  %v2107_v9 = vadd.f32 %v7536_v2, %v2106_v31 }
 0x2ea   :  { %v2118_v58 = vadd.f32 %v5727_v30, %v7536_v2  ;;  %v2109_v51 = vpop.f32.mrb[111].mxu1 }
 0x2eb   :  { %v2110_v10 = vadd.f32 %v7536_v2, %v2109_v51 }
 0x2ec   :  { %v2192_v19 = vpack.c.bf16 %v2118_v58, %v2115_v35 }
 0x2ed   :  { %v2191_v56 = vpack.c.bf16 %v2110_v10, %v2107_v9 }
 0x2ef   :  { %5772 = vmatprep.mubr.bf16.mxu0 %v2191_v56  ;;  %v6133_v56 = vld [vmem:[#allocation10 + $0x10] ss:$28 sps:$4 sm:$0xff]  }
 0x2f0   :  { %5773 = vmatmul.mubr.bf16.gmra.mrb[140].mxu0 %v2192_v19 }
 0x2f7   :  { %v5730_v25 = vpop.f32.mrb[112].mxu1 }
 0x2f8   :  { %v2122_v62 = vpop.f32.mrb[113].mxu1  ;;  %v2131_v38 = vadd.f32 %v5730_v25, %v7536_v2 }
 0x2f9   :  { %v5731_v60 = vpop.f32.mrb[114].mxu1  ;;  %v2123_v52 = vadd.f32 %v7536_v2, %v2122_v62  ;;  %v6138_v62 = vld [vmem:[#allocation10 + $0x4c] ss:$28 sps:$4 sm:$0xff]  }
 0x2fa   :  { %v2134_v27 = vadd.f32 %v5731_v60, %v7536_v2  ;;  %v2125_v12 = vpop.f32.mrb[115].mxu1  ;;  %v6152_v60 = vld [vmem:[#allocation10 + $0x50] ss:$28 sps:$4 sm:$0xff]  }
 0x2fb   :  { %v2126_v50 = vadd.f32 %v7536_v2, %v2125_v12 }
 0x2fc   :  { %v2194_v61 = vpack.c.bf16 %v2134_v27, %v2131_v38  ;;  %v6136_v38 = vld [vmem:[#allocation10 + $0x48] ss:$28 sps:$4 sm:$0xff]  }
 0x2fd   :  { %v2193_v18 = vpack.c.bf16 %v2126_v50, %v2123_v52  ;;  %v6141_v27 = vld [vmem:[#allocation10 + $0x84] ss:$28 sps:$4 sm:$0xff]  }
 0x2fe   :  { %v6139_v52 = vld [vmem:[#allocation10 + $0x80] ss:$28 sps:$4 sm:$0xff]   ;;  %v6156_v50 = vld [vmem:[#allocation10 + $0x88] ss:$28 sps:$4 sm:$0xff]  }
 0x2ff   :  { %5776 = vmatprep.mubr.bf16.mxu0 %v2193_v18 }
 0x300   :  { %5777 = vmatmul.mubr.bf16.gmra.mrb[144].mxu0 %v2194_v61 }
 0x307   :  { %v5734_v8 = vpop.f32.mrb[116].mxu1 }
 0x308   :  { %v2138_v55 = vpop.f32.mrb[117].mxu1  ;;  %v2147_v13 = vadd.f32 %v5734_v8, %v7536_v2  ;;  %v6144_v8 = vld [vmem:[#allocation10 + $0xbc] ss:$28 sps:$4 sm:$0xff]  }
 0x309   :  { %v5735_v37 = vpop.f32.mrb[118].mxu1  ;;  %v2139_v1 = vadd.f32 %v7536_v2, %v2138_v55 }
 0x30a   :  { %v2150_v26 = vadd.f32 %v5735_v37, %v7536_v2  ;;  %v2141_v16 = vpop.f32.mrb[119].mxu1 }
 0x30b   :  { %v2142_v21 = vadd.f32 %v7536_v2, %v2141_v16 }
 0x30c   :  { %v2196_v49 = vpack.c.bf16 %v2150_v26, %v2147_v13  ;;  %v6157_v13 = vld [vmem:[#allocation10 + $0xc0] ss:$28 sps:$4 sm:$0xff]  }
 0x30d   :  { %v2195_v57 = vpack.c.bf16 %v2142_v21, %v2139_v1  ;;  %v6142_v21 = vld [vmem:[#allocation10 + $0xb8] ss:$28 sps:$4 sm:$0xff]  }
 0x30f   :  { %5780 = vmatprep.mubr.bf16.mxu0 %v2195_v57 }
 0x310   :  { %5781 = vmatmul.mubr.bf16.gmra.mrb[148].mxu0 %v2196_v49 }
 0x317   :  { %v5738_v32 = vpop.f32.mrb[120].mxu1 }
 0x318   :  { %v2154_v33 = vpop.f32.mrb[121].mxu1  ;;  %v2163_v46 = vadd.f32 %v5738_v32, %v7536_v2 }
 0x319   :  { %v5739_v17 = vpop.f32.mrb[122].mxu1  ;;  %v2155_v24 = vadd.f32 %v7536_v2, %v2154_v33 }
 0x31a   :  { %v2166_v45 = vadd.f32 %v5739_v17, %v7536_v2  ;;  %v2157_v23 = vpop.f32.mrb[123].mxu1  ;;  %v6161_v17 = vld [vmem:[#allocation10 + $0xf8] ss:$28 sps:$4 sm:$0xff]  }
 0x31b   :  { %v2158_v40 = vadd.f32 %v7536_v2, %v2157_v23 }
 0x31c   :  { %v2198_v43 = vpack.c.bf16 %v2166_v45, %v2163_v46  ;;  %v6149_v46 = vld [vmem:[#allocation10 + $0x128] ss:$28 sps:$4 sm:$0xff]  }
 0x31d   :  { %v2197_v53 = vpack.c.bf16 %v2158_v40, %v2155_v24  ;;  %v6155_v45 = vld [vmem:[#allocation10 + $0x164] ss:$28 sps:$4 sm:$0xff]  }
 0x31e   :  { %v6153_v24 = vld [vmem:[#allocation10 + $0x160] ss:$28 sps:$4 sm:$0xff]   ;;  %v6163_v40 = vld [vmem:[#allocation10 + $0x168] ss:$28 sps:$4 sm:$0xff]  }
 0x31f   :  { %5784 = vmatprep.mubr.bf16.mxu0 %v2197_v53 }
 0x320   :  { %5785 = vmatmul.mubr.bf16.gmra.mrb[152].mxu0 %v2198_v43 }
 0x327   :  { %v5742_v41 = vpop.f32.mrb[124].mxu1 }
 0x328   :  { %v2170_v0 = vpop.f32.mrb[125].mxu1  ;;  %v2179_v3 = vadd.f32 %v5742_v41, %v7536_v2 }
 0x329   :  { %v5743_v4 = vpop.f32.mrb[126].mxu1  ;;  %v2171_v34 = vadd.f32 %v7536_v2, %v2170_v0 }
 0x32a   :  { %v2182_v15 = vadd.f32 %v5743_v4, %v7536_v2  ;;  %v2173_v7 = vpop.f32.mrb[127].mxu1  ;;  %v6164_v4 = vld [vmem:[#allocation10 + $0x1a0] ss:$28 sps:$4 sm:$0xff]  }
 0x32b   :  { %v2174_v22 = vadd.f32 %v7536_v2, %v2173_v7 }
 0x32c   :  { %v2200_v20 = vpack.c.bf16 %v2182_v15, %v2179_v3 }
 0x32d   :  { %v2199_v39 = vpack.c.bf16 %v2174_v22, %v2171_v34  ;;  %v6158_v34 = vld [vmem:[#allocation10 + $0x198] ss:$28 sps:$4 sm:$0xff]  }
 0x32f   :  { %5788 = vmatprep.mubr.bf16.mxu0 %v2199_v39 }
 0x330   :  { %5789 = vmatmul.mubr.bf16.gmra.mrb[156].mxu0 %v2200_v20 }
 0x331   :  { %3095 = vmatprep.mubr.bf16.mxu0 %v7211_v44 }
 0x393   :  { %v5762_v59 = vpop.f32.mrb[128].mxu0 }
 0x394   :  { %v2315_v63 = vadd.f32 %v5762_v59, %v7575_v48  ;;  %v2306_v5 = vpop.f32.mrb[129].mxu0 }
 0x395   :  { %v2307_v6 = vadd.f32 %v7575_v48, %v2306_v5  ;;  %v5763_v2 = vpop.f32.mrb[130].mxu0 }
 0x396   :  { %v2318_v31 = vadd.f32 %v5763_v2, %v7575_v48  ;;  %v2309_v30 = vpop.f32.mrb[131].mxu0  ;;  %v2435_v58 = vmax.f32 %v2315_v63, 0.0 }
 0x397   :  { %v2310_v35 = vadd.f32 %v7575_v48, %v2309_v30  ;;  %v2433_v9 = vmax.f32 %v2307_v6, 0.0 }
 0x398   :  { %v2436_v51 = vmax.f32 %v2318_v31, 0.0 }
 0x399   :  { %v2434_v10 = vmax.f32 %v2310_v35, 0.0 }
 0x39a   :  { %v7581_v19 = vpack.c.bf16 %v2436_v51, %v2435_v58 }
 0x39b   :  { %v7583_v25 = vpack.c.bf16 %v2434_v10, %v2433_v9 }
 0x39d   :  { %2903 = vmatmul.mubr.bf16.vlgmr.msra.gmra.mrb[128].mxu1 %v7583_v25  ;;  %3096 = vmatmul.mubr.bf16.vlgmr.msra.gmra.mrb[160].mxu0 %v7583_v25 }
 0x39e   :  { %3257 = vmatpush1.bf16.msra.mxu1 %v6133_v56  ;;  %2912 = vmatprep.mubr.bf16.mxu1 %v7211_v44 }
 0x39f   :  { %3105 = vmatprep.mubr.bf16.mxu0 %v7211_v44  ;;  %3258 = vmatprep.subr.bf16.mxu1 %v6138_v62 }
 0x3a0   :  { %5793 = vmatpush3.bf16.msra.mxu0 %v6148_v29 }
 0x3a1   :  { %5794 = vmatprep.subr.bf16.mxu0 %v6152_v60 }
 0x3a2   :  { %3259 = vmatpush1.bf16.msra.mxu1 %v6136_v38 }
 0x3a3   :  { %v5766_v12 = vpop.f32.mrb[132].mxu0  ;;  %3260 = vmatprep.subr.bf16.mxu1 %v6141_v27 }
 0x3a4   :  { %v2331_v61 = vadd.f32 %v5766_v12, %v7575_v48  ;;  %v2322_v18 = vpop.f32.mrb[133].mxu0  ;;  %5795 = vmatpush3.bf16.msra.mxu0 %v6152_v60 }
 0x3a5   :  { %v2323_v55 = vadd.f32 %v7575_v48, %v2322_v18  ;;  %v5767_v37 = vpop.f32.mrb[134].mxu0  ;;  %2913 = vmatmul.mubr.bf16.gmra.mrb[132].mxu1 %v7581_v19  ;;  %3106 = vmatmul.mubr.bf16.gmra.mrb[164].mxu0 %v7581_v19 }
 0x3a6   :  { %v2334_v26 = vadd.f32 %v5767_v37, %v7575_v48  ;;  %v2325_v16 = vpop.f32.mrb[135].mxu0  ;;  %2922 = vmatprep.mubr.bf16.mxu1 %v7211_v44  ;;  %3115 = vmatprep.mubr.bf16.mxu0 %v7211_v44  ;;  %v2439_v49 = vmax.f32 %v2331_v61, 0.0 }
 0x3a7   :  { %v2326_v1 = vadd.f32 %v7575_v48, %v2325_v16  ;;  %3261 = vmatpush1.bf16.msra.mxu1 %v6139_v52  ;;  %5796 = vmatprep.subr.bf16.mxu0 %v6156_v50  ;;  %v2437_v28 = vmax.f32 %v2323_v55, 0.0 }
 0x3a8   :  { %v2440_v57 = vmax.f32 %v2334_v26, 0.0  ;;  %3262 = vmatprep.subr.bf16.mxu1 %v6144_v8  ;;  %5797 = vmatpush3.bf16.msra.mxu0 %v6156_v50 }
 0x3a9   :  { %v2438_v32 = vmax.f32 %v2326_v1, 0.0  ;;  %5798 = vmatprep.subr.bf16.mxu0 %v6157_v13 }
 0x3aa   :  { %v7597_v33 = vpack.c.bf16 %v2440_v57, %v2439_v49 }
 0x3ab   :  { %v7599_v14 = vpack.c.bf16 %v2438_v32, %v2437_v28  ;;  %3263 = vmatpush1.bf16.msra.mxu1 %v6142_v21 }
 0x3ac   :  { %3264 = vmatprep.subr.bf16.mxu1 %v6147_v54  ;;  %5799 = vmatpush3.bf16.msra.mxu0 %v6157_v13 }
 0x3ad   :  { %2923 = vmatmul.mubr.bf16.gmra.mrb[136].mxu1 %v7599_v14  ;;  %3116 = vmatmul.mubr.bf16.gmra.mrb[168].mxu0 %v7599_v14 }
 0x3ae   :  { %2932 = vmatprep.mubr.bf16.mxu1 %v7211_v44  ;;  %3125 = vmatprep.mubr.bf16.mxu0 %v7211_v44 }
 0x3af   :  { %3265 = vmatpush1.bf16.msra.mxu1 %v6145_v11  ;;  %5800 = vmatprep.subr.bf16.mxu0 %v6161_v17 }
 0x3b0   :  { %3266 = vmatprep.subr.bf16.mxu1 %v6151_v36  ;;  %5801 = vmatpush3.bf16.msra.mxu0 %v6161_v17 }
 0x3b1   :  { %5802 = vmatprep.subr.bf16.mxu0 %v6162_v42 }
 0x3b3   :  { %v5770_v23 = vpop.f32.mrb[136].mxu0  ;;  %3267 = vmatpush1.bf16.msra.mxu1 %v6149_v46 }
 0x3b4   :  { %v2347_v43 = vadd.f32 %v5770_v23, %v7575_v48  ;;  %v2338_v53 = vpop.f32.mrb[137].mxu0  ;;  %3268 = vmatprep.subr.bf16.mxu1 %v6155_v45  ;;  %5803 = vmatpush3.bf16.msra.mxu0 %v6162_v42 }
 0x3b5   :  { %v2339_v41 = vadd.f32 %v7575_v48, %v2338_v53  ;;  %v5771_v0 = vpop.f32.mrb[138].mxu0  ;;  %2933 = vmatmul.mubr.bf16.gmra.mrb[140].mxu1 %v7597_v33  ;;  %3126 = vmatmul.mubr.bf16.gmra.mrb[172].mxu0 %v7597_v33 }
 0x3b6   :  { %v2350_v3 = vadd.f32 %v5771_v0, %v7575_v48  ;;  %v2341_v15 = vpop.f32.mrb[139].mxu0  ;;  %2942 = vmatprep.mubr.bf16.mxu1 %v7211_v44  ;;  %3135 = vmatprep.mubr.bf16.mxu0 %v7211_v44  ;;  %v2443_v22 = vmax.f32 %v2347_v43, 0.0 }
 0x3b7   :  { %v2342_v7 = vadd.f32 %v7575_v48, %v2341_v15  ;;  %3269 = vmatpush1.bf16.msra.mxu1 %v6153_v24  ;;  %5804 = vmatprep.subr.bf16.mxu0 %v6163_v40  ;;  %v2441_v39 = vmax.f32 %v2339_v41, 0.0 }
 0x3b8   :  { %v2444_v20 = vmax.f32 %v2350_v3, 0.0  ;;  %3270 = vmatprep.subr.bf16.mxu1 %v6160_v47  ;;  %5805 = vmatpush3.bf16.msra.mxu0 %v6163_v40 }
 0x3b9   :  { %v2442_v29 = vmax.f32 %v2342_v7, 0.0  ;;  %5806 = vmatprep.subr.bf16.mxu0 %v6164_v4 }
 0x3ba   :  { %v7613_v59 = vpack.c.bf16 %v2444_v20, %v2443_v22 }
 0x3bb   :  { %v7615_v63 = vpack.c.bf16 %v2442_v29, %v2441_v39  ;;  %3271 = vmatpush1.bf16.msra.mxu1 %v6158_v34 }
 0x3bc   :  { %5807 = vmatpush3.bf16.msra.mxu0 %v6164_v4 }
 0x3bd   :  { %2943 = vmatmul.mubr.bf16.gmra.mrb[144].mxu1 %v7615_v63  ;;  %3136 = vmatmul.mubr.bf16.gmra.mrb[176].mxu0 %v7615_v63 }
 0x3be   :  { %2952 = vmatprep.mubr.bf16.mxu1 %v7211_v44  ;;  %3145 = vmatprep.mubr.bf16.mxu0 %v7211_v44 }
 0x3c3   :  { %v5774_v5 = vpop.f32.mrb[140].mxu0 }
 0x3c4   :  { %v2363_v6 = vadd.f32 %v5774_v5, %v7575_v48  ;;  %v2354_v2 = vpop.f32.mrb[141].mxu0 }
 0x3c5   :  { %v2355_v31 = vadd.f32 %v7575_v48, %v2354_v2  ;;  %v5775_v30 = vpop.f32.mrb[142].mxu0  ;;  %2953 = vmatmul.mubr.bf16.gmra.mrb[148].mxu1 %v7613_v59  ;;  %3146 = vmatmul.mubr.bf16.gmra.mrb[180].mxu0 %v7613_v59 }
 0x3c6   :  { %v2366_v35 = vadd.f32 %v5775_v30, %v7575_v48  ;;  %v2357_v58 = vpop.f32.mrb[143].mxu0  ;;  %2962 = vmatprep.mubr.bf16.mxu1 %v7211_v44  ;;  %3155 = vmatprep.mubr.bf16.mxu0 %v7211_v44  ;;  %v2447_v9 = vmax.f32 %v2363_v6, 0.0 }
 0x3c7   :  { %v2358_v51 = vadd.f32 %v7575_v48, %v2357_v58  ;;  %v2445_v56 = vmax.f32 %v2355_v31, 0.0 }
 0x3c8   :  { %v2448_v10 = vmax.f32 %v2366_v35, 0.0 }
 0x3c9   :  { %v2446_v62 = vmax.f32 %v2358_v51, 0.0 }
 0x3ca   :  { %v7629_v60 = vpack.c.bf16 %v2448_v10, %v2447_v9 }
 0x3cb   :  { %v7631_v38 = vpack.c.bf16 %v2446_v62, %v2445_v56 }
 0x3cd   :  { %2963 = vmatmul.mubr.bf16.gmra.mrb[152].mxu1 %v7631_v38  ;;  %3156 = vmatmul.mubr.bf16.gmra.mrb[184].mxu0 %v7631_v38 }
 0x3ce   :  { %2972 = vmatprep.mubr.bf16.mxu1 %v7211_v44  ;;  %3165 = vmatprep.mubr.bf16.mxu0 %v7211_v44 }
 0x3d3   :  { %v5778_v27 = vpop.f32.mrb[144].mxu0 }
 0x3d4   :  { %v2379_v12 = vadd.f32 %v5778_v27, %v7575_v48  ;;  %v2370_v52 = vpop.f32.mrb[145].mxu0 }
 0x3d5   :  { %v2371_v50 = vadd.f32 %v7575_v48, %v2370_v52  ;;  %v5779_v61 = vpop.f32.mrb[146].mxu0  ;;  %2973 = vmatmul.mubr.bf16.gmra.mrb[156].mxu1 %v7629_v60  ;;  %3166 = vmatmul.mubr.bf16.gmra.mrb[188].mxu0 %v7629_v60 }
 0x3d6   :  { %v2382_v18 = vadd.f32 %v5779_v61, %v7575_v48  ;;  %v2373_v8 = vpop.f32.mrb[147].mxu0  ;;  %2982 = vmatprep.mubr.bf16.mxu1 %v7211_v44  ;;  %3175 = vmatprep.mubr.bf16.mxu0 %v7211_v44  ;;  %v2451_v37 = vmax.f32 %v2379_v12, 0.0 }
 0x3d7   :  { %v2374_v55 = vadd.f32 %v7575_v48, %v2373_v8  ;;  %v2449_v26 = vmax.f32 %v2371_v50, 0.0 }
 0x3d8   :  { %v2452_v13 = vmax.f32 %v2382_v18, 0.0 }
 0x3d9   :  { %v2450_v16 = vmax.f32 %v2374_v55, 0.0 }
 0x3da   :  { %v7645_v1 = vpack.c.bf16 %v2452_v13, %v2451_v37 }
 0x3db   :  { %v7647_v21 = vpack.c.bf16 %v2450_v16, %v2449_v26 }
 0x3dd   :  { %2983 = vmatmul.mubr.bf16.gmra.mrb[160].mxu1 %v7647_v21  ;;  %3176 = vmatmul.mubr.bf16.gmra.mrb[192].mxu0 %v7647_v21 }
 0x3de   :  { %2992 = vmatprep.mubr.bf16.mxu1 %v7211_v44  ;;  %3185 = vmatprep.mubr.bf16.mxu0 %v7211_v44 }
 0x3e3   :  { %v5782_v49 = vpop.f32.mrb[148].mxu0 }
 0x3e4   :  { %v2395_v57 = vadd.f32 %v5782_v49, %v7575_v48  ;;  %v2386_v54 = vpop.f32.mrb[149].mxu0 }
 0x3e5   :  { %v2387_v28 = vadd.f32 %v7575_v48, %v2386_v54  ;;  %v5783_v32 = vpop.f32.mrb[150].mxu0  ;;  %2993 = vmatmul.mubr.bf16.gmra.mrb[164].mxu1 %v7645_v1  ;;  %3186 = vmatmul.mubr.bf16.gmra.mrb[196].mxu0 %v7645_v1 }
 0x3e6   :  { %v2398_v11 = vadd.f32 %v5783_v32, %v7575_v48  ;;  %v2389_v17 = vpop.f32.mrb[151].mxu0  ;;  %3002 = vmatprep.mubr.bf16.mxu1 %v7211_v44  ;;  %3195 = vmatprep.mubr.bf16.mxu0 %v7211_v44  ;;  %v2455_v42 = vmax.f32 %v2395_v57, 0.0 }
 0x3e7   :  { %v2390_v36 = vadd.f32 %v7575_v48, %v2389_v17  ;;  %v2453_v45 = vmax.f32 %v2387_v28, 0.0 }
 0x3e8   :  { %v2456_v46 = vmax.f32 %v2398_v11, 0.0 }
 0x3e9   :  { %v2454_v23 = vmax.f32 %v2390_v36, 0.0 }
 0x3ea   :  { %v7661_v24 = vpack.c.bf16 %v2456_v46, %v2455_v42 }
 0x3eb   :  { %v7663_v40 = vpack.c.bf16 %v2454_v23, %v2453_v45 }
 0x3ed   :  { %3003 = vmatmul.mubr.bf16.gmra.mrb[168].mxu1 %v7663_v40  ;;  %3196 = vmatmul.mubr.bf16.gmra.mrb[200].mxu0 %v7663_v40 }
 0x3ee   :  { %3012 = vmatprep.mubr.bf16.mxu1 %v7211_v44  ;;  %3205 = vmatprep.mubr.bf16.mxu0 %v7211_v44 }
 0x3f3   :  { %v5786_v43 = vpop.f32.mrb[152].mxu0 }
 0x3f4   :  { %v2411_v53 = vadd.f32 %v5786_v43, %v7575_v48  ;;  %v2402_v47 = vpop.f32.mrb[153].mxu0 }
 0x3f5   :  { %v2403_v41 = vadd.f32 %v7575_v48, %v2402_v47  ;;  %v5787_v0 = vpop.f32.mrb[154].mxu0  ;;  %3013 = vmatmul.mubr.bf16.gmra.mrb[172].mxu1 %v7661_v24  ;;  %3206 = vmatmul.mubr.bf16.gmra.mrb[204].mxu0 %v7661_v24 }
 0x3f6   :  { %v2414_v4 = vadd.f32 %v5787_v0, %v7575_v48  ;;  %v2405_v3 = vpop.f32.mrb[155].mxu0  ;;  %3022 = vmatprep.mubr.bf16.mxu1 %v7211_v44  ;;  %3215 = vmatprep.mubr.bf16.mxu0 %v7211_v44  ;;  %v2459_v7 = vmax.f32 %v2411_v53, 0.0 }
 0x3f7   :  { %v2406_v15 = vadd.f32 %v7575_v48, %v2405_v3  ;;  %v2457_v22 = vmax.f32 %v2403_v41, 0.0 }
 0x3f8   :  { %v2460_v34 = vmax.f32 %v2414_v4, 0.0 }
 0x3f9   :  { %v2458_v20 = vmax.f32 %v2406_v15, 0.0 }
 0x3fa   :  { %v7677_v39 = vpack.c.bf16 %v2460_v34, %v2459_v7 }
 0x3fb   :  { %v7679_v29 = vpack.c.bf16 %v2458_v20, %v2457_v22 }
 0x3fd   :  { %3023 = vmatmul.mubr.bf16.gmra.mrb[176].mxu1 %v7679_v29  ;;  %3216 = vmatmul.mubr.bf16.gmra.mrb[208].mxu0 %v7679_v29 }
 0x3fe   :  { %3032 = vmatprep.mubr.bf16.mxu1 %v7211_v44  ;;  %3225 = vmatprep.mubr.bf16.mxu0 %v7211_v44 }
 0x403   :  { %v5790_v5 = vpop.f32.mrb[156].mxu0 }
 0x404   :  { %v2427_v6 = vadd.f32 %v5790_v5, %v7575_v48  ;;  %v2418_v2 = vpop.f32.mrb[157].mxu0 }
 0x405   :  { %v2419_v31 = vadd.f32 %v7575_v48, %v2418_v2  ;;  %v5791_v30 = vpop.f32.mrb[158].mxu0  ;;  %3033 = vmatmul.mubr.bf16.gmra.mrb[180].mxu1 %v7677_v39  ;;  %3226 = vmatmul.mubr.bf16.gmra.mrb[212].mxu0 %v7677_v39 }
 0x406   :  { %v2430_v35 = vadd.f32 %v5791_v30, %v7575_v48  ;;  %v2421_v58 = vpop.f32.mrb[159].mxu0  ;;  %3042 = vmatprep.mubr.bf16.mxu1 %v7211_v44  ;;  %3235 = vmatprep.mubr.bf16.mxu0 %v7211_v44  ;;  %v2463_v9 = vmax.f32 %v2427_v6, 0.0 }
 0x407   :  { %v2422_v51 = vadd.f32 %v7575_v48, %v2421_v58  ;;  %v2461_v56 = vmax.f32 %v2419_v31, 0.0  ;;  %v2547_v48 = vlaneseq }
 0x408   :  { %v2464_v10 = vmax.f32 %v2430_v35, 0.0 }
 0x409   :  { %v2462_v62 = vmax.f32 %v2422_v51, 0.0 }
 0x40a   :  { %v7693_v27 = vpack.c.bf16 %v2464_v10, %v2463_v9 }
 0x40b   :  { %v7695_v12 = vpack.c.bf16 %v2462_v62, %v2461_v56 }
 0x40d   :  { %3043 = vmatmul.mubr.bf16.gmra.mrb[184].mxu1 %v7695_v12  ;;  %3236 = vmatmul.mubr.bf16.gmra.mrb[216].mxu0 %v7695_v12 }
 0x40e   :  { %3052 = vmatprep.mubr.bf16.mxu1 %v7211_v44  ;;  %3245 = vmatprep.mubr.bf16.mxu0 %v7211_v44 }
 0x415   :  { %3053 = vmatmul.mubr.bf16.gmra.mrb[188].mxu1 %v7693_v27  ;;  %3246 = vmatmul.mubr.bf16.gmra.mrb[220].mxu0 %v7693_v27 }
 0x416   :  { %5808 = vmatprep.mubr.bf16.mxu0 %v7583_v25  ;;  %3288 = vmatprep.mubr.bf16.mxu1 %v7211_v44 }
 0x41d   :  { %3289 = vmatmul.mubr.bf16.vlgmr.msra.gmra.mrb[192].mxu1 %v7583_v25  ;;  %5809 = vmatmul.mubr.bf16.vlgmr.msra.gmra.mrb[224].mxu0 %v7581_v19 }
 0x41e   :  { %5812 = vmatprep.mubr.bf16.mxu0 %v7599_v14  ;;  %3298 = vmatprep.mubr.bf16.mxu1 %v7211_v44 }
 0x425   :  { %3299 = vmatmul.mubr.bf16.gmra.mrb[196].mxu1 %v7581_v19  ;;  %5813 = vmatmul.mubr.bf16.gmra.mrb[228].mxu0 %v7597_v33  ;;  %v7739_v19 = vshrl.u32 %v2547_v48, 7 }
 0x426   :  { %5816 = vmatprep.mubr.bf16.mxu0 %v7615_v63  ;;  %3308 = vmatprep.mubr.bf16.mxu1 %v7211_v44 }
 0x427   :  { %8630 = vst [vmem:[#allocation16_spill] sm:$0xff] %v7739_v19  ;;  %v2549_v25 = vsub.s32 0, %v7739_v19 }
 0x42d   :  { %3309 = vmatmul.mubr.bf16.gmra.mrb[200].mxu1 %v7599_v14  ;;  %5817 = vmatmul.mubr.bf16.gmra.mrb[232].mxu0 %v7613_v59  ;;  %v2545_v14 = vld [vmem:[%s8626_s8] sm:$0xff] }
 0x42e   :  { %5820 = vmatprep.mubr.bf16.mxu0 %v7631_v38  ;;  %3318 = vmatprep.mubr.bf16.mxu1 %v7211_v44 }
 0x435   :  { %3319 = vmatmul.mubr.bf16.gmra.mrb[204].mxu1 %v7597_v33  ;;  %5821 = vmatmul.mubr.bf16.gmra.mrb[236].mxu0 %v7629_v60  ;;  %v2557_v33 = vsub.s32 2, %v7739_v19 }
 0x436   :  { %5824 = vmatprep.mubr.bf16.mxu0 %v7647_v21  ;;  %3328 = vmatprep.mubr.bf16.mxu1 %v7211_v44 }
 0x43d   :  { %3329 = vmatmul.mubr.bf16.gmra.mrb[208].mxu1 %v7615_v63  ;;  %5825 = vmatmul.mubr.bf16.gmra.mrb[240].mxu0 %v7645_v1  ;;  %v2561_v63 = vsub.s32 3, %v7739_v19 }
 0x43e   :  { %5828 = vmatprep.mubr.bf16.mxu0 %v7663_v40  ;;  %3338 = vmatprep.mubr.bf16.mxu1 %v7211_v44 }
 0x43f   :  { %v7756_v50 = vrot.slane %v2545_v14, %v2561_v63 }
 0x445   :  { %3339 = vmatmul.mubr.bf16.gmra.mrb[212].mxu1 %v7613_v59  ;;  %5829 = vmatmul.mubr.bf16.gmra.mrb[244].mxu0 %v7661_v24  ;;  %v2553_v59 = vsub.s32 1, %v7739_v19 }
 0x446   :  { %5832 = vmatprep.mubr.bf16.mxu0 %v7679_v29  ;;  %3348 = vmatprep.mubr.bf16.mxu1 %v7211_v44 }
 0x447   :  { %v7754_v52 = vrot.slane %v2545_v14, %v2553_v59 }
 0x44d   :  { %3349 = vmatmul.mubr.bf16.gmra.mrb[216].mxu1 %v7631_v38  ;;  %5833 = vmatmul.mubr.bf16.gmra.mrb[248].mxu0 %v7677_v39  ;;  %v7752_v38 = vrot.slane %v2545_v14, %v2557_v33 }
 0x44e   :  { %5836 = vmatprep.mubr.bf16.mxu0 %v7695_v12  ;;  %3358 = vmatprep.mubr.bf16.mxu1 %v7211_v44 }
 0x455   :  { %3359 = vmatmul.mubr.bf16.gmra.mrb[220].mxu1 %v7629_v60  ;;  %5837 = vmatmul.mubr.bf16.gmra.mrb[252].mxu0 %v7693_v27  ;;  %v7750_v60 = vrot.slane %v2545_v14, %v2549_v25 }
 0x456   :  { %3368 = vmatprep.mubr.bf16.mxu1 %v7211_v44 }
 0x45d   :  { %3369 = vmatmul.mubr.bf16.gmra.mrb[224].mxu1 %v7647_v21 }
 0x45e   :  { %3378 = vmatprep.mubr.bf16.mxu1 %v7211_v44 }
 0x465   :  { %3379 = vmatmul.mubr.bf16.gmra.mrb[228].mxu1 %v7645_v1 }
 0x466   :  { %3388 = vmatprep.mubr.bf16.mxu1 %v7211_v44 }
 0x46d   :  { %3389 = vmatmul.mubr.bf16.gmra.mrb[232].mxu1 %v7663_v40 }
 0x46e   :  { %3398 = vmatprep.mubr.bf16.mxu1 %v7211_v44 }
 0x470   :  { %v2904_v61 = vpop.f32.mrb[128].mxu1  ;;  %v3097_v18 = vpop.f32.mrb[160].mxu0 }
 0x471   :  { %v2905_v8 = vadd.f32 %v2904_v61, %v7750_v60  ;;  %v3098_v55 = vadd.f32 %v3097_v18, %v7752_v38  ;;  %v2906_v37 = vpop.f32.mrb[129].mxu1  ;;  %v3099_v13 = vpop.f32.mrb[161].mxu0 }
 0x472   :  { %v2907_v26 = vadd.f32 %v2906_v37, %v7754_v52  ;;  %v3100_v16 = vadd.f32 %v3099_v13, %v7756_v50  ;;  %v2908_v1 = vpop.f32.mrb[130].mxu1  ;;  %v3101_v21 = vpop.f32.mrb[162].mxu0 }
 0x473   :  { %v3610_v49 = vsub.f32 0.0, %v2905_v8  ;;  %v3612_v57 = vsub.f32 0.0, %v3098_v55  ;;  %v2909_v54 = vadd.f32 %v2908_v1, %v7750_v60  ;;  %v3102_v28 = vadd.f32 %v3101_v21, %v7752_v38  ;;  %v2910_v32 = vpop.f32.mrb[131].mxu1  ;;  %v3103_v11 = vpop.f32.mrb[163].mxu0 }
 0x474   :  { %v3611_v17 = vsub.f32 0.0, %v2907_v26  ;;  %v3613_v36 = vsub.f32 0.0, %v3100_v16  ;;  %v2911_v42 = vadd.f32 %v2910_v32, %v7754_v52  ;;  %v3104_v46 = vadd.f32 %v3103_v11, %v7756_v50 }
 0x475   :  { %v3834_v45 = vmul.f32 1.442695, %v3610_v49  ;;  %v3838_v23 = vmul.f32 1.442695, %v3612_v57  ;;  %v3617_v40 = vsub.f32 0.0, %v2909_v54  ;;  %v3619_v43 = vsub.f32 0.0, %v3102_v28  ;;  %3399 = vmatmul.mubr.bf16.gmra.mrb[236].mxu1 %v7661_v24 }
 0x476   :  { %v3836_v53 = vmul.f32 1.442695, %v3611_v17  ;;  %v3840_v47 = vmul.f32 1.442695, %v3613_v36  ;;  %v3618_v41 = vsub.f32 0.0, %v2911_v42  ;;  %v3620_v0 = vsub.f32 0.0, %v3104_v46  ;;  %3408 = vmatprep.mubr.bf16.mxu1 %v7211_v44 }
 0x477   :  { %6165 = vpow2.f32 %v3834_v45  ;;  %v3848_v4 = vmul.f32 1.442695, %v3617_v40  ;;  %v3852_v3 = vmul.f32 1.442695, %v3619_v43 }
 0x478   :  { %6167 = vpow2.f32 %v3838_v23  ;;  %v2914_v15 = vpop.f32.mrb[132].mxu1  ;;  %v3107_v7 = vpop.f32.mrb[164].mxu0  ;;  %v3850_v34 = vmul.f32 1.442695, %v3618_v41  ;;  %v3854_v6 = vmul.f32 1.442695, %v3620_v0 }
 0x479   :  { %6169 = vpow2.f32 %v3836_v53  ;;  %v2915_v22 = vadd.f32 %v2914_v15, %v7750_v60  ;;  %v3108_v20 = vadd.f32 %v3107_v7, %v7752_v38  ;;  %v2916_v5 = vpop.f32.mrb[133].mxu1  ;;  %v3109_v24 = vpop.f32.mrb[165].mxu0 }
 0x47a   :  { %6171 = vpow2.f32 %v3840_v47  ;;  %v2917_v2 = vadd.f32 %v2916_v5, %v7754_v52  ;;  %v3110_v31 = vadd.f32 %v3109_v24, %v7756_v50  ;;  %v2918_v30 = vpop.f32.mrb[134].mxu1  ;;  %v3111_v35 = vpop.f32.mrb[166].mxu0 }
 0x47b   :  { %6173 = vpow2.f32 %v3848_v4  ;;  %v3624_v58 = vsub.f32 0.0, %v2915_v22  ;;  %v3626_v51 = vsub.f32 0.0, %v3108_v20  ;;  %v2919_v9 = vadd.f32 %v2918_v30, %v7750_v60  ;;  %v2920_v10 = vpop.f32.mrb[135].mxu1  ;;  %v3113_v56 = vpop.f32.mrb[167].mxu0 }
 0x47c   :  { %6175 = vpow2.f32 %v3852_v3  ;;  %v3625_v62 = vsub.f32 0.0, %v2917_v2  ;;  %v3627_v48 = vsub.f32 0.0, %v3110_v31  ;;  %v3112_v37 = vadd.f32 %v3111_v35, %v7752_v38 }
 0x47d   :  { %6177 = vpow2.f32 %v3850_v34  ;;  %v3862_v25 = vmul.f32 1.442695, %v3624_v58  ;;  %v3866_v33 = vmul.f32 1.442695, %v3626_v51  ;;  %v3631_v14 = vsub.f32 0.0, %v2919_v9  ;;  %3409 = vmatmul.mubr.bf16.gmra.mrb[240].mxu1 %v7679_v29 }
 0x47e   :  { %6179 = vpow2.f32 %v3854_v6  ;;  %v3864_v59 = vmul.f32 1.442695, %v3625_v62  ;;  %v3868_v63 = vmul.f32 1.442695, %v3627_v48  ;;  %3418 = vmatprep.mubr.bf16.mxu1 %v7211_v44  ;;  %v2921_v54 = vadd.f32 %v2920_v10, %v7754_v52 }
 0x47f   :  { %6181 = vpow2.f32 %v3862_v25  ;;  %v3876_v61 = vmul.f32 1.442695, %v3631_v14  ;;  %v3633_v46 = vsub.f32 0.0, %v3112_v37  ;;  %v3114_v40 = vadd.f32 %v3113_v56, %v7756_v50 }
 0x480   :  { %6183 = vpow2.f32 %v3866_v33  ;;  %v2924_v18 = vpop.f32.mrb[136].mxu1  ;;  %v3117_v8 = vpop.f32.mrb[168].mxu0  ;;  %v3632_v47 = vsub.f32 0.0, %v2921_v54 }
 0x481   :  { %v6166_v55 = vpop.eup %6165  ;;  %6185 = vpow2.f32 %v3864_v59  ;;  %v2926_v13 = vpop.f32.mrb[137].mxu1  ;;  %v2925_v4 = vadd.f32 %v2924_v18, %v7750_v60  ;;  %v3880_v34 = vmul.f32 1.442695, %v3633_v46  ;;  %v3118_v22 = vadd.f32 %v3117_v8, %v7752_v38 }
 0x482   :  { %v3119_v26 = vpop.f32.mrb[169].mxu0  ;;  %v6168_v16 = vpop.eup %6167  ;;  %v4282_v1 = vadd.f32 1.0, %v6166_v55  ;;  %6187 = vpow2.f32 %v3868_v63  ;;  %v3634_v2 = vsub.f32 0.0, %v3114_v40  ;;  %v2927_v31 = vadd.f32 %v2926_v13, %v7754_v52 }
 0x483   :  { %v2928_v29 = vpop.f32.mrb[138].mxu1  ;;  %v3121_v21 = vpop.f32.mrb[170].mxu0  ;;  %v4284_v57 = vadd.f32 1.0, %v6168_v16  ;;  %6189 = vpow2.f32 %v3876_v61  ;;  %v3878_v9 = vmul.f32 1.442695, %v3632_v47  ;;  %v3120_v10 = vadd.f32 %v3119_v26, %v7756_v50 }
 0x484   :  { %v6170_v49 = vpop.eup %6169  ;;  %v2930_v28 = vpop.f32.mrb[139].mxu1  ;;  %6191 = vrcp.f32 %v4282_v1  ;;  %v3638_v33 = vsub.f32 0.0, %v2925_v4  ;;  %v2929_v14 = vadd.f32 %v2928_v29, %v7750_v60  ;;  %v3640_v61 = vsub.f32 0.0, %v3118_v22 }
 0x485   :  { %v6172_v32 = vpop.eup %6171  ;;  %v4283_v11 = vadd.f32 1.0, %v6170_v49  ;;  %v7778_v17 = vpop.f32.mrb[171].mxu0  ;;  %6193 = vrcp.f32 %v4284_v57  ;;  %3419 = vmatmul.mubr.bf16.gmra.mrb[244].mxu1 %v7677_v39  ;;  %v3122_v18 = vadd.f32 %v3121_v21, %v7752_v38  ;;  %v3639_v37 = vsub.f32 0.0, %v2927_v31 }
 0x486   :  { %v6174_v36 = vpop.eup %6173  ;;  %v4285_v42 = vadd.f32 1.0, %v6172_v32  ;;  %3428 = vmatprep.mubr.bf16.mxu1 %v7211_v44  ;;  %v2931_v13 = vadd.f32 %v2930_v28, %v7754_v52  ;;  %v3882_v16 = vmul.f32 1.442695, %v3634_v2  ;;  %v3641_v1 = vsub.f32 0.0, %v3120_v10 }
 0x487   :  { %v6176_v45 = vpop.eup %6175  ;;  %6195 = vrcp.f32 %v4283_v11  ;;  %v4289_v23 = vadd.f32 1.0, %v6174_v36  ;;  %v3124_v29 = vadd.f32 %v7778_v17, %v7756_v50  ;;  %v3645_v21 = vsub.f32 0.0, %v2929_v14 }
 0x488   :  { %v6178_v43 = vpop.eup %6177  ;;  %6197 = vrcp.f32 %v4285_v42  ;;  %v4291_v53 = vadd.f32 1.0, %v6176_v45  ;;  %v2934_v3 = vpop.f32.mrb[140].mxu1  ;;  %v3894_v32 = vmul.f32 1.442695, %v3640_v61  ;;  %v3647_v11 = vsub.f32 0.0, %v3122_v18 }
 0x489   :  { %v6180_v41 = vpop.eup %6179  ;;  %6199 = vrcp.f32 %v4289_v23  ;;  %v4290_v0 = vadd.f32 1.0, %v6178_v43  ;;  %v3127_v15 = vpop.f32.mrb[172].mxu0  ;;  %v2935_v57 = vadd.f32 %v2934_v3, %v7750_v60  ;;  %v3892_v45 = vmul.f32 1.442695, %v3639_v37 }
 0x48a   :  { %v6182_v7 = vpop.eup %6181  ;;  %6201 = vrcp.f32 %v4291_v53  ;;  %v4292_v39 = vadd.f32 1.0, %v6180_v41  ;;  %v7785_v20 = vpop.f32.mrb[141].mxu1  ;;  %v3128_v36 = vadd.f32 %v3127_v15, %v7752_v38  ;;  %v3646_v23 = vsub.f32 0.0, %v2931_v13 }
 0x48b   :  { %v7787_v5 = vpop.f32.mrb[173].mxu0  ;;  %v6184_v24 = vpop.eup %6183  ;;  %6203 = vrcp.f32 %v4290_v0  ;;  %v4296_v6 = vadd.f32 1.0, %v6182_v7  ;;  %v3896_v53 = vmul.f32 1.442695, %v3641_v1  ;;  %v3648_v47 = vsub.f32 0.0, %v3124_v29 }
 0x48c   :  { %v7790_v30 = vpop.f32.mrb[142].mxu1  ;;  %v7792_v35 = vpop.f32.mrb[174].mxu0  ;;  %6205 = vrcp.f32 %v4292_v39  ;;  %v4298_v51 = vadd.f32 1.0, %v6184_v24  ;;  %v3904_v4 = vmul.f32 1.442695, %v3645_v21  ;;  %v3652_v3 = vsub.f32 0.0, %v2935_v57 }
 0x48d   :  { %v6186_v58 = vpop.eup %6185  ;;  %v7795_v56 = vpop.f32.mrb[143].mxu1  ;;  %6207 = vrcp.f32 %v4296_v6  ;;  %3429 = vmatmul.mubr.bf16.gmra.mrb[248].mxu1 %v7695_v12  ;;  %v3890_v12 = vmul.f32 1.442695, %v3638_v33  ;;  %v3654_v22 = vsub.f32 0.0, %v3128_v36  ;;  %v3906_v6 = vmul.f32 1.442695, %v3646_v23 }
 0x48e   :  { %v7797_v62 = vpop.f32.mrb[175].mxu0  ;;  %v6188_v48 = vpop.eup %6187  ;;  %v4297_v25 = vadd.f32 1.0, %v6186_v58  ;;  %6209 = vrcp.f32 %v4298_v51  ;;  %3438 = vmatprep.mubr.bf16.mxu1 %v7211_v44  ;;  %v3910_v31 = vmul.f32 1.442695, %v3648_v47  ;;  %v3918_v51 = vmul.f32 1.442695, %v3652_v3 }
 0x48f   :  { %v6190_v59 = vpop.eup %6189  ;;  %v4299_v63 = vadd.f32 1.0, %v6188_v48  ;;  %v3922_v48 = vmul.f32 1.442695, %v3654_v22  ;;  %v3130_v1 = vadd.f32 %v7787_v5, %v7756_v50  ;;  %v2939_v57 = vadd.f32 %v7790_v30, %v7750_v60 }
 0x490   :  { %v6192_v8 = vpop.eup %6191  ;;  %6211 = vrcp.f32 %v4297_v25  ;;  %v4303_v55 = vadd.f32 1.0, %v6190_v59  ;;  %v7807_v54 = vpop.f32.mrb[144].mxu1  ;;  %v3132_v30 = vadd.f32 %v7792_v35, %v7752_v38  ;;  %v2941_v22 = vadd.f32 %v7795_v56, %v7754_v52 }
 0x491   :  { %v6194_v26 = vpop.eup %6193  ;;  %4730 = vst [vmem:[#allocation11] sm:$0xff] %v6192_v8  ;;  %6213 = vrcp.f32 %v4299_v63  ;;  %v7809_v28 = vpop.f32.mrb[176].mxu0  ;;  %v3134_v35 = vadd.f32 %v7797_v62, %v7756_v50 }
 0x492   :  { %v6196_v49 = vpop.eup %6195  ;;  %4732 = vst [vmem:[#allocation11 + $0x10] sm:$0xff] %v6194_v26  ;;  %6215 = vrcp.f32 %v4303_v55  ;;  %v7812_v42 = vpop.f32.mrb[145].mxu1  ;;  %v2937_v55 = vadd.f32 %v7785_v20, %v7754_v52 }
 0x493   :  { %v6198_v44 = vpop.eup %6197  ;;  %4731 = vst [vmem:[#allocation11 + $0x8] sm:$0xff] %v6196_v49  ;;  %6217 = vpow2.f32 %v3880_v34  ;;  %v7814_v17 = vpop.f32.mrb[177].mxu0  ;;  %v3908_v34 = vmul.f32 1.442695, %v3647_v11  ;;  %v2947_v62 = vadd.f32 %v7812_v42, %v7754_v52 }
 0x494   :  { %v6200_v46 = vpop.eup %6199  ;;  %4733 = vst [vmem:[#allocation11 + $0x18] sm:$0xff] %v6198_v44  ;;  %6219 = vpow2.f32 %v3878_v9  ;;  %v7816_v40 = vpop.f32.mrb[146].mxu1 }
 0x495   :  { %v6202_v43 = vpop.eup %6201  ;;  %4737 = vst [vmem:[#allocation11 + $0x38] sm:$0xff] %v6200_v46  ;;  %6221 = vpow2.f32 %v3882_v16  ;;  %v7818_v41 = vpop.f32.mrb[178].mxu0  ;;  %3439 = vmatmul.mubr.bf16.gmra.mrb[252].mxu1 %v7693_v27 }
 0x496   :  { %v6204_v0 = vpop.eup %6203  ;;  %4739 = vst [vmem:[#allocation11 + $0x48] sm:$0xff] %v6202_v43  ;;  %6223 = vpow2.f32 %v3890_v12  ;;  %v7820_v15 = vpop.f32.mrb[147].mxu1 }
 0x497   :  { %v7822_v7 = vpop.f32.mrb[179].mxu0  ;;  %v6206_v39 = vpop.eup %6205  ;;  %4738 = vst [vmem:[#allocation11 + $0x40] sm:$0xff] %v6204_v0  ;;  %6225 = vpow2.f32 %v3894_v32  ;;  %v3653_v32 = vsub.f32 0.0, %v2937_v55 }
 0x498   :  { %v6208_v24 = vpop.eup %6207  ;;  %4740 = vst [vmem:[#allocation11 + $0x50] sm:$0xff] %v6206_v39  ;;  %6227 = vpow2.f32 %v3892_v45  ;;  %v7825_v9 = vpop.f32.mrb[148].mxu1  ;;  %v3655_v45 = vsub.f32 0.0, %v3130_v1 }
 0x499   :  { %v6210_v2 = vpop.eup %6209  ;;  %4744 = vst [vmem:[#allocation11 + $0x70] sm:$0xff] %v6208_v24  ;;  %6229 = vpow2.f32 %v3896_v53  ;;  %v7827_v25 = vpop.f32.mrb[180].mxu0 }
 0x49a   :  { %v6212_v58 = vpop.eup %6211  ;;  %4746 = vst [vmem:[#allocation11 + $0x80] sm:$0xff] %v6210_v2  ;;  %6231 = vpow2.f32 %v3904_v4  ;;  %v7829_v33 = vpop.f32.mrb[149].mxu1 }
 0x49b   :  { %v6214_v10 = vpop.eup %6213  ;;  %4745 = vst [vmem:[#allocation11 + $0x78] sm:$0xff] %v6212_v58  ;;  %6233 = vpow2.f32 %v3908_v34  ;;  %v7831_v14 = vpop.f32.mrb[181].mxu0  ;;  %v3659_v34 = vsub.f32 0.0, %v2939_v57  ;;  %v3920_v58 = vmul.f32 1.442695, %v3653_v32 }
 0x49c   :  { %v6216_v27 = vpop.eup %6215  ;;  %4747 = vst [vmem:[#allocation11 + $0x88] sm:$0xff] %v6214_v10  ;;  %6235 = vpow2.f32 %v3906_v6  ;;  %v7833_v63 = vpop.f32.mrb[150].mxu1 }
 0x49d   :  { %v6218_v59 = vpop.eup %6217  ;;  %4751 = vst [vmem:[#allocation11 + $0xa8] sm:$0xff] %v6216_v27  ;;  %6237 = vpow2.f32 %v3910_v31  ;;  %v7835_v61 = vpop.f32.mrb[182].mxu0  ;;  %v2945_v27 = vadd.f32 %v7807_v54, %v7750_v60  ;;  %v3140_v54 = vadd.f32 %v7814_v17, %v7756_v50 }
 0x49e   :  { %v6220_v18 = vpop.eup %6219  ;;  %v4305_v8 = vadd.f32 1.0, %v6218_v59  ;;  %6239 = vpow2.f32 %v3918_v51  ;;  %v7839_v37 = vpop.f32.mrb[151].mxu1 }
 0x49f   :  { %v7841_v13 = vpop.f32.mrb[183].mxu0  ;;  %v6222_v26 = vpop.eup %6221  ;;  %v4304_v16 = vadd.f32 1.0, %v6220_v18  ;;  %6241 = vpow2.f32 %v3922_v48  ;;  %v3924_v48 = vmul.f32 1.442695, %v3655_v45  ;;  %v3661_v18 = vsub.f32 0.0, %v3132_v30 }
 0x4a0   :  { %v6224_v29 = vpop.eup %6223  ;;  %6243 = vrcp.f32 %v4305_v8  ;;  %v4306_v49 = vadd.f32 1.0, %v6222_v26  ;;  %v7847_v11 = vpop.f32.mrb[152].mxu1  ;;  %v3138_v8 = vadd.f32 %v7809_v28, %v7752_v38  ;;  %v3932_v28 = vmul.f32 1.442695, %v3659_v34 }
 0x4a1   :  { %v6226_v12 = vpop.eup %6225  ;;  %6245 = vrcp.f32 %v4304_v16  ;;  %v4310_v21 = vadd.f32 1.0, %v6224_v29  ;;  %v7849_v36 = vpop.f32.mrb[184].mxu0  ;;  %v3660_v16 = vsub.f32 0.0, %v2941_v22  ;;  %v3936_v17 = vmul.f32 1.442695, %v3661_v18 }
 0x4a2   :  { %v6228_v20 = vpop.eup %6227  ;;  %6247 = vrcp.f32 %v4306_v49  ;;  %v4312_v44 = vadd.f32 1.0, %v6226_v12  ;;  %v7851_v23 = vpop.f32.mrb[153].mxu1  ;;  %v3662_v49 = vsub.f32 0.0, %v3134_v35  ;;  %v3142_v45 = vadd.f32 %v7818_v41, %v7752_v38 }
 0x4a3   :  { %v6230_v46 = vpop.eup %6229  ;;  %6249 = vrcp.f32 %v4310_v21  ;;  %v4311_v5 = vadd.f32 1.0, %v6228_v20  ;;  %v7853_v43 = vpop.f32.mrb[185].mxu0  ;;  %v3666_v20 = vsub.f32 0.0, %v2945_v27  ;;  %v2967_v19 = vadd.f32 %v7851_v23, %v7754_v52 }
 0x4a4   :  { %v6232_v53 = vpop.eup %6231  ;;  %6251 = vrcp.f32 %v4312_v44  ;;  %v4313_v47 = vadd.f32 1.0, %v6230_v46  ;;  %v7857_v0 = vpop.f32.mrb[154].mxu1  ;;  %v2949_v44 = vadd.f32 %v7816_v40, %v7750_v60  ;;  %v3934_v40 = vmul.f32 1.442695, %v3660_v16 }
 0x4a5   :  { %v7859_v4 = vpop.f32.mrb[186].mxu0  ;;  %v6234_v3 = vpop.eup %6233  ;;  %6253 = vrcp.f32 %v4311_v5  ;;  %v4317_v39 = vadd.f32 1.0, %v6232_v53  ;;  %v3668_v5 = vsub.f32 0.0, %v3138_v8 }
 0x4a6   :  { %v7863_v24 = vpop.f32.mrb[155].mxu1  ;;  %v7865_v6 = vpop.f32.mrb[187].mxu0  ;;  %6255 = vrcp.f32 %v4313_v47  ;;  %v4319_v31 = vadd.f32 1.0, %v6234_v3  ;;  %v3667_v3 = vsub.f32 0.0, %v2947_v62 }
 0x4a7   :  { %v6236_v2 = vpop.eup %6235  ;;  %6257 = vrcp.f32 %v4317_v39  ;;  %v2951_v39 = vadd.f32 %v7820_v15, %v7754_v52  ;;  %v3950_v27 = vmul.f32 1.442695, %v3668_v5 }
 0x4a8   :  { %v6238_v51 = vpop.eup %6237  ;;  %v4318_v10 = vadd.f32 1.0, %v6236_v2  ;;  %6259 = vrcp.f32 %v4319_v31  ;;  %v7877_v12 = vpop.f32.mrb[156].mxu1  ;;  %v3938_v2 = vmul.f32 1.442695, %v3662_v49  ;;  %v3669_v31 = vsub.f32 0.0, %v3140_v54 }
 0x4a9   :  { %v6240_v59 = vpop.eup %6239  ;;  %v4320_v56 = vadd.f32 1.0, %v6238_v51  ;;  %v7879_v21 = vpop.f32.mrb[188].mxu0  ;;  %v3946_v51 = vmul.f32 1.442695, %v3666_v20  ;;  %v3674_v18 = vsub.f32 0.0, %v2951_v39 }
 0x4aa   :  { %v6242_v55 = vpop.eup %6241  ;;  %6261 = vrcp.f32 %v4318_v10  ;;  %v4324_v26 = vadd.f32 1.0, %v6240_v59  ;;  %v7883_v42 = vpop.f32.mrb[157].mxu1  ;;  %v3673_v10 = vsub.f32 0.0, %v2949_v44  ;;  %v3675_v59 = vsub.f32 0.0, %v3142_v45 }
 0x4ab   :  { %v6244_v1 = vpop.eup %6243  ;;  %6263 = vrcp.f32 %v4320_v56  ;;  %v4326_v29 = vadd.f32 1.0, %v6242_v55  ;;  %v7885_v32 = vpop.f32.mrb[189].mxu0  ;;  %v3948_v56 = vmul.f32 1.442695, %v3667_v3  ;;  %v3952_v8 = vmul.f32 1.442695, %v3669_v31 }
 0x4ac   :  { %v6246_v57 = vpop.eup %6245  ;;  %4753 = vst [vmem:[#allocation11 + $0xb8] sm:$0xff] %v6244_v1  ;;  %6265 = vrcp.f32 %v4324_v26  ;;  %v7889_v53 = vpop.f32.mrb[158].mxu1  ;;  %v3960_v62 = vmul.f32 1.442695, %v3673_v10  ;;  %v3964_v49 = vmul.f32 1.442695, %v3675_v59 }
 0x4ad   :  { %v6248_v46 = vpop.eup %6247  ;;  %4752 = vst [vmem:[#allocation11 + $0xb0] sm:$0xff] %v6246_v57  ;;  %6267 = vrcp.f32 %v4326_v29  ;;  %v7891_v47 = vpop.f32.mrb[190].mxu0  ;;  %v3962_v20 = vmul.f32 1.442695, %v3674_v18 }
 0x4ae   :  { %v6250_v30 = vpop.eup %6249  ;;  %4754 = vst [vmem:[#allocation11 + $0xc0] sm:$0xff] %v6248_v46  ;;  %6269 = vpow2.f32 %v3920_v58  ;;  %v7895_v34 = vpop.f32.mrb[159].mxu1 }
 0x4af   :  { %v6252_v22 = vpop.eup %6251  ;;  %4758 = vst [vmem:[#allocation11 + $0xe0] sm:$0xff] %v6250_v30  ;;  %6271 = vpow2.f32 %v3924_v48  ;;  %v7897_v41 = vpop.f32.mrb[191].mxu0  ;;  %v3144_v30 = vadd.f32 %v7822_v7, %v7756_v50  ;;  %v2955_v7 = vadd.f32 %v7825_v9, %v7750_v60  ;;  %v2957_v9 = vadd.f32 %v7829_v33, %v7754_v52 }
 0x4b0   :  { %v6254_v35 = vpop.eup %6253  ;;  %4760 = vst [vmem:[#allocation11 + $0xf0] sm:$0xff] %v6252_v22  ;;  %6273 = vpow2.f32 %v3932_v28  ;;  %v7899_v55 = vpop.f32.mrb[160].mxu1  ;;  %v2959_v33 = vadd.f32 %v7833_v63, %v7750_v60 }
 0x4b1   :  { %v6256_v58 = vpop.eup %6255  ;;  %4759 = vst [vmem:[#allocation11 + $0xe8] sm:$0xff] %v6254_v35  ;;  %6275 = vpow2.f32 %v3936_v17  ;;  %v7901_v26 = vpop.f32.mrb[192].mxu0 }
 0x4b2   :  { %v6258_v15 = vpop.eup %6257  ;;  %4761 = vst [vmem:[#allocation11 + $0xf8] sm:$0xff] %v6256_v58  ;;  %6277 = vpow2.f32 %v3934_v40  ;;  %v7903_v1 = vpop.f32.mrb[161].mxu1 }
 0x4b3   :  { %v6260_v48 = vpop.eup %6259  ;;  %4765 = vst [vmem:[#allocation11 + $0x118] sm:$0xff] %v6258_v15  ;;  %6279 = vpow2.f32 %v3938_v2  ;;  %v7905_v54 = vpop.f32.mrb[193].mxu0 }
 0x4b4   :  { %v6262_v16 = vpop.eup %6261  ;;  %4767 = vst [vmem:[#allocation11 + $0x128] sm:$0xff] %v6260_v48  ;;  %6281 = vpow2.f32 %v3946_v51  ;;  %v7907_v57 = vpop.f32.mrb[162].mxu1  ;;  %v3148_v48 = vadd.f32 %v7827_v25, %v7752_v38  ;;  %v3150_v25 = vadd.f32 %v7831_v14, %v7756_v50 }
 0x4b5   :  { %v6264_v29 = vpop.eup %6263  ;;  %4766 = vst [vmem:[#allocation11 + $0x120] sm:$0xff] %v6262_v16  ;;  %6283 = vpow2.f32 %v3950_v27  ;;  %v7909_v44 = vpop.f32.mrb[194].mxu0  ;;  %v3676_v27 = vsub.f32 0.0, %v3144_v30 }
 0x4b6   :  { %v6266_v28 = vpop.eup %6265  ;;  %4768 = vst [vmem:[#allocation11 + $0x130] sm:$0xff] %v6264_v29  ;;  %6285 = vpow2.f32 %v3948_v56  ;;  %v7911_v46 = vpop.f32.mrb[163].mxu1 }
 0x4b7   :  { %v6268_v17 = vpop.eup %6267  ;;  %4772 = vst [vmem:[#allocation11 + $0x150] sm:$0xff] %v6266_v28  ;;  %6287 = vpow2.f32 %v3952_v8  ;;  %v7913_v5 = vpop.f32.mrb[195].mxu0 }
 0x4b8   :  { %v6270_v45 = vpop.eup %6269  ;;  %4774 = vst [vmem:[#allocation11 + $0x160] sm:$0xff] %v6268_v17  ;;  %6289 = vpow2.f32 %v3960_v62  ;;  %v7917_v35 = vpop.f32.mrb[164].mxu1 }
 0x4b9   :  { %v6272_v40 = vpop.eup %6271  ;;  %v4325_v3 = vadd.f32 1.0, %v6270_v45  ;;  %6291 = vpow2.f32 %v3964_v49  ;;  %v7919_v51 = vpop.f32.mrb[196].mxu0 }
 0x4ba   :  { %v6274_v39 = vpop.eup %6273  ;;  %v4327_v22 = vadd.f32 1.0, %v6272_v40  ;;  %6293 = vpow2.f32 %v3962_v20  ;;  %v7923_v59 = vpop.f32.mrb[165].mxu1  ;;  %v3966_v40 = vmul.f32 1.442695, %v3676_v27  ;;  %v2961_v27 = vadd.f32 %v7839_v37, %v7754_v52 }
 0x4bb   :  { %v6276_v2 = vpop.eup %6275  ;;  %6295 = vrcp.f32 %v4325_v3  ;;  %v4331_v31 = vadd.f32 1.0, %v6274_v39  ;;  %v7925_v15 = vpop.f32.mrb[197].mxu0  ;;  %v3680_v3 = vsub.f32 0.0, %v2955_v7  ;;  %v2965_v37 = vadd.f32 %v7847_v11, %v7750_v60 }
 0x4bc   :  { %v6278_v10 = vpop.eup %6277  ;;  %6297 = vrcp.f32 %v4327_v22  ;;  %v4333_v58 = vadd.f32 1.0, %v6276_v2  ;;  %v7929_v8 = vpop.f32.mrb[166].mxu1  ;;  %v3682_v2 = vsub.f32 0.0, %v3148_v48 }
 0x4bd   :  { %v6280_v56 = vpop.eup %6279  ;;  %6299 = vrcp.f32 %v4331_v31  ;;  %v4332_v18 = vadd.f32 1.0, %v6278_v10  ;;  %v7931_v16 = vpop.f32.mrb[198].mxu0 }
 0x4be   :  { %v6282_v62 = vpop.eup %6281  ;;  %6301 = vrcp.f32 %v4333_v58  ;;  %v4334_v29 = vadd.f32 1.0, %v6280_v56  ;;  %v7935_v49 = vpop.f32.mrb[167].mxu1  ;;  %v3681_v58 = vsub.f32 0.0, %v2957_v9  ;;  %v3152_v56 = vadd.f32 %v7835_v61, %v7752_v38 }
 0x4bf   :  { %v7937_v28 = vpop.f32.mrb[199].mxu0  ;;  %v6284_v20 = vpop.eup %6283  ;;  %6303 = vrcp.f32 %v4332_v18  ;;  %v4338_v17 = vadd.f32 1.0, %v6282_v62  ;;  %v3683_v62 = vsub.f32 0.0, %v3150_v25  ;;  %v3154_v9 = vadd.f32 %v7841_v13, %v7756_v50 }
 0x4c0   :  { %v6286_v45 = vpop.eup %6285  ;;  %6305 = vrcp.f32 %v4334_v29  ;;  %v4340_v30 = vadd.f32 1.0, %v6284_v20  ;;  %v7947_v7 = vpop.f32.mrb[168].mxu1  ;;  %v3974_v20 = vmul.f32 1.442695, %v3680_v3  ;;  %v3978_v3 = vmul.f32 1.442695, %v3682_v2 }
 0x4c1   :  { %v6288_v39 = vpop.eup %6287  ;;  %6307 = vrcp.f32 %v4338_v17  ;;  %v4339_v22 = vadd.f32 1.0, %v6286_v45  ;;  %v7949_v48 = vpop.f32.mrb[200].mxu0  ;;  %v3689_v13 = vsub.f32 0.0, %v3152_v56  ;;  %v3976_v11 = vmul.f32 1.442695, %v3681_v58 }
 0x4c2   :  { %v6290_v31 = vpop.eup %6289  ;;  %6309 = vrcp.f32 %v4340_v30  ;;  %v4341_v10 = vadd.f32 1.0, %v6288_v39  ;;  %v7953_v17 = vpop.f32.mrb[169].mxu1  ;;  %v3687_v30 = vsub.f32 0.0, %v2959_v33  ;;  %v3980_v2 = vmul.f32 1.442695, %v3683_v62 }
 0x4c3   :  { %v6292_v14 = vpop.eup %6291  ;;  %6311 = vrcp.f32 %v4339_v22  ;;  %v4345_v18 = vadd.f32 1.0, %v6290_v31  ;;  %v7955_v61 = vpop.f32.mrb[201].mxu0  ;;  %v3690_v56 = vsub.f32 0.0, %v3154_v9  ;;  %v3992_v58 = vmul.f32 1.442695, %v3689_v13 }
 0x4c4   :  { %v6294_v29 = vpop.eup %6293  ;;  %6313 = vrcp.f32 %v4341_v10  ;;  %v4347_v63 = vadd.f32 1.0, %v6292_v14  ;;  %v7959_v39 = vpop.f32.mrb[170].mxu1  ;;  %v3158_v10 = vadd.f32 %v7849_v36, %v7752_v38  ;;  %v3160_v36 = vadd.f32 %v7853_v43, %v7756_v50 }
 0x4c5   :  { %v6296_v45 = vpop.eup %6295  ;;  %6315 = vrcp.f32 %v4345_v18  ;;  %v4346_v25 = vadd.f32 1.0, %v6294_v29  ;;  %v7961_v22 = vpop.f32.mrb[202].mxu0  ;;  %v3688_v29 = vsub.f32 0.0, %v2961_v27 }
 0x4c6   :  { %8631 = vst [vmem:[#allocation17_spill] sm:$0xff] %v7961_v22  ;;  %v6298_v31 = vpop.eup %6297  ;;  %4773 = vst [vmem:[#allocation11 + $0x158] sm:$0xff] %v6296_v45  ;;  %6317 = vrcp.f32 %v4347_v63  ;;  %v7965_v14 = vpop.f32.mrb[171].mxu1  ;;  %v3988_v45 = vmul.f32 1.442695, %v3687_v30  ;;  %v3696_v27 = vsub.f32 0.0, %v3158_v10 }
 0x4c7   :  { %v7967_v18 = vpop.f32.mrb[203].mxu0  ;;  %v6300_v33 = vpop.eup %6299  ;;  %4775 = vst [vmem:[#allocation11 + $0x168] sm:$0xff] %v6298_v31  ;;  %6319 = vrcp.f32 %v4346_v25  ;;  %v3990_v23 = vmul.f32 1.442695, %v3688_v29  ;;  %v3697_v30 = vsub.f32 0.0, %v3160_v36 }
 0x4c8   :  { %8632 = vst [vmem:[#allocation18_spill] sm:$0xff] %v7967_v18  ;;  %v6302_v22 = vpop.eup %6301  ;;  %4779 = vst [vmem:[#allocation11 + $0x188] sm:$0xff] %v6300_v33  ;;  %6321 = vpow2.f32 %v3966_v40  ;;  %v3694_v18 = vsub.f32 0.0, %v2965_v37  ;;  %v3695_v40 = vsub.f32 0.0, %v2967_v19  ;;  %v7973_v62 = vpop.f32.mrb[172].mxu1 }
 0x4c9   :  { %v6304_v63 = vpop.eup %6303  ;;  %4781 = vst [vmem:[#allocation11 + $0x198] sm:$0xff] %v6302_v22  ;;  %6323 = vpow2.f32 %v3974_v20  ;;  %v7975_v9 = vpop.f32.mrb[204].mxu0  ;;  %v3994_v20 = vmul.f32 1.442695, %v3690_v56 }
 0x4ca   :  { %v6306_v31 = vpop.eup %6305  ;;  %4780 = vst [vmem:[#allocation11 + $0x190] sm:$0xff] %v6304_v63  ;;  %6325 = vpow2.f32 %v3978_v3  ;;  %v7977_v37 = vpop.f32.mrb[173].mxu1  ;;  %v4002_v13 = vmul.f32 1.442695, %v3694_v18  ;;  %v4004_v36 = vmul.f32 1.442695, %v3695_v40 }
 0x4cb   :  { %v6308_v25 = vpop.eup %6307  ;;  %4782 = vst [vmem:[#allocation11 + $0x1a0] sm:$0xff] %v6306_v31  ;;  %6327 = vpow2.f32 %v3976_v11  ;;  %v7979_v22 = vpop.f32.mrb[205].mxu0  ;;  %v4006_v11 = vmul.f32 1.442695, %v3696_v27  ;;  %v4008_v18 = vmul.f32 1.442695, %v3697_v30 }
 0x4cc   :  { %v6310_v43 = vpop.eup %6309  ;;  %4786 = vst [vmem:[#allocation11 + $0x1c0] sm:$0xff] %v6308_v25  ;;  %6329 = vpow2.f32 %v3980_v2  ;;  %v7981_v10 = vpop.f32.mrb[174].mxu1 }
 0x4cd   :  { %v6312_v3 = vpop.eup %6311  ;;  %4788 = vst [vmem:[#allocation11 + $0x1d0] sm:$0xff] %v6310_v43  ;;  %6331 = vpow2.f32 %v3988_v45  ;;  %v7983_v19 = vpop.f32.mrb[206].mxu0 }
 0x4ce   :  { %v6314_v33 = vpop.eup %6313  ;;  %4787 = vst [vmem:[#allocation11 + $0x1c8] sm:$0xff] %v6312_v3  ;;  %6333 = vpow2.f32 %v3992_v58  ;;  %v7985_v29 = vpop.f32.mrb[175].mxu1  ;;  %v2969_v58 = vadd.f32 %v7857_v0, %v7750_v60 }
 0x4cf   :  { %v7987_v2 = vpop.f32.mrb[207].mxu0  ;;  %v6316_v56 = vpop.eup %6315  ;;  %4789 = vst [vmem:[#allocation11 + $0x1d8] sm:$0xff] %v6314_v33  ;;  %6335 = vpow2.f32 %v3990_v23  ;;  %v3162_v23 = vadd.f32 %v7859_v4, %v7752_v38 }
 0x4d0   :  { %v6318_v63 = vpop.eup %6317  ;;  %4793 = vst [vmem:[#allocation11 + $0x1f8] sm:$0xff] %v6316_v56  ;;  %6337 = vpow2.f32 %v3994_v20  ;;  %v7993_v40 = vpop.f32.mrb[176].mxu1 }
 0x4d1   :  { %v6320_v45 = vpop.eup %6319  ;;  %4795 = vst [vmem:[#allocation11 + $0x208] sm:$0xff] %v6318_v63  ;;  %6339 = vpow2.f32 %v4002_v13  ;;  %v7995_v43 = vpop.f32.mrb[208].mxu0  ;;  %v3701_v63 = vsub.f32 0.0, %v2969_v58  ;;  %v3164_v58 = vadd.f32 %v7865_v6, %v7756_v50 }
 0x4d2   :  { %v6322_v31 = vpop.eup %6321  ;;  %4794 = vst [vmem:[#allocation11 + $0x200] sm:$0xff] %v6320_v45  ;;  %6341 = vpow2.f32 %v4006_v11  ;;  %v7997_v3 = vpop.f32.mrb[177].mxu1 }
 0x4d3   :  { %v6324_v27 = vpop.eup %6323  ;;  %v4348_v25 = vadd.f32 1.0, %v6322_v31  ;;  %6343 = vpow2.f32 %v4004_v36  ;;  %8633 = vst [vmem:[#allocation19_spill] sm:$0xff] %v7997_v3  ;;  %v7999_v13 = vpop.f32.mrb[209].mxu0  ;;  %v3703_v3 = vsub.f32 0.0, %v3162_v23 }
 0x4d4   :  { %v6326_v20 = vpop.eup %6325  ;;  %v4352_v30 = vadd.f32 1.0, %v6324_v27  ;;  %6345 = vpow2.f32 %v4008_v18  ;;  %8634 = vst [vmem:[#allocation20_spill] sm:$0xff] %v7999_v13  ;;  %v8001_v11 = vpop.f32.mrb[178].mxu1 }
 0x4d5   :  { %v6328_v33 = vpop.eup %6327  ;;  %6347 = vrcp.f32 %v4348_v25  ;;  %v4354_v0 = vadd.f32 1.0, %v6326_v20  ;;  %8635 = vst [vmem:[#allocation21_spill] sm:$0xff] %v8001_v11  ;;  %v8003_v56 = vpop.f32.mrb[210].mxu0  ;;  %v2971_v20 = vadd.f32 %v7863_v24, %v7754_v52  ;;  %v3168_v24 = vadd.f32 %v7879_v21, %v7752_v38 }
 0x4d6   :  { %8636 = vst [vmem:[#allocation22_spill] sm:$0xff] %v8003_v56  ;;  %v6330_v36 = vpop.eup %6329  ;;  %6349 = vrcp.f32 %v4352_v30  ;;  %v4353_v4 = vadd.f32 1.0, %v6328_v33  ;;  %v8005_v45 = vpop.f32.mrb[179].mxu1  ;;  %v3170_v21 = vadd.f32 %v7885_v32, %v7756_v50  ;;  %v3172_v32 = vadd.f32 %v7891_v47, %v7752_v38 }
 0x4d7   :  { %v8007_v31 = vpop.f32.mrb[211].mxu0  ;;  %v6332_v18 = vpop.eup %6331  ;;  %6351 = vrcp.f32 %v4354_v0  ;;  %v4355_v27 = vadd.f32 1.0, %v6330_v36  ;;  %v2975_v0 = vadd.f32 %v7877_v12, %v7750_v60 }
 0x4d8   :  { %8637 = vst [vmem:[#allocation23_spill] sm:$0xff] %v8007_v31  ;;  %v6334_v13 = vpop.eup %6333  ;;  %6353 = vrcp.f32 %v4353_v4  ;;  %v4359_v25 = vadd.f32 1.0, %v6332_v18  ;;  %v4016_v31 = vmul.f32 1.442695, %v3701_v63  ;;  %v4020_v4 = vmul.f32 1.442695, %v3703_v3 }
 0x4d9   :  { %v6336_v11 = vpop.eup %6335  ;;  %6355 = vrcp.f32 %v4355_v27  ;;  %v4361_v56 = vadd.f32 1.0, %v6334_v13  ;;  %v8017_v18 = vpop.f32.mrb[180].mxu1 }
 0x4da   :  { %v6338_v30 = vpop.eup %6337  ;;  %6357 = vrcp.f32 %v4359_v25  ;;  %v4360_v33 = vadd.f32 1.0, %v6336_v11  ;;  %8638 = vst [vmem:[#allocation24_spill] sm:$0xff] %v8017_v18  ;;  %v8019_v13 = vpop.f32.mrb[212].mxu0  ;;  %v3702_v25 = vsub.f32 0.0, %v2971_v20  ;;  %v2977_v11 = vadd.f32 %v7883_v42, %v7754_v52 }
 0x4db   :  { %v6340_v23 = vpop.eup %6339  ;;  %6359 = vrcp.f32 %v4361_v56  ;;  %v4362_v36 = vadd.f32 1.0, %v6338_v30  ;;  %8639 = vst [vmem:[#allocation25_spill] sm:$0xff] %v8019_v13  ;;  %v8023_v63 = vpop.f32.mrb[181].mxu1  ;;  %v3704_v30 = vsub.f32 0.0, %v3164_v58  ;;  %v2979_v42 = vadd.f32 %v7889_v53, %v7750_v60 }
 0x4dc   :  { %v6342_v27 = vpop.eup %6341  ;;  %6361 = vrcp.f32 %v4360_v33  ;;  %v4366_v6 = vadd.f32 1.0, %v6340_v23  ;;  %8640 = vst [vmem:[#allocation26_spill] sm:$0xff] %v8023_v63  ;;  %v8025_v12 = vpop.f32.mrb[213].mxu0  ;;  %v3708_v23 = vsub.f32 0.0, %v2975_v0  ;;  %v2981_v0 = vadd.f32 %v7895_v34, %v7754_v52 }
 0x4dd   :  { %8641 = vst [vmem:[#allocation27_spill] sm:$0xff] %v8025_v12  ;;  %v6344_v56 = vpop.eup %6343  ;;  %6363 = vrcp.f32 %v4362_v36  ;;  %v4368_v3 = vadd.f32 1.0, %v6342_v27  ;;  %v8029_v18 = vpop.f32.mrb[182].mxu1  ;;  %v3710_v27 = vsub.f32 0.0, %v3168_v24 }
 0x4de   :  { %8642 = vst [vmem:[#allocation28_spill] sm:$0xff] %v8029_v18  ;;  %v8031_v13 = vpop.f32.mrb[214].mxu0  ;;  %v6346_v33 = vpop.eup %6345  ;;  %6365 = vrcp.f32 %v4366_v6  ;;  %v4367_v20 = vadd.f32 1.0, %v6344_v56  ;;  %v4018_v6 = vmul.f32 1.442695, %v3702_v25  ;;  %v3709_v56 = vsub.f32 0.0, %v2977_v11 }
 0x4df   :  { %v8035_v63 = vpop.f32.mrb[183].mxu1  ;;  %v8037_v12 = vpop.f32.mrb[215].mxu0  ;;  %6367 = vrcp.f32 %v4368_v3  ;;  %v4369_v58 = vadd.f32 1.0, %v6346_v33  ;;  %v3174_v3 = vadd.f32 %v7897_v41, %v7756_v50  ;;  %v4030_v47 = vmul.f32 1.442695, %v3708_v23 }
 0x4e0   :  { %8643 = vst [vmem:[#allocation29_spill] sm:$0xff] %v8035_v63  ;;  %8644 = vst [vmem:[#allocation30_spill] sm:$0xff] %v8037_v12  ;;  %v6348_v36 = vpop.eup %6347  ;;  %6369 = vrcp.f32 %v4367_v20  ;;  %v4022_v63 = vmul.f32 1.442695, %v3704_v30  ;;  %v3711_v12 = vsub.f32 0.0, %v3170_v21  ;;  %v3715_v33 = vsub.f32 0.0, %v2979_v42 }
 0x4e1   :  { %v6350_v18 = vpop.eup %6349  ;;  %4796 = vst [vmem:[#allocation11 + $0x210] sm:$0xff] %v6348_v36  ;;  %6371 = vrcp.f32 %v4369_v58  ;;  %v2985_v25 = vadd.f32 %v7899_v55, %v7750_v60  ;;  %v4034_v34 = vmul.f32 1.442695, %v3710_v27  ;;  %v3717_v20 = vsub.f32 0.0, %v3172_v32  ;;  %v8049_v30 = vpop.f32.mrb[216].mxu0 }
 0x4e2   :  { %v6352_v53 = vpop.eup %6351  ;;  %4800 = vst [vmem:[#allocation11 + $0x230] sm:$0xff] %v6350_v18  ;;  %6373 = vpow2.f32 %v4016_v31  ;;  %v8047_v18 = vpop.f32.mrb[184].mxu1  ;;  %v4032_v41 = vmul.f32 1.442695, %v3709_v56  ;;  %v3716_v36 = vsub.f32 0.0, %v2981_v0 }
 0x4e3   :  { %v6354_v24 = vpop.eup %6353  ;;  %4802 = vst [vmem:[#allocation11 + $0x240] sm:$0xff] %v6352_v53  ;;  %6375 = vpow2.f32 %v4020_v4  ;;  %v8051_v31 = vpop.f32.mrb[185].mxu1  ;;  %v4036_v55 = vmul.f32 1.442695, %v3711_v12  ;;  %v3718_v4 = vsub.f32 0.0, %v3174_v3 }
 0x4e4   :  { %v6356_v11 = vpop.eup %6355  ;;  %4801 = vst [vmem:[#allocation11 + $0x238] sm:$0xff] %v6354_v24  ;;  %6377 = vpow2.f32 %v4018_v6  ;;  %v8053_v23 = vpop.f32.mrb[217].mxu0  ;;  %v4044_v53 = vmul.f32 1.442695, %v3715_v33  ;;  %v3722_v6 = vsub.f32 0.0, %v2985_v25 }
 0x4e5   :  { %v6358_v21 = vpop.eup %6357  ;;  %4803 = vst [vmem:[#allocation11 + $0x248] sm:$0xff] %v6356_v11  ;;  %6379 = vpow2.f32 %v4022_v63  ;;  %v8055_v58 = vpop.f32.mrb[186].mxu1  ;;  %v4048_v11 = vmul.f32 1.442695, %v3717_v20  ;;  %v4046_v12 = vmul.f32 1.442695, %v3716_v36 }
 0x4e6   :  { %v6360_v42 = vpop.eup %6359  ;;  %4807 = vst [vmem:[#allocation11 + $0x268] sm:$0xff] %v6358_v21  ;;  %v8057_v27 = vpop.f32.mrb[218].mxu0  ;;  %6381 = vpow2.f32 %v4030_v47  ;;  %v4050_v21 = vmul.f32 1.442695, %v3718_v4  ;;  %v4058_v47 = vmul.f32 1.442695, %v3722_v6  ;;  %v3178_v4 = vadd.f32 %v7901_v26, %v7752_v38 }
 0x4e7   :  { %v6362_v32 = vpop.eup %6361  ;;  %4809 = vst [vmem:[#allocation11 + $0x278] sm:$0xff] %v6360_v42  ;;  %v8059_v56 = vpop.f32.mrb[187].mxu1  ;;  %6383 = vpow2.f32 %v4034_v34 }
 0x4e8   :  { %v8061_v0 = vpop.f32.mrb[219].mxu0  ;;  %v6364_v24 = vpop.eup %6363  ;;  %4808 = vst [vmem:[#allocation11 + $0x270] sm:$0xff] %v6362_v32  ;;  %6385 = vpow2.f32 %v4032_v41 }
 0x4e9   :  { %v6366_v63 = vpop.eup %6365  ;;  %4810 = vst [vmem:[#allocation11 + $0x280] sm:$0xff] %v6364_v24  ;;  %6387 = vpow2.f32 %v4036_v55  ;;  %v8063_v25 = vpop.f32.mrb[188].mxu1 }
 0x4ea   :  { %v6368_v3 = vpop.eup %6367  ;;  %4814 = vst [vmem:[#allocation11 + $0x2a0] sm:$0xff] %v6366_v63  ;;  %6389 = vpow2.f32 %v4044_v53  ;;  %v8065_v32 = vpop.f32.mrb[220].mxu0  ;;  %v2987_v63 = vadd.f32 %v7903_v1, %v7754_v52 }
 0x4eb   :  { %v6370_v42 = vpop.eup %6369  ;;  %4816 = vst [vmem:[#allocation11 + $0x2b0] sm:$0xff] %v6368_v3  ;;  %6391 = vpow2.f32 %v4048_v11  ;;  %v8067_v20 = vpop.f32.mrb[189].mxu1 }
 0x4ec   :  { %v6372_v33 = vpop.eup %6371  ;;  %4815 = vst [vmem:[#allocation11 + $0x2a8] sm:$0xff] %v6370_v42  ;;  %6393 = vpow2.f32 %v4046_v12  ;;  %v8069_v41 = vpop.f32.mrb[221].mxu0 }
 0x4ed   :  { %v6374_v34 = vpop.eup %6373  ;;  %4817 = vst [vmem:[#allocation11 + $0x2b8] sm:$0xff] %v6372_v33  ;;  %8645 = vst [vmem:[#allocation31_spill] sm:$0xff] %v8069_v41  ;;  %6395 = vpow2.f32 %v4050_v21  ;;  %v8073_v53 = vpop.f32.mrb[190].mxu1  ;;  %v3723_v41 = vsub.f32 0.0, %v2987_v63 }
 0x4ee   :  { %v6376_v36 = vpop.eup %6375  ;;  %v4373_v55 = vadd.f32 1.0, %v6374_v34  ;;  %8646 = vst [vmem:[#allocation32_spill] sm:$0xff] %v8073_v53  ;;  %v8075_v6 = vpop.f32.mrb[222].mxu0  ;;  %6397 = vpow2.f32 %v4058_v47  ;;  %v3180_v34 = vadd.f32 %v7905_v54, %v7756_v50  ;;  %v3724_v47 = vsub.f32 0.0, %v3178_v4 }
 0x4ef   :  { %8647 = vst [vmem:[#allocation33_spill] sm:$0xff] %v8075_v6  ;;  %v6378_v24 = vpop.eup %6377  ;;  %v4375_v11 = vadd.f32 1.0, %v6376_v36  ;;  %v8079_v12 = vpop.f32.mrb[191].mxu1  ;;  %v3182_v4 = vadd.f32 %v7909_v44, %v7752_v38 }
 0x4f0   :  { %8648 = vst [vmem:[#allocation34_spill] sm:$0xff] %v8079_v12  ;;  %v8081_v3 = vpop.f32.mrb[223].mxu0  ;;  %v6380_v42 = vpop.eup %6379  ;;  %6399 = vrcp.f32 %v4373_v55  ;;  %v4374_v21 = vadd.f32 1.0, %v6378_v24  ;;  %v2989_v55 = vadd.f32 %v7907_v57, %v7750_v60  ;;  %v2991_v57 = vadd.f32 %v7911_v46, %v7754_v52 }
 0x4f1   :  { %8649 = vst [vmem:[#allocation35_spill] sm:$0xff] %v8081_v3  ;;  %v6382_v33 = vpop.eup %6381  ;;  %6401 = vrcp.f32 %v4375_v11  ;;  %v4376_v26 = vadd.f32 1.0, %v6380_v42  ;;  %v8087_v24 = vpop.f32.mrb[192].mxu1  ;;  %v3731_v46 = vsub.f32 0.0, %v3182_v4  ;;  %v3190_v4 = vadd.f32 %v7925_v15, %v7756_v50 }
 0x4f2   :  { %v6384_v6 = vpop.eup %6383  ;;  %6403 = vrcp.f32 %v4374_v21  ;;  %v4380_v36 = vadd.f32 1.0, %v6382_v33  ;;  %v8089_v11 = vpop.f32.mrb[224].mxu0  ;;  %v3725_v21 = vsub.f32 0.0, %v3180_v34  ;;  %v3729_v44 = vsub.f32 0.0, %v2989_v55 }
 0x4f3   :  { %v6386_v53 = vpop.eup %6385  ;;  %6405 = vrcp.f32 %v4376_v26  ;;  %v4382_v1 = vadd.f32 1.0, %v6384_v6  ;;  %8650 = vst [vmem:[#allocation36_spill] sm:$0xff] %v8089_v11  ;;  %v8093_v33 = vpop.f32.mrb[193].mxu1  ;;  %v4060_v11 = vmul.f32 1.442695, %v3723_v41  ;;  %v3192_v15 = vadd.f32 %v7931_v16, %v7752_v38 }
 0x4f4   :  { %v6388_v12 = vpop.eup %6387  ;;  %6407 = vrcp.f32 %v4380_v36  ;;  %v4381_v3 = vadd.f32 1.0, %v6386_v53  ;;  %8651 = vst [vmem:[#allocation37_spill] sm:$0xff] %v8093_v33  ;;  %v4062_v53 = vmul.f32 1.442695, %v3724_v47  ;;  %v2995_v33 = vadd.f32 %v7917_v35, %v7750_v60  ;;  %v8107_v55 = vpop.f32.mrb[194].mxu1 }
 0x4f5   :  { %v6390_v42 = vpop.eup %6389  ;;  %6409 = vrcp.f32 %v4382_v1  ;;  %v4383_v54 = vadd.f32 1.0, %v6388_v12  ;;  %v3184_v12 = vadd.f32 %v7913_v5, %v7756_v50  ;;  %v3730_v5 = vsub.f32 0.0, %v2991_v57  ;;  %8652 = vst [vmem:[#allocation38_spill] sm:$0xff] %v8107_v55 }
 0x4f6   :  { %v6392_v6 = vpop.eup %6391  ;;  %6411 = vrcp.f32 %v4381_v3  ;;  %v4387_v63 = vadd.f32 1.0, %v6390_v42  ;;  %v8101_v3 = vpop.f32.mrb[225].mxu0  ;;  %v3736_v57 = vsub.f32 0.0, %v2995_v33  ;;  %v3745_v16 = vsub.f32 0.0, %v3192_v15 }
 0x4f7   :  { %v6394_v26 = vpop.eup %6393  ;;  %6413 = vrcp.f32 %v4383_v54  ;;  %v4389_v36 = vadd.f32 1.0, %v6392_v6  ;;  %v3188_v54 = vadd.f32 %v7919_v51, %v7752_v38 }
 0x4f8   :  { %v6396_v34 = vpop.eup %6395  ;;  %6415 = vrcp.f32 %v4387_v63  ;;  %v4388_v1 = vadd.f32 1.0, %v6394_v26  ;;  %v2997_v63 = vadd.f32 %v7923_v59, %v7754_v52  ;;  %v8109_v26 = vpop.f32.mrb[226].mxu0  ;;  %v2999_v59 = vadd.f32 %v7929_v8, %v7750_v60 }
 0x4f9   :  { %v6398_v47 = vpop.eup %6397  ;;  %6417 = vrcp.f32 %v4389_v36  ;;  %v4390_v42 = vadd.f32 1.0, %v6396_v34  ;;  %8653 = vst [vmem:[#allocation39_spill] sm:$0xff] %v8109_v26  ;;  %v4064_v36 = vmul.f32 1.442695, %v3725_v21  ;;  %v3732_v34 = vsub.f32 0.0, %v3184_v12  ;;  %v8117_v55 = vpop.f32.mrb[227].mxu0 }
 0x4fa   :  { %v6400_v41 = vpop.eup %6399  ;;  %6419 = vrcp.f32 %v4388_v1  ;;  %v4394_v6 = vadd.f32 1.0, %v6398_v47  ;;  %v4072_v1 = vmul.f32 1.442695, %v3729_v44  ;;  %v8115_v47 = vpop.f32.mrb[195].mxu1  ;;  %8654 = vst [vmem:[#allocation40_spill] sm:$0xff] %v8117_v55  ;;  %v3738_v12 = vsub.f32 0.0, %v3188_v54 }
 0x4fb   :  { %v6402_v35 = vpop.eup %6401  ;;  %4821 = vst [vmem:[#allocation11 + $0x2d8] sm:$0xff] %v6400_v41  ;;  %6421 = vrcp.f32 %v4390_v42  ;;  %v4076_v21 = vmul.f32 1.442695, %v3731_v46  ;;  %v4074_v44 = vmul.f32 1.442695, %v3730_v5  ;;  %v3737_v33 = vsub.f32 0.0, %v2997_v63 }
 0x4fc   :  { %v6404_v51 = vpop.eup %6403  ;;  %4823 = vst [vmem:[#allocation11 + $0x2e8] sm:$0xff] %v6402_v35  ;;  %6423 = vrcp.f32 %v4394_v6  ;;  %v4078_v8 = vmul.f32 1.442695, %v3732_v34  ;;  %v3739_v6 = vsub.f32 0.0, %v3190_v4  ;;  %v4090_v54 = vmul.f32 1.442695, %v3738_v12 }
 0x4fd   :  { %v6406_v26 = vpop.eup %6405  ;;  %4822 = vst [vmem:[#allocation11 + $0x2e0] sm:$0xff] %v6404_v51  ;;  %6425 = vpow2.f32 %v4062_v53  ;;  %v4086_v51 = vmul.f32 1.442695, %v3736_v57  ;;  %v3743_v53 = vsub.f32 0.0, %v2999_v59  ;;  %v8121_v5 = vpop.f32.mrb[196].mxu1 }
 0x4fe   :  { %v6408_v42 = vpop.eup %6407  ;;  %4824 = vst [vmem:[#allocation11 + $0x2f0] sm:$0xff] %v6406_v26  ;;  %6427 = vpow2.f32 %v4060_v11  ;;  %v4088_v11 = vmul.f32 1.442695, %v3737_v33  ;;  %v8123_v63 = vpop.f32.mrb[228].mxu0  ;;  %v4104_v15 = vmul.f32 1.442695, %v3745_v16 }
 0x4ff   :  { %v6410_v41 = vpop.eup %6409  ;;  %4828 = vst [vmem:[#allocation11 + $0x310] sm:$0xff] %v6408_v42  ;;  %6429 = vpow2.f32 %v4064_v36  ;;  %v4092_v36 = vmul.f32 1.442695, %v3739_v6  ;;  %v8125_v34 = vpop.f32.mrb[197].mxu1  ;;  %v4100_v57 = vmul.f32 1.442695, %v3743_v53 }
 0x500   :  { %v6412_v35 = vpop.eup %6411  ;;  %4830 = vst [vmem:[#allocation11 + $0x320] sm:$0xff] %v6410_v41  ;;  %6431 = vpow2.f32 %v4072_v1  ;;  %v8127_v4 = vpop.f32.mrb[229].mxu0  ;;  %v3001_v41 = vadd.f32 %v7935_v49, %v7754_v52 }
 0x501   :  { %v6414_v46 = vpop.eup %6413  ;;  %4829 = vst [vmem:[#allocation11 + $0x318] sm:$0xff] %v6412_v35  ;;  %6433 = vpow2.f32 %v4076_v21  ;;  %v8129_v59 = vpop.f32.mrb[198].mxu1  ;;  %v3194_v35 = vadd.f32 %v7937_v28, %v7756_v50  ;;  %v3005_v28 = vadd.f32 %v7947_v7, %v7750_v60  ;;  %v3200_v7 = vadd.f32 %v7955_v61, %v7756_v50 }
 0x502   :  { %v6416_v55 = vpop.eup %6415  ;;  %4831 = vst [vmem:[#allocation11 + $0x328] sm:$0xff] %v6414_v46  ;;  %6435 = vpow2.f32 %v4074_v44  ;;  %v8131_v21 = vpop.f32.mrb[230].mxu0  ;;  %v3011_v61 = vadd.f32 %v7965_v14, %v7754_v52 }
 0x503   :  { %v6418_v26 = vpop.eup %6417  ;;  %4835 = vst [vmem:[#allocation11 + $0x348] sm:$0xff] %v6416_v55  ;;  %6437 = vpow2.f32 %v4078_v8  ;;  %v8133_v42 = vpop.f32.mrb[199].mxu1  ;;  %v3746_v49 = vsub.f32 0.0, %v3194_v35 }
 0x504   :  { %v6420_v1 = vpop.eup %6419  ;;  %4837 = vst [vmem:[#allocation11 + $0x358] sm:$0xff] %v6418_v26  ;;  %6439 = vpow2.f32 %v4086_v51  ;;  %v8135_v55 = vpop.f32.mrb[231].mxu0  ;;  %v3744_v26 = vsub.f32 0.0, %v3001_v41 }
 0x505   :  { %v6422_v12 = vpop.eup %6421  ;;  %4836 = vst [vmem:[#allocation11 + $0x350] sm:$0xff] %v6420_v1  ;;  %6441 = vpow2.f32 %v4090_v54 }
 0x506   :  { %v6424_v44 = vpop.eup %6423  ;;  %4838 = vst [vmem:[#allocation11 + $0x360] sm:$0xff] %v6422_v12  ;;  %6443 = vpow2.f32 %v4088_v11  ;;  %v4102_v41 = vmul.f32 1.442695, %v3744_v26 }
 0x507   :  { %v6426_v33 = vpop.eup %6425  ;;  %4842 = vst [vmem:[#allocation11 + $0x380] sm:$0xff] %v6424_v44  ;;  %6445 = vpow2.f32 %v4092_v36 }
 0x508   :  { %v6428_v8 = vpop.eup %6427  ;;  %v4396_v6 = vadd.f32 1.0, %v6426_v33  ;;  %6447 = vpow2.f32 %v4100_v57  ;;  %v3198_v33 = vadd.f32 %v7949_v48, %v7752_v38  ;;  %v3009_v48 = vadd.f32 %v7959_v39, %v7750_v60  ;;  %v8656_v39 = vld [vmem:[#allocation18_spill] sm:$0xff] }
 0x509   :  { %v6430_v51 = vpop.eup %6429  ;;  %v4395_v53 = vadd.f32 1.0, %v6428_v8  ;;  %6449 = vpow2.f32 %v4104_v15 }
 0x50a   :  { %v6432_v46 = vpop.eup %6431  ;;  %6451 = vrcp.f32 %v4396_v6  ;;  %v4397_v54 = vadd.f32 1.0, %v6430_v51  ;;  %v3007_v51 = vadd.f32 %v7953_v17, %v7754_v52  ;;  %v8655_v17 = vld [vmem:[#allocation17_spill] sm:$0xff] }
 0x50b   :  { %v6434_v16 = vpop.eup %6433  ;;  %6453 = vrcp.f32 %v4395_v53  ;;  %v4401_v11 = vadd.f32 1.0, %v6432_v46  ;;  %v4106_v46 = vmul.f32 1.442695, %v3746_v49 }
 0x50c   :  { %v6436_v36 = vpop.eup %6435  ;;  %6455 = vrcp.f32 %v4397_v54  ;;  %v4403_v1 = vadd.f32 1.0, %v6434_v16 }
 0x50d   :  { %v6438_v12 = vpop.eup %6437  ;;  %6457 = vrcp.f32 %v4401_v11  ;;  %v4402_v57 = vadd.f32 1.0, %v6436_v36  ;;  %v3750_v11 = vsub.f32 0.0, %v3005_v28 }
 0x50e   :  { %v6440_v44 = vpop.eup %6439  ;;  %6459 = vrcp.f32 %v4403_v1  ;;  %v4404_v15 = vadd.f32 1.0, %v6438_v12  ;;  %v3752_v1 = vsub.f32 0.0, %v3198_v33  ;;  %v3202_v12 = vadd.f32 %v8655_v17, %v7752_v38 }
 0x50f   :  { %v6442_v8 = vpop.eup %6441  ;;  %6461 = vrcp.f32 %v4402_v57  ;;  %v4408_v6 = vadd.f32 1.0, %v6440_v44  ;;  %v3751_v44 = vsub.f32 0.0, %v3007_v51  ;;  %v4114_v33 = vmul.f32 1.442695, %v3750_v11 }
 0x510   :  { %v6444_v35 = vpop.eup %6443  ;;  %6463 = vrcp.f32 %v4404_v15  ;;  %v4410_v53 = vadd.f32 1.0, %v6442_v8  ;;  %v3753_v8 = vsub.f32 0.0, %v3200_v7  ;;  %v4118_v51 = vmul.f32 1.442695, %v3752_v1 }
 0x511   :  { %v6446_v54 = vpop.eup %6445  ;;  %6465 = vrcp.f32 %v4408_v6  ;;  %v4409_v16 = vadd.f32 1.0, %v6444_v35  ;;  %v3204_v6 = vadd.f32 %v8656_v39, %v7756_v50  ;;  %v3759_v14 = vsub.f32 0.0, %v3202_v12 }
 0x512   :  { %v6448_v36 = vpop.eup %6447  ;;  %6467 = vrcp.f32 %v4410_v53  ;;  %v4411_v26 = vadd.f32 1.0, %v6446_v54  ;;  %v3757_v53 = vsub.f32 0.0, %v3009_v48  ;;  %v3015_v54 = vadd.f32 %v7973_v62, %v7750_v60  ;;  %v8163_v48 = vpop.f32.mrb[200].mxu1 }
 0x513   :  { %v6450_v57 = vpop.eup %6449  ;;  %6469 = vrcp.f32 %v4409_v16  ;;  %v4415_v49 = vadd.f32 1.0, %v6448_v36  ;;  %v3208_v36 = vadd.f32 %v7975_v9, %v7752_v38  ;;  %v3758_v17 = vsub.f32 0.0, %v3011_v61 }
 0x514   :  { %v6452_v15 = vpop.eup %6451  ;;  %6471 = vrcp.f32 %v4411_v26  ;;  %v4417_v28 = vadd.f32 1.0, %v6450_v57  ;;  %v4116_v26 = vmul.f32 1.442695, %v3751_v44  ;;  %v3017_v11 = vadd.f32 %v7977_v37, %v7754_v52  ;;  %v8165_v57 = vpop.f32.mrb[232].mxu0 }
 0x515   :  { %v6454_v35 = vpop.eup %6453  ;;  %4844 = vst [vmem:[#allocation11 + $0x390] sm:$0xff] %v6452_v15  ;;  %6473 = vrcp.f32 %v4415_v49  ;;  %v4120_v1 = vmul.f32 1.442695, %v3753_v8  ;;  %v3760_v12 = vsub.f32 0.0, %v3204_v6  ;;  %v8167_v49 = vpop.f32.mrb[201].mxu1  ;;  %v3764_v44 = vsub.f32 0.0, %v3015_v54 }
 0x516   :  { %v6456_v16 = vpop.eup %6455  ;;  %4843 = vst [vmem:[#allocation11 + $0x388] sm:$0xff] %v6454_v35  ;;  %6475 = vrcp.f32 %v4417_v28  ;;  %v8169_v9 = vpop.f32.mrb[233].mxu0  ;;  %v4132_v39 = vmul.f32 1.442695, %v3759_v14 }
 0x517   :  { %v6458_v7 = vpop.eup %6457  ;;  %4845 = vst [vmem:[#allocation11 + $0x398] sm:$0xff] %v6456_v16  ;;  %6477 = vpow2.f32 %v4102_v41  ;;  %v4128_v41 = vmul.f32 1.442695, %v3757_v53  ;;  %v8171_v61 = vpop.f32.mrb[202].mxu1  ;;  %v4130_v16 = vmul.f32 1.442695, %v3758_v17 }
 0x518   :  { %v6460_v62 = vpop.eup %6459  ;;  %4849 = vst [vmem:[#allocation11 + $0x3b8] sm:$0xff] %v6458_v7  ;;  %6479 = vpow2.f32 %v4106_v46  ;;  %v8173_v37 = vpop.f32.mrb[234].mxu0  ;;  %v3766_v46 = vsub.f32 0.0, %v3208_v36  ;;  %v4134_v54 = vmul.f32 1.442695, %v3760_v12 }
 0x519   :  { %v6462_v15 = vpop.eup %6461  ;;  %4851 = vst [vmem:[#allocation11 + $0x3c8] sm:$0xff] %v6460_v62  ;;  %6481 = vpow2.f32 %v4114_v33  ;;  %v8175_v8 = vpop.f32.mrb[203].mxu1  ;;  %v3765_v33 = vsub.f32 0.0, %v3017_v11  ;;  %v4142_v62 = vmul.f32 1.442695, %v3764_v44 }
 0x51a   :  { %v6464_v28 = vpop.eup %6463  ;;  %4850 = vst [vmem:[#allocation11 + $0x3c0] sm:$0xff] %v6462_v15  ;;  %6483 = vpow2.f32 %v4118_v51  ;;  %v8177_v6 = vpop.f32.mrb[235].mxu0  ;;  %v4146_v14 = vmul.f32 1.442695, %v3766_v46  ;;  %v3210_v46 = vadd.f32 %v7979_v22, %v7756_v50 }
 0x51b   :  { %v6466_v35 = vpop.eup %6465  ;;  %4852 = vst [vmem:[#allocation11 + $0x3d0] sm:$0xff] %v6464_v28  ;;  %6485 = vpow2.f32 %v4116_v26  ;;  %v4144_v15 = vmul.f32 1.442695, %v3765_v33  ;;  %v8179_v28 = vpop.f32.mrb[204].mxu1  ;;  %v3019_v33 = vadd.f32 %v7981_v10, %v7750_v60 }
 0x51c   :  { %v6468_v53 = vpop.eup %6467  ;;  %4856 = vst [vmem:[#allocation11 + $0x3f0] sm:$0xff] %v6466_v35  ;;  %6487 = vpow2.f32 %v4120_v1  ;;  %v8181_v26 = vpop.f32.mrb[236].mxu0 }
 0x51d   :  { %v6470_v7 = vpop.eup %6469  ;;  %4858 = vst [vmem:[#allocation11 + $0x400] sm:$0xff] %v6468_v53  ;;  %6489 = vpow2.f32 %v4128_v41  ;;  %v8183_v11 = vpop.f32.mrb[205].mxu1 }
 0x51e   :  { %v6472_v51 = vpop.eup %6471  ;;  %4857 = vst [vmem:[#allocation11 + $0x3f8] sm:$0xff] %v6470_v7  ;;  %6491 = vpow2.f32 %v4132_v39  ;;  %v8185_v1 = vpop.f32.mrb[237].mxu0 }
 0x51f   :  { %v6474_v36 = vpop.eup %6473  ;;  %4859 = vst [vmem:[#allocation11 + $0x408] sm:$0xff] %v6472_v51  ;;  %6493 = vpow2.f32 %v4130_v16  ;;  %8657 = vst [vmem:[#allocation17_spill] sm:$0xff] %v8185_v1  ;;  %v8187_v41 = vpop.f32.mrb[206].mxu1  ;;  %v3212_v51 = vadd.f32 %v7983_v19, %v7752_v38  ;;  %v3214_v19 = vadd.f32 %v7987_v2, %v7756_v50  ;;  %v8659_v2 = vld [vmem:[#allocation19_spill] sm:$0xff] }
 0x520   :  { %v6476_v17 = vpop.eup %6475  ;;  %4863 = vst [vmem:[#allocation11 + $0x428] sm:$0xff] %v6474_v36  ;;  %6495 = vpow2.f32 %v4134_v54  ;;  %8658 = vst [vmem:[#allocation18_spill] sm:$0xff] %v8187_v41 }
 0x521   :  { %v6478_v12 = vpop.eup %6477  ;;  %4865 = vst [vmem:[#allocation11 + $0x438] sm:$0xff] %v6476_v17  ;;  %6497 = vpow2.f32 %v4142_v62  ;;  %v3767_v17 = vsub.f32 0.0, %v3210_v46 }
 0x522   :  { %v6480_v44 = vpop.eup %6479  ;;  %v4416_v39 = vadd.f32 1.0, %v6478_v12  ;;  %6499 = vpow2.f32 %v4146_v14 }
 0x523   :  { %v6482_v35 = vpop.eup %6481  ;;  %v4418_v16 = vadd.f32 1.0, %v6480_v44  ;;  %6501 = vpow2.f32 %v4144_v15  ;;  %v3771_v15 = vsub.f32 0.0, %v3019_v33  ;;  %v3025_v33 = vadd.f32 %v7993_v40, %v7750_v60 }
 0x524   :  { %v6484_v53 = vpop.eup %6483  ;;  %6503 = vrcp.f32 %v4416_v39  ;;  %v4422_v54 = vadd.f32 1.0, %v6482_v35  ;;  %v3021_v39 = vadd.f32 %v7985_v29, %v7754_v52  ;;  %v3218_v29 = vadd.f32 %v7995_v43, %v7752_v38 }
 0x525   :  { %v6486_v7 = vpop.eup %6485  ;;  %6505 = vrcp.f32 %v4418_v16  ;;  %v4424_v62 = vadd.f32 1.0, %v6484_v53  ;;  %v3773_v53 = vsub.f32 0.0, %v3212_v51  ;;  %v3774_v40 = vsub.f32 0.0, %v3214_v19  ;;  %v8665_v19 = vld [vmem:[#allocation22_spill] sm:$0xff] }
 0x526   :  { %v6488_v36 = vpop.eup %6487  ;;  %6507 = vrcp.f32 %v4422_v54  ;;  %v4423_v14 = vadd.f32 1.0, %v6486_v7  ;;  %v4148_v7 = vmul.f32 1.442695, %v3767_v17  ;;  %v3778_v43 = vsub.f32 0.0, %v3025_v33 }
 0x527   :  { %v6490_v22 = vpop.eup %6489  ;;  %6509 = vrcp.f32 %v4424_v62  ;;  %v4425_v12 = vadd.f32 1.0, %v6488_v36 }
 0x528   :  { %v6492_v44 = vpop.eup %6491  ;;  %6511 = vrcp.f32 %v4423_v14  ;;  %v4429_v10 = vadd.f32 1.0, %v6490_v22  ;;  %v4156_v14 = vmul.f32 1.442695, %v3771_v15 }
 0x529   :  { %v6494_v35 = vpop.eup %6493  ;;  %6513 = vrcp.f32 %v4425_v12  ;;  %v4431_v16 = vadd.f32 1.0, %v6492_v44  ;;  %v3772_v12 = vsub.f32 0.0, %v3021_v39  ;;  %v3027_v44 = vadd.f32 %v8659_v2, %v7754_v52  ;;  %v8211_v39 = vpop.f32.mrb[207].mxu1 }
 0x52a   :  { %v6496_v54 = vpop.eup %6495  ;;  %6515 = vrcp.f32 %v4429_v10  ;;  %v4430_v46 = vadd.f32 1.0, %v6494_v35  ;;  %v8205_v10 = vpop.f32.mrb[238].mxu0 }
 0x52b   :  { %v6498_v62 = vpop.eup %6497  ;;  %6517 = vrcp.f32 %v4431_v16  ;;  %v4432_v36 = vadd.f32 1.0, %v6496_v54  ;;  %8660 = vst [vmem:[#allocation19_spill] sm:$0xff] %v8205_v10  ;;  %v8661_v16 = vld [vmem:[#allocation20_spill] sm:$0xff]  ;;  %v8213_v1 = vpop.f32.mrb[239].mxu0  ;;  %v3222_v10 = vadd.f32 %v8665_v19, %v7752_v38  ;;  %v3779_v33 = vsub.f32 0.0, %v3027_v44 }
 0x52c   :  { %v6500_v22 = vpop.eup %6499  ;;  %6519 = vrcp.f32 %v4430_v46  ;;  %v4436_v51 = vadd.f32 1.0, %v6498_v62  ;;  %v3220_v54 = vadd.f32 %v8661_v16, %v7756_v50  ;;  %v8662_v46 = vld [vmem:[#allocation21_spill] sm:$0xff]  ;;  %8663 = vst [vmem:[#allocation20_spill] sm:$0xff] %v8211_v39 }
 0x52d   :  { %v6502_v17 = vpop.eup %6501  ;;  %6521 = vrcp.f32 %v4432_v36  ;;  %v4438_v35 = vadd.f32 1.0, %v6500_v22  ;;  %v3029_v62 = vadd.f32 %v8662_v46, %v7750_v60  ;;  %8664 = vst [vmem:[#allocation21_spill] sm:$0xff] %v8213_v1  ;;  %v4160_v36 = vmul.f32 1.442695, %v3773_v53 }
 0x52e   :  { %v6504_v15 = vpop.eup %6503  ;;  %6523 = vrcp.f32 %v4436_v51  ;;  %v4437_v41 = vadd.f32 1.0, %v6502_v17  ;;  %v3780_v22 = vsub.f32 0.0, %v3218_v29  ;;  %v4158_v51 = vmul.f32 1.442695, %v3772_v12 }
 0x52f   :  { %v6506_v2 = vpop.eup %6505  ;;  %4864 = vst [vmem:[#allocation11 + $0x430] sm:$0xff] %v6504_v15  ;;  %6525 = vrcp.f32 %v4438_v35  ;;  %v3031_v17 = vadd.f32 %v8005_v45, %v7754_v52  ;;  %v4162_v1 = vmul.f32 1.442695, %v3774_v40  ;;  %v3781_v39 = vsub.f32 0.0, %v3220_v54  ;;  %v8666_v35 = vld [vmem:[#allocation23_spill] sm:$0xff]  ;;  %v8221_v40 = vpop.f32.mrb[208].mxu1 }
 0x530   :  { %v6508_v16 = vpop.eup %6507  ;;  %4866 = vst [vmem:[#allocation11 + $0x440] sm:$0xff] %v6506_v2  ;;  %6527 = vrcp.f32 %v4437_v41  ;;  %v3224_v53 = vadd.f32 %v8666_v35, %v7756_v50  ;;  %v4170_v15 = vmul.f32 1.442695, %v3778_v43  ;;  %v3785_v19 = vsub.f32 0.0, %v3029_v62  ;;  %v8223_v54 = vpop.f32.mrb[240].mxu0 }
 0x531   :  { %v6510_v46 = vpop.eup %6509  ;;  %4870 = vst [vmem:[#allocation11 + $0x460] sm:$0xff] %v6508_v16  ;;  %6529 = vpow2.f32 %v4148_v7  ;;  %v4174_v41 = vmul.f32 1.442695, %v3780_v22  ;;  %v3787_v12 = vsub.f32 0.0, %v3222_v10  ;;  %v4172_v45 = vmul.f32 1.442695, %v3779_v33 }
 0x532   :  { %v6512_v29 = vpop.eup %6511  ;;  %4872 = vst [vmem:[#allocation11 + $0x470] sm:$0xff] %v6510_v46  ;;  %6531 = vpow2.f32 %v4156_v14  ;;  %v3786_v7 = vsub.f32 0.0, %v3031_v17  ;;  %v4176_v14 = vmul.f32 1.442695, %v3781_v39  ;;  %v3788_v43 = vsub.f32 0.0, %v3224_v53  ;;  %v8225_v62 = vpop.f32.mrb[209].mxu1 }
 0x533   :  { %v6514_v2 = vpop.eup %6513  ;;  %4871 = vst [vmem:[#allocation11 + $0x468] sm:$0xff] %v6512_v29  ;;  %6533 = vpow2.f32 %v4160_v36  ;;  %v8227_v46 = vpop.f32.mrb[241].mxu0  ;;  %v4184_v10 = vmul.f32 1.442695, %v3785_v19  ;;  %v4188_v17 = vmul.f32 1.442695, %v3787_v12 }
 0x534   :  { %v6516_v44 = vpop.eup %6515  ;;  %4873 = vst [vmem:[#allocation11 + $0x478] sm:$0xff] %v6514_v2  ;;  %6535 = vpow2.f32 %v4158_v51  ;;  %v8229_v22 = vpop.f32.mrb[210].mxu1  ;;  %v4186_v53 = vmul.f32 1.442695, %v3786_v7 }
 0x535   :  { %v6518_v16 = vpop.eup %6517  ;;  %4877 = vst [vmem:[#allocation11 + $0x498] sm:$0xff] %v6516_v44  ;;  %6537 = vpow2.f32 %v4162_v1  ;;  %8667 = vst [vmem:[#allocation22_spill] sm:$0xff] %v8229_v22  ;;  %v8231_v51 = vpop.f32.mrb[242].mxu0 }
 0x536   :  { %v6520_v36 = vpop.eup %6519  ;;  %4879 = vst [vmem:[#allocation11 + $0x4a8] sm:$0xff] %v6518_v16  ;;  %6539 = vpow2.f32 %v4170_v15  ;;  %8668 = vst [vmem:[#allocation23_spill] sm:$0xff] %v8231_v51  ;;  %v8233_v35 = vpop.f32.mrb[211].mxu1  ;;  %v4190_v15 = vmul.f32 1.442695, %v3788_v43 }
 0x537   :  { %v6522_v33 = vpop.eup %6521  ;;  %4878 = vst [vmem:[#allocation11 + $0x4a0] sm:$0xff] %v6520_v36  ;;  %6541 = vpow2.f32 %v4174_v41  ;;  %8669 = vst [vmem:[#allocation41_spill] sm:$0xff] %v8233_v35  ;;  %v8235_v1 = vpop.f32.mrb[243].mxu0  ;;  %v8671_v41 = vld [vmem:[#allocation24_spill] sm:$0xff] }
 0x538   :  { %8670 = vst [vmem:[#allocation42_spill] sm:$0xff] %v8235_v1  ;;  %v6524_v39 = vpop.eup %6523  ;;  %4880 = vst [vmem:[#allocation11 + $0x4b0] sm:$0xff] %v6522_v33  ;;  %6543 = vpow2.f32 %v4172_v45  ;;  %v3035_v12 = vadd.f32 %v8671_v41, %v7750_v60  ;;  %v8239_v36 = vpop.f32.mrb[212].mxu1 }
 0x539   :  { %v6526_v29 = vpop.eup %6525  ;;  %4884 = vst [vmem:[#allocation11 + $0x4d0] sm:$0xff] %v6524_v39  ;;  %6545 = vpow2.f32 %v4176_v14  ;;  %8672 = vst [vmem:[#allocation24_spill] sm:$0xff] %v8239_v36  ;;  %v8241_v45 = vpop.f32.mrb[244].mxu0  ;;  %v8674_v14 = vld [vmem:[#allocation25_spill] sm:$0xff] }
 0x53a   :  { %v6528_v19 = vpop.eup %6527  ;;  %4886 = vst [vmem:[#allocation11 + $0x4e0] sm:$0xff] %v6526_v29  ;;  %6547 = vpow2.f32 %v4184_v10  ;;  %8673 = vst [vmem:[#allocation43_spill] sm:$0xff] %v8241_v45  ;;  %v3228_v43 = vadd.f32 %v8674_v14, %v7752_v38 }
 0x53b   :  { %v6530_v2 = vpop.eup %6529  ;;  %4885 = vst [vmem:[#allocation11 + $0x4d8] sm:$0xff] %v6528_v19  ;;  %6549 = vpow2.f32 %v4188_v17  ;;  %v3792_v19 = vsub.f32 0.0, %v3035_v12 }
 0x53c   :  { %v6532_v44 = vpop.eup %6531  ;;  %v4439_v16 = vadd.f32 1.0, %v6530_v2  ;;  %6551 = vpow2.f32 %v4186_v53  ;;  %v8675_v2 = vld [vmem:[#allocation26_spill] sm:$0xff] }
 0x53d   :  { %v6534_v7 = vpop.eup %6533  ;;  %v4443_v33 = vadd.f32 1.0, %v6532_v44  ;;  %6553 = vpow2.f32 %v4190_v15  ;;  %v3037_v36 = vadd.f32 %v8675_v2, %v7754_v52  ;;  %v3794_v15 = vsub.f32 0.0, %v3228_v43 }
 0x53e   :  { %v6536_v10 = vpop.eup %6535  ;;  %6555 = vrcp.f32 %v4439_v16  ;;  %v4445_v39 = vadd.f32 1.0, %v6534_v7  ;;  %v8676_v16 = vld [vmem:[#allocation27_spill] sm:$0xff]  ;;  %v4198_v12 = vmul.f32 1.442695, %v3792_v19  ;;  %v3232_v43 = vadd.f32 %v8031_v13, %v7752_v38 }
 0x53f   :  { %v6538_v17 = vpop.eup %6537  ;;  %6557 = vrcp.f32 %v4443_v33  ;;  %v4444_v29 = vadd.f32 1.0, %v6536_v10  ;;  %v3230_v7 = vadd.f32 %v8676_v16, %v7756_v50  ;;  %v8677_v10 = vld [vmem:[#allocation28_spill] sm:$0xff]  ;;  %v3793_v51 = vsub.f32 0.0, %v3037_v36 }
 0x540   :  { %v6540_v41 = vpop.eup %6539  ;;  %6559 = vrcp.f32 %v4445_v39  ;;  %v4446_v53 = vadd.f32 1.0, %v6538_v17  ;;  %v3039_v39 = vadd.f32 %v8677_v10, %v7750_v60  ;;  %v8679_v10 = vld [vmem:[#allocation30_spill] sm:$0xff]  ;;  %v3045_v13 = vadd.f32 %v8047_v18, %v7750_v60 }
 0x541   :  { %v6542_v45 = vpop.eup %6541  ;;  %6561 = vrcp.f32 %v4444_v29  ;;  %v4450_v44 = vadd.f32 1.0, %v6540_v41  ;;  %v4202_v41 = vmul.f32 1.442695, %v3794_v15  ;;  %v3795_v19 = vsub.f32 0.0, %v3230_v7  ;;  %v8261_v15 = vpop.f32.mrb[245].mxu0 }
 0x542   :  { %v6544_v1 = vpop.eup %6543  ;;  %6563 = vrcp.f32 %v4446_v53  ;;  %v4452_v14 = vadd.f32 1.0, %v6542_v45  ;;  %v8678_v53 = vld [vmem:[#allocation29_spill] sm:$0xff]  ;;  %v3234_v22 = vadd.f32 %v8679_v10, %v7756_v50  ;;  %v3799_v36 = vsub.f32 0.0, %v3039_v39  ;;  %8680 = vst [vmem:[#allocation25_spill] sm:$0xff] %v8261_v15  ;;  %v8269_v10 = vpop.f32.mrb[246].mxu0 }
 0x543   :  { %v6546_v35 = vpop.eup %6545  ;;  %6565 = vrcp.f32 %v4450_v44  ;;  %v4451_v33 = vadd.f32 1.0, %v6544_v1  ;;  %v3041_v16 = vadd.f32 %v8678_v53, %v7754_v52  ;;  %v3238_v7 = vadd.f32 %v8049_v30, %v7752_v38  ;;  %8681 = vst [vmem:[#allocation26_spill] sm:$0xff] %v8269_v10 }
 0x544   :  { %v6548_v17 = vpop.eup %6547  ;;  %6567 = vrcp.f32 %v4452_v14  ;;  %v4453_v2 = vadd.f32 1.0, %v6546_v35  ;;  %v3047_v39 = vadd.f32 %v8051_v31, %v7754_v52  ;;  %v3240_v30 = vadd.f32 %v8053_v23, %v7756_v50 }
 0x545   :  { %v6550_v29 = vpop.eup %6549  ;;  %6569 = vrcp.f32 %v4451_v33  ;;  %v4457_v45 = vadd.f32 1.0, %v6548_v17  ;;  %v8259_v33 = vpop.f32.mrb[213].mxu1  ;;  %v3049_v31 = vadd.f32 %v8055_v58, %v7750_v60 }
 0x546   :  { %v6552_v44 = vpop.eup %6551  ;;  %6571 = vrcp.f32 %v4453_v2  ;;  %v4459_v1 = vadd.f32 1.0, %v6550_v29  ;;  %v3801_v2 = vsub.f32 0.0, %v3232_v43  ;;  %v8267_v18 = vpop.f32.mrb[214].mxu1  ;;  %v3802_v43 = vsub.f32 0.0, %v3234_v22 }
 0x547   :  { %v6554_v14 = vpop.eup %6553  ;;  %6573 = vrcp.f32 %v4457_v45  ;;  %v4458_v35 = vadd.f32 1.0, %v6552_v44  ;;  %v4200_v45 = vmul.f32 1.442695, %v3793_v51  ;;  %v3800_v44 = vsub.f32 0.0, %v3041_v16 }
 0x548   :  { %v6556_v17 = vpop.eup %6555  ;;  %6575 = vrcp.f32 %v4459_v1  ;;  %v4460_v53 = vadd.f32 1.0, %v6554_v14  ;;  %v4204_v1 = vmul.f32 1.442695, %v3795_v19  ;;  %v4212_v51 = vmul.f32 1.442695, %v3799_v36 }
 0x549   :  { %v6558_v29 = vpop.eup %6557  ;;  %4887 = vst [vmem:[#allocation11 + $0x4e8] sm:$0xff] %v6556_v17  ;;  %6577 = vrcp.f32 %v4458_v35  ;;  %v3806_v16 = vsub.f32 0.0, %v3045_v13  ;;  %v8275_v35 = vpop.f32.mrb[215].mxu1  ;;  %v4216_v19 = vmul.f32 1.442695, %v3801_v2  ;;  %v3808_v22 = vsub.f32 0.0, %v3238_v7 }
 0x54a   :  { %v6560_v15 = vpop.eup %6559  ;;  %4891 = vst [vmem:[#allocation11 + $0x508] sm:$0xff] %v6558_v29  ;;  %6579 = vrcp.f32 %v4460_v53  ;;  %8682 = vst [vmem:[#allocation27_spill] sm:$0xff] %v8275_v35  ;;  %v8277_v17 = vpop.f32.mrb[247].mxu0  ;;  %v4214_v23 = vmul.f32 1.442695, %v3800_v44  ;;  %v3809_v13 = vsub.f32 0.0, %v3240_v30 }
 0x54b   :  { %v6562_v14 = vpop.eup %6561  ;;  %4893 = vst [vmem:[#allocation11 + $0x518] sm:$0xff] %v6560_v15  ;;  %6581 = vpow2.f32 %v4198_v12  ;;  %8683 = vst [vmem:[#allocation28_spill] sm:$0xff] %v8277_v17  ;;  %v3807_v15 = vsub.f32 0.0, %v3047_v39  ;;  %v4218_v36 = vmul.f32 1.442695, %v3802_v43  ;;  %v3813_v17 = vsub.f32 0.0, %v3049_v31 }
 0x54c   :  { %v6564_v10 = vpop.eup %6563  ;;  %4892 = vst [vmem:[#allocation11 + $0x510] sm:$0xff] %v6562_v14  ;;  %6583 = vpow2.f32 %v4202_v41  ;;  %v4226_v29 = vmul.f32 1.442695, %v3806_v16  ;;  %v4230_v41 = vmul.f32 1.442695, %v3808_v22  ;;  %v8281_v44 = vpop.f32.mrb[248].mxu0 }
 0x54d   :  { %v6566_v53 = vpop.eup %6565  ;;  %4894 = vst [vmem:[#allocation11 + $0x520] sm:$0xff] %v6564_v10  ;;  %6585 = vpow2.f32 %v4200_v45  ;;  %v4228_v7 = vmul.f32 1.442695, %v3807_v15  ;;  %v8279_v45 = vpop.f32.mrb[216].mxu1  ;;  %v4232_v10 = vmul.f32 1.442695, %v3809_v13 }
 0x54e   :  { %v6568_v12 = vpop.eup %6567  ;;  %4898 = vst [vmem:[#allocation11 + $0x540] sm:$0xff] %v6566_v53  ;;  %6587 = vpow2.f32 %v4204_v1  ;;  %v8283_v1 = vpop.f32.mrb[217].mxu1  ;;  %v4240_v14 = vmul.f32 1.442695, %v3813_v17  ;;  %v3051_v53 = vadd.f32 %v8059_v56, %v7754_v52 }
 0x54f   :  { %v6570_v58 = vpop.eup %6569  ;;  %4900 = vst [vmem:[#allocation11 + $0x550] sm:$0xff] %v6568_v12  ;;  %6589 = vpow2.f32 %v4212_v51  ;;  %v8285_v43 = vpop.f32.mrb[249].mxu0  ;;  %v3242_v51 = vadd.f32 %v8057_v27, %v7752_v38 }
 0x550   :  { %v6572_v35 = vpop.eup %6571  ;;  %4899 = vst [vmem:[#allocation11 + $0x548] sm:$0xff] %v6570_v58  ;;  %6591 = vpow2.f32 %v4216_v19  ;;  %v8289_v16 = vpop.f32.mrb[218].mxu1  ;;  %v3244_v58 = vadd.f32 %v8061_v0, %v7756_v50 }
 0x551   :  { %v6574_v2 = vpop.eup %6573  ;;  %4901 = vst [vmem:[#allocation11 + $0x558] sm:$0xff] %v6572_v35  ;;  %6593 = vpow2.f32 %v4214_v23  ;;  %8684 = vst [vmem:[#allocation29_spill] sm:$0xff] %v8289_v16  ;;  %v8291_v31 = vpop.f32.mrb[250].mxu0  ;;  %v3815_v12 = vsub.f32 0.0, %v3242_v51  ;;  %v3248_v51 = vadd.f32 %v8065_v32, %v7752_v38 }
 0x552   :  { %v6576_v39 = vpop.eup %6575  ;;  %4905 = vst [vmem:[#allocation11 + $0x578] sm:$0xff] %v6574_v2  ;;  %6595 = vpow2.f32 %v4218_v36  ;;  %8685 = vst [vmem:[#allocation30_spill] sm:$0xff] %v8291_v31  ;;  %v8293_v19 = vpop.f32.mrb[219].mxu1  ;;  %v3814_v2 = vsub.f32 0.0, %v3051_v53 }
 0x553   :  { %v6578_v30 = vpop.eup %6577  ;;  %4907 = vst [vmem:[#allocation11 + $0x588] sm:$0xff] %v6576_v39  ;;  %6597 = vpow2.f32 %v4226_v29  ;;  %8686 = vst [vmem:[#allocation44_spill] sm:$0xff] %v8293_v19  ;;  %v3055_v39 = vadd.f32 %v8063_v25, %v7750_v60 }
 0x554   :  { %v6580_v35 = vpop.eup %6579  ;;  %4906 = vst [vmem:[#allocation11 + $0x580] sm:$0xff] %v6578_v30  ;;  %6599 = vpow2.f32 %v4230_v41 }
 0x555   :  { %v6582_v22 = vpop.eup %6581  ;;  %4908 = vst [vmem:[#allocation11 + $0x590] sm:$0xff] %v6580_v35  ;;  %6601 = vpow2.f32 %v4228_v7 }
 0x556   :  { %v6584_v23 = vpop.eup %6583  ;;  %v4464_v17 = vadd.f32 1.0, %v6582_v22  ;;  %6603 = vpow2.f32 %v4232_v10  ;;  %v3816_v22 = vsub.f32 0.0, %v3244_v58  ;;  %v8688_v58 = vld [vmem:[#allocation31_spill] sm:$0xff] }
 0x557   :  { %v6586_v15 = vpop.eup %6585  ;;  %v4466_v27 = vadd.f32 1.0, %v6584_v23  ;;  %6605 = vpow2.f32 %v4240_v14  ;;  %v4244_v14 = vmul.f32 1.442695, %v3815_v12  ;;  %v8687_v23 = vld [vmem:[#allocation16_spill] sm:$0xff]  ;;  %v3057_v12 = vadd.f32 %v8067_v20, %v7754_v52 }
 0x558   :  { %v6588_v36 = vpop.eup %6587  ;;  %6607 = vrcp.f32 %v4464_v17  ;;  %v4465_v13 = vadd.f32 1.0, %v6586_v15  ;;  %v2565_v17 = vsub.s32 4, %v8687_v23 }
 0x559   :  { %v6590_v29 = vpop.eup %6589  ;;  %6609 = vrcp.f32 %v4466_v27  ;;  %v4467_v41 = vadd.f32 1.0, %v6588_v36  ;;  %v4242_v27 = vmul.f32 1.442695, %v3814_v2  ;;  %v2573_v36 = vsub.s32 6, %v8687_v23  ;;  %v8689_v2 = vld [vmem:[#allocation32_spill] sm:$0xff] }
 0x55a   :  { %v6592_v7 = vpop.eup %6591  ;;  %6611 = vrcp.f32 %v4465_v13  ;;  %v4471_v56 = vadd.f32 1.0, %v6590_v29  ;;  %v3820_v29 = vsub.f32 0.0, %v3055_v39  ;;  %v8314_v39 = vld [vmem:[%s8626_s8] sm:$0xff]  ;;  %s7212_s8 = smov [#allocation11]  }
 0x55b   :  { %v6594_v10 = vpop.eup %6593  ;;  %6613 = vrcp.f32 %v4467_v41  ;;  %v4473_v30 = vadd.f32 1.0, %v6592_v7  ;;  %v3822_v7 = vsub.f32 0.0, %v3248_v51  ;;  %v8317_v20 = vrot.slane %v8314_v39, %v2565_v17  ;;  %s4959_s1 = sshll.u32 %s7212_s8, 4  ;;  %s4960_s1 = int_to_ptr.vmem [resolvable:$true] %s4959_s1 }
 0x55c   :  { %v6596_v35 = vpop.eup %6595  ;;  %6615 = vrcp.f32 %v4471_v56  ;;  %v4472_v0 = vadd.f32 1.0, %v6594_v10  ;;  %v3250_v56 = vadd.f32 %v8688_v58, %v7756_v50  ;;  %v3821_v58 = vsub.f32 0.0, %v3057_v12  ;;  %s7172_s10 = scalar_lea.vmem %s4960_s1, 28672  ;;  %p7177_p13 = scmp.lt.s32.totalorder %s4960_s1, %s4960_s1 }
 0x55d   :  { %v6598_v53 = vpop.eup %6597  ;;  %6617 = vrcp.f32 %v4473_v30  ;;  %v4474_v15 = vadd.f32 1.0, %v6596_v35  ;;  %v3059_v35 = vadd.f32 %v8689_v2, %v7750_v60  ;;  %v8692_v2 = vld [vmem:[#allocation34_spill] sm:$0xff]  ;;  %p7173_p12 = scmp.ne.s32.totalorder %s4960_s1, %s7172_s10  ;;  %p7178_p0 = scmp.lt.s32.totalorder %s7172_s10, %s7172_s10 }
 0x55e   :  { %v6600_v25 = vpop.eup %6599  ;;  %6619 = vrcp.f32 %v4472_v0  ;;  %v4478_v13 = vadd.f32 1.0, %v6598_v53  ;;  %v8319_v0 = vpop.f32.mrb[251].mxu0  ;;  %v3061_v19 = vadd.f32 %v8692_v2, %v7754_v52  ;;  %v3823_v31 = vsub.f32 0.0, %v3250_v56 }
 0x55f   :  { %v6602_v32 = vpop.eup %6601  ;;  %6621 = vrcp.f32 %v4474_v15  ;;  %v4480_v41 = vadd.f32 1.0, %v6600_v25  ;;  %8690 = vst [vmem:[#allocation16_spill] sm:$0xff] %v8319_v0  ;;  %v8691_v15 = vld [vmem:[#allocation33_spill] sm:$0xff]  ;;  %v4246_v0 = vmul.f32 1.442695, %v3816_v22  ;;  %p7179_p1 = por %p7178_p0, %p7177_p13 }
 0x560   :  { %v6604_v10 = vpop.eup %6603  ;;  %6623 = vrcp.f32 %v4478_v13  ;;  %v4479_v30 = vadd.f32 1.0, %v6602_v32  ;;  %v3252_v25 = vadd.f32 %v8691_v15, %v7752_v38  ;;  %v8324_v13 = vrot.slane %v8314_v39, %v2573_v36 }
 0x561   :  { %v6606_v51 = vpop.eup %6605  ;;  %6625 = vrcp.f32 %v4480_v41  ;;  %v4481_v53 = vadd.f32 1.0, %v6604_v10  ;;  %v8693_v41 = vld [vmem:[#allocation35_spill] sm:$0xff]  ;;  %v4254_v38 = vmul.f32 1.442695, %v3820_v29  ;;  %v3827_v36 = vsub.f32 0.0, %v3059_v35  ;;  %v8336_v29 = vpop.f32.mrb[252].mxu0  ;;  %p7180_p2 = pnand %p7179_p1, %p7173_p12 }
 0x562   :  { %v6608_v60 = vpop.eup %6607  ;;  %6627 = vrcp.f32 %v4479_v30  ;;  %v4485_v32 = vadd.f32 1.0, %v6606_v51  ;;  %v3254_v10 = vadd.f32 %v8693_v41, %v7756_v50  ;;  %v3291_v30 = vadd.f32 %v8087_v24, %v8317_v20 }
 0x563   :  { %v6610_v17 = vpop.eup %6609  ;;  %4912 = vst [vmem:[#allocation11 + $0x5b0] sm:$0xff] %v6608_v60  ;;  %6629 = vrcp.f32 %v4481_v53  ;;  %v4258_v52 = vmul.f32 1.442695, %v3822_v7  ;;  %v3829_v51 = vsub.f32 0.0, %v3252_v25  ;;  %v8694_v53 = vld [vmem:[#allocation36_spill] sm:$0xff]  ;;  %v3828_v15 = vsub.f32 0.0, %v3061_v19 }
 0x564   :  { %v6612_v16 = vpop.eup %6611  ;;  %4914 = vst [vmem:[#allocation11 + $0x5c0] sm:$0xff] %v6610_v17  ;;  %6631 = vrcp.f32 %v4485_v32  ;;  %v3492_v22 = vadd.f32 %v8694_v53, %v8324_v13  ;;  %v4256_v50 = vmul.f32 1.442695, %v3821_v58  ;;  %v8334_v60 = vpop.f32.mrb[220].mxu1  ;;  %v4260_v24 = vmul.f32 1.442695, %v3823_v31 }
 0x565   :  { %v6614_v12 = vpop.eup %6613  ;;  %4913 = vst [vmem:[#allocation11 + $0x5b8] sm:$0xff] %v6612_v16  ;;  %6633 = vpow2.f32 %v4244_v14  ;;  %v3830_v16 = vsub.f32 0.0, %v3254_v10  ;;  %v8338_v14 = vpop.f32.mrb[221].mxu1  ;;  %v4268_v32 = vmul.f32 1.442695, %v3827_v36  ;;  %v2569_v31 = vsub.s32 5, %v8687_v23 }
 0x566   :  { %v6616_v56 = vpop.eup %6615  ;;  %4915 = vst [vmem:[#allocation11 + $0x5c8] sm:$0xff] %v6614_v12  ;;  %6635 = vpow2.f32 %v4242_v27  ;;  %v8340_v7 = vpop.f32.mrb[253].mxu0  ;;  %v3614_v27 = vsub.f32 0.0, %v3291_v30  ;;  %v4272_v17 = vmul.f32 1.442695, %v3829_v51 }
 0x567   :  { %v6618_v35 = vpop.eup %6617  ;;  %4919 = vst [vmem:[#allocation11 + $0x5e8] sm:$0xff] %v6616_v56  ;;  %6637 = vpow2.f32 %v4246_v0  ;;  %v8342_v58 = vpop.f32.mrb[222].mxu1  ;;  %v3630_v0 = vsub.f32 0.0, %v3492_v22  ;;  %v4274_v30 = vmul.f32 1.442695, %v3830_v16  ;;  %v8352_v22 = vrot.slane %v8314_v39, %v2569_v31 }
 0x568   :  { %v6620_v25 = vpop.eup %6619  ;;  %4921 = vst [vmem:[#allocation11 + $0x5f8] sm:$0xff] %v6618_v35  ;;  %6639 = vpow2.f32 %v4254_v38  ;;  %v8344_v19 = vpop.f32.mrb[254].mxu0  ;;  %v4270_v38 = vmul.f32 1.442695, %v3828_v15  ;;  %v3484_v35 = vadd.f32 %v8101_v3, %v8324_v13 }
 0x569   :  { %v6622_v2 = vpop.eup %6621  ;;  %4920 = vst [vmem:[#allocation11 + $0x5f0] sm:$0xff] %v6620_v25  ;;  %6641 = vpow2.f32 %v4258_v52  ;;  %v8347_v41 = vpop.f32.mrb[223].mxu1  ;;  %v3842_v52 = vmul.f32 1.442695, %v3614_v27  ;;  %v3874_v23 = vmul.f32 1.442695, %v3630_v0 }
 0x56a   :  { %v8349_v10 = vpop.f32.mrb[255].mxu0  ;;  %v6624_v12 = vpop.eup %6623  ;;  %4922 = vst [vmem:[#allocation11 + $0x600] sm:$0xff] %v6622_v2  ;;  %6643 = vpow2.f32 %v4256_v50  ;;  %v8695_v2 = vld [vmem:[#allocation37_spill] sm:$0xff] }
 0x56b   :  { %v6626_v36 = vpop.eup %6625  ;;  %4926 = vst [vmem:[#allocation11 + $0x620] sm:$0xff] %v6624_v12  ;;  %6645 = vpow2.f32 %v4260_v24  ;;  %v8354_v50 = vpop.f32.mrb[224].mxu1 }
 0x56c   :  { %v6628_v53 = vpop.eup %6627  ;;  %4928 = vst [vmem:[#allocation11 + $0x630] sm:$0xff] %v6626_v36  ;;  %6647 = vpow2.f32 %v4268_v32  ;;  %v8358_v24 = vpop.f32.mrb[225].mxu1  ;;  %v3616_v36 = vsub.f32 0.0, %v3484_v35 }
 0x56d   :  { %v6630_v51 = vpop.eup %6629  ;;  %4927 = vst [vmem:[#allocation11 + $0x628] sm:$0xff] %v6628_v53  ;;  %6649 = vpow2.f32 %v4272_v17  ;;  %v8360_v32 = vpop.f32.mrb[226].mxu1  ;;  %v3293_v17 = vadd.f32 %v8695_v2, %v8352_v22 }
 0x56e   :  { %v6632_v56 = vpop.eup %6631  ;;  %4929 = vst [vmem:[#allocation11 + $0x638] sm:$0xff] %v6630_v51  ;;  %6651 = vpow2.f32 %v4270_v38  ;;  %v8364_v0 = vpop.f32.mrb[227].mxu1  ;;  %v3846_v35 = vmul.f32 1.442695, %v3616_v36 }
 0x56f   :  { %v6634_v15 = vpop.eup %6633  ;;  %4933 = vst [vmem:[#allocation11 + $0x658] sm:$0xff] %v6632_v56  ;;  %6653 = vpow2.f32 %v4274_v30  ;;  %8696 = vst [vmem:[#allocation31_spill] sm:$0xff] %v8364_v0 }
 0x570   :  { %v6636_v16 = vpop.eup %6635  ;;  %v4487_v25 = vadd.f32 1.0, %v6634_v15  ;;  %6655 = vpow2.f32 %v3842_v52  ;;  %v8697_v52 = vld [vmem:[#allocation38_spill] sm:$0xff]  ;;  %v3615_v15 = vsub.f32 0.0, %v3293_v17 }
 0x571   :  { %v6638_v39 = vpop.eup %6637  ;;  %v4486_v27 = vadd.f32 1.0, %v6636_v16  ;;  %6657 = vpow2.f32 %v3874_v23  ;;  %v3295_v51 = vadd.f32 %v8697_v52, %v8317_v20 }
 0x572   :  { %v6640_v31 = vpop.eup %6639  ;;  %6659 = vrcp.f32 %v4487_v25  ;;  %v4488_v12 = vadd.f32 1.0, %v6638_v39  ;;  %v8698_v25 = vld [vmem:[#allocation39_spill] sm:$0xff] }
 0x573   :  { %v6642_v38 = vpop.eup %6641  ;;  %6661 = vrcp.f32 %v4486_v27  ;;  %v4492_v3 = vadd.f32 1.0, %v6640_v31  ;;  %v3495_v39 = vadd.f32 %v8698_v25, %v8324_v13  ;;  %v3297_v31 = vadd.f32 %v8115_v47, %v8352_v22 }
 0x574   :  { %v6644_v30 = vpop.eup %6643  ;;  %6663 = vrcp.f32 %v4488_v12  ;;  %v4494_v53 = vadd.f32 1.0, %v6642_v38  ;;  %v3621_v52 = vsub.f32 0.0, %v3295_v51  ;;  %v3301_v25 = vadd.f32 %v8121_v5, %v8317_v20 }
 0x575   :  { %v6646_v56 = vpop.eup %6645  ;;  %6665 = vrcp.f32 %v4492_v3  ;;  %v4493_v23 = vadd.f32 1.0, %v6644_v30  ;;  %v8699_v3 = vld [vmem:[#allocation40_spill] sm:$0xff]  ;;  %v3508_v47 = vadd.f32 %v8123_v63, %v8324_v13  ;;  %v3622_v51 = vsub.f32 0.0, %v3297_v31 }
 0x576   :  { %v6648_v16 = vpop.eup %6647  ;;  %6667 = vrcp.f32 %v4494_v53  ;;  %v4495_v2 = vadd.f32 1.0, %v6646_v56  ;;  %v3487_v17 = vadd.f32 %v8699_v3, %v8324_v13  ;;  %v3844_v56 = vmul.f32 1.442695, %v3615_v15 }
 0x577   :  { %v6650_v0 = vpop.eup %6649  ;;  %6669 = vrcp.f32 %v4493_v23  ;;  %v4499_v27 = vadd.f32 1.0, %v6648_v16  ;;  %v3637_v16 = vsub.f32 0.0, %v3495_v39  ;;  %v3303_v3 = vadd.f32 %v8125_v34, %v8352_v22 }
 0x578   :  { %v6652_v12 = vpop.eup %6651  ;;  %6671 = vrcp.f32 %v4495_v2  ;;  %v4501_v38 = vadd.f32 1.0, %v6650_v0  ;;  %v3500_v5 = vadd.f32 %v8127_v4, %v8324_v13  ;;  %v3856_v39 = vmul.f32 1.442695, %v3621_v52 }
 0x579   :  { %v6654_v30 = vpop.eup %6653  ;;  %6673 = vrcp.f32 %v4499_v27  ;;  %v4500_v53 = vadd.f32 1.0, %v6652_v12  ;;  %v3623_v12 = vsub.f32 0.0, %v3487_v17  ;;  %v3305_v63 = vadd.f32 %v8129_v59, %v8317_v20 }
 0x57a   :  { %v6656_v23 = vpop.eup %6655  ;;  %6675 = vrcp.f32 %v4501_v38  ;;  %v4502_v36 = vadd.f32 1.0, %v6654_v30  ;;  %v3628_v30 = vsub.f32 0.0, %v3301_v25  ;;  %v3888_v31 = vmul.f32 1.442695, %v3637_v16  ;;  %v8388_v25 = vpop.f32.mrb[228].mxu1 }
 0x57b   :  { %v6658_v2 = vpop.eup %6657  ;;  %6677 = vrcp.f32 %v4500_v53  ;;  %v4286_v0 = vadd.f32 1.0, %v6656_v23  ;;  %v3658_v34 = vsub.f32 0.0, %v3508_v47  ;;  %v3511_v23 = vadd.f32 %v8131_v21, %v8324_v13  ;;  %v8390_v16 = vpop.f32.mrb[229].mxu1 }
 0x57c   :  { %v6660_v27 = vpop.eup %6659  ;;  %6679 = vrcp.f32 %v4502_v36  ;;  %v4302_v15 = vadd.f32 1.0, %v6658_v2  ;;  %v3858_v4 = vmul.f32 1.442695, %v3622_v51  ;;  %v3629_v36 = vsub.f32 0.0, %v3303_v3 }
 0x57d   :  { %v6662_v38 = vpop.eup %6661  ;;  %4935 = vst [vmem:[#allocation11 + $0x668] sm:$0xff] %v6660_v27  ;;  %6681 = vrcp.f32 %v4286_v0  ;;  %v3307_v52 = vadd.f32 %v8133_v42, %v8352_v22  ;;  %v3860_v59 = vmul.f32 1.442695, %v3623_v12  ;;  %v3644_v0 = vsub.f32 0.0, %v3500_v5 }
 0x57e   :  { %v6664_v53 = vpop.eup %6663  ;;  %4934 = vst [vmem:[#allocation11 + $0x660] sm:$0xff] %v6662_v38  ;;  %6683 = vrcp.f32 %v4302_v15  ;;  %v3870_v21 = vmul.f32 1.442695, %v3628_v30  ;;  %v3635_v27 = vsub.f32 0.0, %v3305_v63  ;;  %v3930_v42 = vmul.f32 1.442695, %v3658_v34 }
 0x57f   :  { %v6666_v17 = vpop.eup %6665  ;;  %4936 = vst [vmem:[#allocation11 + $0x670] sm:$0xff] %v6664_v53  ;;  %6685 = vpow2.f32 %v3844_v56  ;;  %v8392_v56 = vpop.f32.mrb[230].mxu1  ;;  %v3665_v3 = vsub.f32 0.0, %v3511_v23  ;;  %v3636_v12 = vsub.f32 0.0, %v3307_v52 }
 0x580   :  { %v6668_v2 = vpop.eup %6667  ;;  %4940 = vst [vmem:[#allocation11 + $0x690] sm:$0xff] %v6666_v17  ;;  %6687 = vpow2.f32 %v3846_v35  ;;  %v8394_v15 = vpop.f32.mrb[231].mxu1  ;;  %v3872_v35 = vmul.f32 1.442695, %v3629_v36  ;;  %v3884_v63 = vmul.f32 1.442695, %v3635_v27 }
 0x581   :  { %v6670_v47 = vpop.eup %6669  ;;  %4942 = vst [vmem:[#allocation11 + $0x6a0] sm:$0xff] %v6668_v2  ;;  %6689 = vpow2.f32 %v3856_v39  ;;  %v3902_v39 = vmul.f32 1.442695, %v3644_v0  ;;  %v3886_v23 = vmul.f32 1.442695, %v3636_v12  ;;  %v8396_v17 = vpop.f32.mrb[232].mxu1  ;;  %v3503_v2 = vadd.f32 %v8135_v55, %v8324_v13 }
 0x582   :  { %v6672_v51 = vpop.eup %6671  ;;  %4941 = vst [vmem:[#allocation11 + $0x698] sm:$0xff] %v6670_v47  ;;  %6691 = vpow2.f32 %v3888_v31  ;;  %v3944_v31 = vmul.f32 1.442695, %v3665_v3  ;;  %v8398_v36 = vpop.f32.mrb[233].mxu1 }
 0x583   :  { %v6674_v38 = vpop.eup %6673  ;;  %4943 = vst [vmem:[#allocation11 + $0x6a8] sm:$0xff] %v6672_v51  ;;  %6693 = vpow2.f32 %v3858_v4  ;;  %v3651_v55 = vsub.f32 0.0, %v3503_v2 }
 0x584   :  { %v6676_v5 = vpop.eup %6675  ;;  %4947 = vst [vmem:[#allocation11 + $0x6c8] sm:$0xff] %v6674_v38  ;;  %6695 = vpow2.f32 %v3860_v59  ;;  %v8402_v59 = vpop.f32.mrb[234].mxu1 }
 0x585   :  { %v6678_v30 = vpop.eup %6677  ;;  %4949 = vst [vmem:[#allocation11 + $0x6d8] sm:$0xff] %v6676_v5  ;;  %6697 = vpow2.f32 %v3870_v21  ;;  %v8404_v21 = vpop.f32.mrb[235].mxu1 }
 0x586   :  { %v6680_v53 = vpop.eup %6679  ;;  %4948 = vst [vmem:[#allocation11 + $0x6d0] sm:$0xff] %v6678_v30  ;;  %6699 = vpow2.f32 %v3930_v42  ;;  %v3311_v42 = vadd.f32 %v8163_v48, %v8317_v20  ;;  %v3524_v30 = vadd.f32 %v8165_v57, %v8324_v13  ;;  %v3516_v57 = vadd.f32 %v8169_v9, %v8324_v13 }
 0x587   :  { %v6682_v34 = vpop.eup %6681  ;;  %4950 = vst [vmem:[#allocation11 + $0x6e0] sm:$0xff] %v6680_v53  ;;  %6701 = vpow2.f32 %v3872_v35 }
 0x588   :  { %v6684_v4 = vpop.eup %6683  ;;  %4734 = vst [vmem:[#allocation11 + $0x20] sm:$0xff] %v6682_v34  ;;  %6703 = vpow2.f32 %v3902_v39  ;;  %v8410_v34 = vpop.f32.mrb[236].mxu1 }
 0x589   :  { %v6686_v52 = vpop.eup %6685  ;;  %4750 = vst [vmem:[#allocation11 + $0xa0] sm:$0xff] %v6684_v4  ;;  %6705 = vpow2.f32 %v3884_v63  ;;  %v3313_v4 = vadd.f32 %v8167_v49, %v8352_v22 }
 0x58a   :  { %v6688_v0 = vpop.eup %6687  ;;  %v4287_v47 = vadd.f32 1.0, %v6686_v52  ;;  %6707 = vpow2.f32 %v3944_v31  ;;  %v3642_v31 = vsub.f32 0.0, %v3311_v42  ;;  %v8414_v52 = vpop.f32.mrb[237].mxu1 }
 0x58b   :  { %v6690_v27 = vpop.eup %6689  ;;  %v4288_v51 = vadd.f32 1.0, %v6688_v0  ;;  %6709 = vpow2.f32 %v3886_v23 }
 0x58c   :  { %v6692_v3 = vpop.eup %6691  ;;  %6711 = vrcp.f32 %v4287_v47  ;;  %v4293_v38 = vadd.f32 1.0, %v6690_v27  ;;  %v3916_v47 = vmul.f32 1.442695, %v3651_v55  ;;  %v8418_v27 = vpop.f32.mrb[238].mxu1  ;;  %v3527_v55 = vadd.f32 %v8173_v37, %v8324_v13 }
 0x58d   :  { %v6694_v35 = vpop.eup %6693  ;;  %6713 = vrcp.f32 %v4288_v51  ;;  %v4309_v12 = vadd.f32 1.0, %v6692_v3  ;;  %v3686_v3 = vsub.f32 0.0, %v3524_v30  ;;  %v3321_v37 = vadd.f32 %v8179_v28, %v8317_v20 }
 0x58e   :  { %v6696_v5 = vpop.eup %6695  ;;  %6715 = vrcp.f32 %v4293_v38  ;;  %v4294_v39 = vadd.f32 1.0, %v6694_v35  ;;  %v3315_v38 = vadd.f32 %v8171_v61, %v8317_v20  ;;  %v8422_v35 = vpop.f32.mrb[239].mxu1  ;;  %v3672_v61 = vsub.f32 0.0, %v3516_v57 }
 0x58f   :  { %v6698_v63 = vpop.eup %6697  ;;  %6717 = vrcp.f32 %v4309_v12  ;;  %v4295_v53 = vadd.f32 1.0, %v6696_v5  ;;  %v3898_v5 = vmul.f32 1.442695, %v3642_v31 }
 0x590   :  { %v6700_v48 = vpop.eup %6699  ;;  %6719 = vrcp.f32 %v4294_v39  ;;  %v4300_v23 = vadd.f32 1.0, %v6698_v63  ;;  %v3643_v63 = vsub.f32 0.0, %v3313_v4  ;;  %v3986_v4 = vmul.f32 1.442695, %v3686_v3 }
 0x591   :  { %v6702_v2 = vpop.eup %6701  ;;  %6721 = vrcp.f32 %v4295_v53  ;;  %v4330_v0 = vadd.f32 1.0, %v6700_v48  ;;  %v3317_v53 = vadd.f32 %v8175_v8, %v8352_v22  ;;  %v3540_v8 = vadd.f32 %v8181_v26, %v8324_v13 }
 0x592   :  { %v6704_v51 = vpop.eup %6703  ;;  %6723 = vrcp.f32 %v4300_v23  ;;  %v4301_v42 = vadd.f32 1.0, %v6702_v2  ;;  %v3519_v23 = vadd.f32 %v8177_v6, %v8324_v13  ;;  %v3900_v6 = vmul.f32 1.442695, %v3643_v63 }
 0x593   :  { %v6706_v49 = vpop.eup %6705  ;;  %6725 = vrcp.f32 %v4330_v0  ;;  %v4316_v12 = vadd.f32 1.0, %v6704_v51  ;;  %v3649_v0 = vsub.f32 0.0, %v3315_v38  ;;  %v3323_v38 = vadd.f32 %v8183_v11, %v8352_v22 }
 0x594   :  { %v6708_v39 = vpop.eup %6707  ;;  %6727 = vrcp.f32 %v4301_v42  ;;  %v4307_v9 = vadd.f32 1.0, %v6706_v49  ;;  %v3693_v42 = vsub.f32 0.0, %v3527_v55  ;;  %v8434_v49 = vpop.f32.mrb[240].mxu1  ;;  %v3958_v3 = vmul.f32 1.442695, %v3672_v61 }
 0x595   :  { %v6710_v30 = vpop.eup %6709  ;;  %6729 = vrcp.f32 %v4316_v12  ;;  %v4337_v48 = vadd.f32 1.0, %v6708_v39  ;;  %v3650_v12 = vsub.f32 0.0, %v3317_v53  ;;  %v8438_v39 = vpop.f32.mrb[241].mxu1  ;;  %v3679_v55 = vsub.f32 0.0, %v3519_v23 }
 0x596   :  { %v6712_v2 = vpop.eup %6711  ;;  %6731 = vrcp.f32 %v4307_v9  ;;  %v4308_v31 = vadd.f32 1.0, %v6710_v30  ;;  %v8700_v9 = vld [vmem:[#allocation17_spill] sm:$0xff]  ;;  %v8442_v30 = vpop.f32.mrb[242].mxu1  ;;  %v3912_v63 = vmul.f32 1.442695, %v3649_v0  ;;  %v3656_v53 = vsub.f32 0.0, %v3321_v37 }
 0x597   :  { %v6714_v51 = vpop.eup %6713  ;;  %4735 = vst [vmem:[#allocation11 + $0x28] sm:$0xff] %v6712_v2  ;;  %6733 = vrcp.f32 %v4337_v48  ;;  %v3532_v26 = vadd.f32 %v8700_v9, %v8324_v13  ;;  %v8444_v2 = vpop.f32.mrb[243].mxu1  ;;  %v3914_v61 = vmul.f32 1.442695, %v3650_v12  ;;  %v3657_v23 = vsub.f32 0.0, %v3323_v38 }
 0x598   :  { %v6716_v57 = vpop.eup %6715  ;;  %4736 = vst [vmem:[#allocation11 + $0x30] sm:$0xff] %v6714_v51  ;;  %6735 = vrcp.f32 %v4308_v31  ;;  %v4000_v31 = vmul.f32 1.442695, %v3693_v42  ;;  %v3714_v51 = vsub.f32 0.0, %v3540_v8  ;;  %v3972_v9 = vmul.f32 1.442695, %v3679_v55 }
 0x599   :  { %v6718_v28 = vpop.eup %6717  ;;  %4741 = vst [vmem:[#allocation11 + $0x58] sm:$0xff] %v6716_v57  ;;  %6737 = vpow2.f32 %v3916_v47  ;;  %v3926_v0 = vmul.f32 1.442695, %v3656_v53  ;;  %v8446_v42 = vpop.f32.mrb[244].mxu1  ;;  %v8703_v53 = vld [vmem:[#allocation18_spill] sm:$0xff] }
 0x59a   :  { %v6720_v48 = vpop.eup %6719  ;;  %4757 = vst [vmem:[#allocation11 + $0xd8] sm:$0xff] %v6718_v28  ;;  %6739 = vpow2.f32 %v3898_v5  ;;  %v3700_v28 = vsub.f32 0.0, %v3532_v26  ;;  %v8448_v12 = vpop.f32.mrb[245].mxu1 }
 0x59b   :  { %v6722_v11 = vpop.eup %6721  ;;  %4742 = vst [vmem:[#allocation11 + $0x60] sm:$0xff] %v6720_v48  ;;  %6741 = vpow2.f32 %v3986_v4  ;;  %v4042_v4 = vmul.f32 1.442695, %v3714_v51  ;;  %v8450_v55 = vpop.f32.mrb[246].mxu1 }
 0x59c   :  { %v6724_v47 = vpop.eup %6723  ;;  %4743 = vst [vmem:[#allocation11 + $0x68] sm:$0xff] %v6722_v11  ;;  %6743 = vpow2.f32 %v3900_v6  ;;  %v3928_v6 = vmul.f32 1.442695, %v3657_v23  ;;  %8701 = vst [vmem:[#allocation32_spill] sm:$0xff] %v8450_v55  ;;  %v8452_v48 = vpop.f32.mrb[247].mxu1  ;;  %v3325_v11 = vadd.f32 %v8703_v53, %v8317_v20  ;;  %v8704_v23 = vld [vmem:[#allocation19_spill] sm:$0xff] }
 0x59d   :  { %v6726_v57 = vpop.eup %6725  ;;  %4748 = vst [vmem:[#allocation11 + $0x90] sm:$0xff] %v6724_v47  ;;  %6745 = vpow2.f32 %v3958_v3  ;;  %v4014_v3 = vmul.f32 1.442695, %v3700_v28  ;;  %8702 = vst [vmem:[#allocation33_spill] sm:$0xff] %v8452_v48 }
 0x59e   :  { %v6728_v5 = vpop.eup %6727  ;;  %4778 = vst [vmem:[#allocation11 + $0x180] sm:$0xff] %v6726_v57  ;;  %6747 = vpow2.f32 %v3912_v63  ;;  %v3543_v57 = vadd.f32 %v8704_v23, %v8324_v13 }
 0x59f   :  { %v6730_v37 = vpop.eup %6729  ;;  %4749 = vst [vmem:[#allocation11 + $0x98] sm:$0xff] %v6728_v5  ;;  %6749 = vpow2.f32 %v4000_v31 }
 0x5a0   :  { %v6732_v8 = vpop.eup %6731  ;;  %4764 = vst [vmem:[#allocation11 + $0x110] sm:$0xff] %v6730_v37  ;;  %6751 = vpow2.f32 %v3914_v61  ;;  %v3663_v37 = vsub.f32 0.0, %v3325_v11  ;;  %v8709_v11 = vld [vmem:[#allocation21_spill] sm:$0xff] }
 0x5a1   :  { %v6734_v38 = vpop.eup %6733  ;;  %4755 = vst [vmem:[#allocation11 + $0xc8] sm:$0xff] %v6732_v8  ;;  %6753 = vpow2.f32 %v3972_v9  ;;  %v3535_v23 = vadd.f32 %v8709_v11, %v8324_v13 }
 0x5a2   :  { %v6736_v26 = vpop.eup %6735  ;;  %4785 = vst [vmem:[#allocation11 + $0x1b8] sm:$0xff] %v6734_v38  ;;  %6755 = vpow2.f32 %v3926_v0 }
 0x5a3   :  { %v6738_v63 = vpop.eup %6737  ;;  %4756 = vst [vmem:[#allocation11 + $0xd0] sm:$0xff] %v6736_v26  ;;  %6757 = vpow2.f32 %v4042_v4  ;;  %v8458_v4 = vpop.f32.mrb[248].mxu1 }
 0x5a4   :  { %v6740_v31 = vpop.eup %6739  ;;  %v4323_v51 = vadd.f32 1.0, %v6738_v63  ;;  %6759 = vpow2.f32 %v3928_v6  ;;  %8705 = vst [vmem:[#allocation34_spill] sm:$0xff] %v8458_v4  ;;  %v8706_v6 = vld [vmem:[#allocation20_spill] sm:$0xff]  ;;  %v8462_v63 = vpop.f32.mrb[249].mxu1 }
 0x5a5   :  { %v6742_v47 = vpop.eup %6741  ;;  %v4314_v61 = vadd.f32 1.0, %v6740_v31  ;;  %6761 = vpow2.f32 %v4014_v3  ;;  %v3327_v26 = vadd.f32 %v8706_v6, %v8352_v22  ;;  %8707 = vst [vmem:[#allocation35_spill] sm:$0xff] %v8462_v63  ;;  %v3721_v31 = vsub.f32 0.0, %v3543_v57 }
 0x5a6   :  { %v6744_v9 = vpop.eup %6743  ;;  %6763 = vrcp.f32 %v4323_v51  ;;  %v4358_v28 = vadd.f32 1.0, %v6742_v47  ;;  %v8464_v51 = vpop.f32.mrb[250].mxu1  ;;  %v3940_v6 = vmul.f32 1.442695, %v3663_v37  ;;  %v3331_v63 = vadd.f32 %v8221_v40, %v8317_v20 }
 0x5a7   :  { %v6746_v5 = vpop.eup %6745  ;;  %6765 = vrcp.f32 %v4314_v61  ;;  %v4315_v0 = vadd.f32 1.0, %v6744_v9  ;;  %8708 = vst [vmem:[#allocation36_spill] sm:$0xff] %v8464_v51  ;;  %v8468_v9 = vpop.f32.mrb[251].mxu1  ;;  %v4056_v11 = vmul.f32 1.442695, %v3721_v31  ;;  %v3548_v40 = vadd.f32 %v8227_v46, %v8324_v13 }
 0x5a8   :  { %v6748_v8 = vpop.eup %6747  ;;  %6767 = vrcp.f32 %v4358_v28  ;;  %v4344_v38 = vadd.f32 1.0, %v6746_v5  ;;  %8710 = vst [vmem:[#allocation37_spill] sm:$0xff] %v8468_v9  ;;  %v3333_v9 = vadd.f32 %v8225_v62, %v8352_v22 }
 0x5a9   :  { %v6750_v3 = vpop.eup %6749  ;;  %6769 = vrcp.f32 %v4315_v0  ;;  %v4321_v53 = vadd.f32 1.0, %v6748_v8  ;;  %v3664_v8 = vsub.f32 0.0, %v3327_v26 }
 0x5aa   :  { %v6752_v47 = vpop.eup %6751  ;;  %6771 = vrcp.f32 %v4344_v38  ;;  %v4365_v61 = vadd.f32 1.0, %v6750_v3  ;;  %v3556_v38 = vadd.f32 %v8223_v54, %v8324_v13  ;;  %v8711_v54 = vld [vmem:[#allocation22_spill] sm:$0xff] }
 0x5ab   :  { %v6754_v28 = vpop.eup %6753  ;;  %6773 = vrcp.f32 %v4321_v53  ;;  %v4322_v5 = vadd.f32 1.0, %v6752_v47  ;;  %v3707_v47 = vsub.f32 0.0, %v3535_v23  ;;  %v3335_v4 = vadd.f32 %v8711_v54, %v8317_v20 }
 0x5ac   :  { %v6756_v0 = vpop.eup %6755  ;;  %6775 = vrcp.f32 %v4365_v61  ;;  %v4351_v57 = vadd.f32 1.0, %v6754_v28  ;;  %v3670_v28 = vsub.f32 0.0, %v3331_v63  ;;  %v3742_v62 = vsub.f32 0.0, %v3556_v38  ;;  %v8715_v63 = vld [vmem:[#allocation41_spill] sm:$0xff] }
 0x5ad   :  { %v6758_v3 = vpop.eup %6757  ;;  %6777 = vrcp.f32 %v4322_v5  ;;  %v4328_v51 = vadd.f32 1.0, %v6756_v0  ;;  %v8480_v5 = vpop.f32.mrb[252].mxu1  ;;  %v3942_v46 = vmul.f32 1.442695, %v3664_v8  ;;  %v3728_v38 = vsub.f32 0.0, %v3548_v40 }
 0x5ae   :  { %v6760_v53 = vpop.eup %6759  ;;  %6779 = vrcp.f32 %v4351_v57  ;;  %v4386_v37 = vadd.f32 1.0, %v6758_v3  ;;  %8712 = vst [vmem:[#allocation38_spill] sm:$0xff] %v8480_v5  ;;  %v8713_v57 = vld [vmem:[#allocation23_spill] sm:$0xff]  ;;  %v8484_v23 = vpop.f32.mrb[253].mxu1  ;;  %v3954_v8 = vmul.f32 1.442695, %v3670_v28 }
 0x5af   :  { %v6762_v61 = vpop.eup %6761  ;;  %6781 = vrcp.f32 %v4328_v51  ;;  %v4329_v26 = vadd.f32 1.0, %v6760_v53  ;;  %v3559_v3 = vadd.f32 %v8713_v57, %v8324_v13  ;;  %8714 = vst [vmem:[#allocation39_spill] sm:$0xff] %v8484_v23  ;;  %v3671_v51 = vsub.f32 0.0, %v3333_v9  ;;  %v8488_v54 = vpop.f32.mrb[254].mxu1 }
 0x5b0   :  { %v6764_v31 = vpop.eup %6763  ;;  %6783 = vrcp.f32 %v4386_v37  ;;  %v4372_v0 = vadd.f32 1.0, %v6762_v61  ;;  %v3337_v53 = vadd.f32 %v8715_v63, %v8352_v22  ;;  %8716 = vst [vmem:[#allocation40_spill] sm:$0xff] %v8488_v54  ;;  %v4028_v37 = vmul.f32 1.442695, %v3707_v47  ;;  %v8717_v61 = vld [vmem:[#allocation42_spill] sm:$0xff]  ;;  %v8492_v55 = vpop.f32.mrb[255].mxu1 }
 0x5b1   :  { %v6766_v48 = vpop.eup %6765  ;;  %4771 = vst [vmem:[#allocation11 + $0x148] sm:$0xff] %v6764_v31  ;;  %6785 = vrcp.f32 %v4329_v26  ;;  %v3551_v57 = vadd.f32 %v8717_v61, %v8324_v13  ;;  %8718 = vst [vmem:[#allocation17_spill] sm:$0xff] %v8492_v55  ;;  %v3677_v9 = vsub.f32 0.0, %v3335_v4  ;;  %v8719_v26 = vld [vmem:[#allocation24_spill] sm:$0xff]  ;;  %v3956_v40 = vmul.f32 1.442695, %v3671_v51 }
 0x5b2   :  { %v6768_v5 = vpop.eup %6767  ;;  %4762 = vst [vmem:[#allocation11 + $0x100] sm:$0xff] %v6766_v48  ;;  %6787 = vrcp.f32 %v4372_v0  ;;  %v3341_v31 = vadd.f32 %v8719_v26, %v8317_v20  ;;  %v4098_v48 = vmul.f32 1.442695, %v3742_v62  ;;  %v3749_v0 = vsub.f32 0.0, %v3559_v3 }
 0x5b3   :  { %v6770_v23 = vpop.eup %6769  ;;  %4806 = vst [vmem:[#allocation11 + $0x260] sm:$0xff] %v6768_v5  ;;  %6789 = vpow2.f32 %v3940_v6  ;;  %v3678_v61 = vsub.f32 0.0, %v3337_v53  ;;  %v4070_v5 = vmul.f32 1.442695, %v3728_v38  ;;  %v3735_v6 = vsub.f32 0.0, %v3551_v57  ;;  %v8720_v38 = vld [vmem:[#allocation43_spill] sm:$0xff] }
 0x5b4   :  { %v6772_v63 = vpop.eup %6771  ;;  %4763 = vst [vmem:[#allocation11 + $0x108] sm:$0xff] %v6770_v23  ;;  %6791 = vpow2.f32 %v4056_v11  ;;  %v3968_v4 = vmul.f32 1.442695, %v3677_v9  ;;  %v3684_v26 = vsub.f32 0.0, %v3341_v31  ;;  %v4112_v11 = vmul.f32 1.442695, %v3749_v0 }
 0x5b5   :  { %v6774_v47 = vpop.eup %6773  ;;  %4792 = vst [vmem:[#allocation11 + $0x1f0] sm:$0xff] %v6772_v63  ;;  %6793 = vpow2.f32 %v3942_v46  ;;  %v3970_v3 = vmul.f32 1.442695, %v3678_v61  ;;  %v4084_v46 = vmul.f32 1.442695, %v3735_v6  ;;  %v3572_v57 = vadd.f32 %v8720_v38, %v8324_v13 }
 0x5b6   :  { %v6776_v54 = vpop.eup %6775  ;;  %4769 = vst [vmem:[#allocation11 + $0x138] sm:$0xff] %v6774_v47  ;;  %6795 = vpow2.f32 %v4028_v37  ;;  %v3982_v53 = vmul.f32 1.442695, %v3684_v26  ;;  %v3343_v63 = vadd.f32 %v8259_v33, %v8352_v22 }
 0x5b7   :  { %v6778_v28 = vpop.eup %6777  ;;  %4813 = vst [vmem:[#allocation11 + $0x298] sm:$0xff] %v6776_v54  ;;  %6797 = vpow2.f32 %v3954_v8  ;;  %v3770_v61 = vsub.f32 0.0, %v3572_v57 }
 0x5b8   :  { %v6780_v55 = vpop.eup %6779  ;;  %4770 = vst [vmem:[#allocation11 + $0x140] sm:$0xff] %v6778_v28  ;;  %6799 = vpow2.f32 %v4098_v48  ;;  %v8721_v28 = vld [vmem:[#allocation25_spill] sm:$0xff] }
 0x5b9   :  { %v6782_v62 = vpop.eup %6781  ;;  %4799 = vst [vmem:[#allocation11 + $0x228] sm:$0xff] %v6780_v55  ;;  %6801 = vpow2.f32 %v3956_v40 }
 0x5ba   :  { %v6784_v23 = vpop.eup %6783  ;;  %4776 = vst [vmem:[#allocation11 + $0x170] sm:$0xff] %v6782_v62  ;;  %6803 = vpow2.f32 %v4070_v5  ;;  %v3685_v62 = vsub.f32 0.0, %v3343_v63 }
 0x5bb   :  { %v6786_v51 = vpop.eup %6785  ;;  %4834 = vst [vmem:[#allocation11 + $0x340] sm:$0xff] %v6784_v23  ;;  %6805 = vpow2.f32 %v3968_v4  ;;  %v3564_v4 = vadd.f32 %v8721_v28, %v8324_v13  ;;  %v3345_v23 = vadd.f32 %v8267_v18, %v8317_v20  ;;  %v8724_v18 = vld [vmem:[#allocation28_spill] sm:$0xff] }
 0x5bc   :  { %v6788_v54 = vpop.eup %6787  ;;  %4777 = vst [vmem:[#allocation11 + $0x178] sm:$0xff] %v6786_v51  ;;  %6807 = vpow2.f32 %v4112_v11 }
 0x5bd   :  { %v6790_v37 = vpop.eup %6789  ;;  %4820 = vst [vmem:[#allocation11 + $0x2d0] sm:$0xff] %v6788_v54  ;;  %6809 = vpow2.f32 %v3970_v3  ;;  %v8722_v54 = vld [vmem:[#allocation26_spill] sm:$0xff] }
 0x5be   :  { %v6792_v55 = vpop.eup %6791  ;;  %v4335_v8 = vadd.f32 1.0, %v6790_v37  ;;  %6811 = vpow2.f32 %v4084_v46  ;;  %v3575_v37 = vadd.f32 %v8722_v54, %v8324_v13 }
 0x5bf   :  { %v6794_v9 = vpop.eup %6793  ;;  %v4393_v31 = vadd.f32 1.0, %v6792_v55  ;;  %6813 = vpow2.f32 %v3982_v53  ;;  %v4154_v53 = vmul.f32 1.442695, %v3770_v61  ;;  %v3756_v55 = vsub.f32 0.0, %v3564_v4 }
 0x5c0   :  { %v6796_v48 = vpop.eup %6795  ;;  %6815 = vrcp.f32 %v4335_v8  ;;  %v4336_v0 = vadd.f32 1.0, %v6794_v9  ;;  %v8723_v8 = vld [vmem:[#allocation27_spill] sm:$0xff]  ;;  %v3691_v61 = vsub.f32 0.0, %v3345_v23  ;;  %v3777_v4 = vsub.f32 0.0, %v3575_v37 }
 0x5c1   :  { %v6798_v47 = vpop.eup %6797  ;;  %6817 = vrcp.f32 %v4393_v31  ;;  %v4379_v40 = vadd.f32 1.0, %v6796_v48  ;;  %v3347_v9 = vadd.f32 %v8723_v8, %v8352_v22  ;;  %v3984_v48 = vmul.f32 1.442695, %v3685_v62 }
 0x5c2   :  { %v6800_v5 = vpop.eup %6799  ;;  %6819 = vrcp.f32 %v4336_v0  ;;  %v4342_v6 = vadd.f32 1.0, %v6798_v47  ;;  %v3567_v0 = vadd.f32 %v8724_v18, %v8324_v13  ;;  %v4126_v23 = vmul.f32 1.442695, %v3756_v55 }
 0x5c3   :  { %v6802_v26 = vpop.eup %6801  ;;  %6821 = vrcp.f32 %v4379_v40  ;;  %v4414_v11 = vadd.f32 1.0, %v6800_v5  ;;  %v3351_v5 = vadd.f32 %v8279_v45, %v8317_v20  ;;  %v3580_v45 = vadd.f32 %v8285_v43, %v8324_v13 }
 0x5c4   :  { %v6804_v3 = vpop.eup %6803  ;;  %6823 = vrcp.f32 %v4342_v6  ;;  %v4343_v33 = vadd.f32 1.0, %v6802_v26  ;;  %v3588_v26 = vadd.f32 %v8281_v44, %v8324_v13  ;;  %v3996_v37 = vmul.f32 1.442695, %v3691_v61 }
 0x5c5   :  { %v6806_v46 = vpop.eup %6805  ;;  %6825 = vrcp.f32 %v4414_v11  ;;  %v4400_v51 = vadd.f32 1.0, %v6804_v3  ;;  %v3692_v3 = vsub.f32 0.0, %v3347_v9  ;;  %v3698_v44 = vsub.f32 0.0, %v3351_v5 }
 0x5c6   :  { %v6808_v38 = vpop.eup %6807  ;;  %6827 = vrcp.f32 %v4343_v33  ;;  %v4349_v57 = vadd.f32 1.0, %v6806_v46  ;;  %v3353_v33 = vadd.f32 %v8283_v1, %v8352_v22  ;;  %v4168_v1 = vmul.f32 1.442695, %v3777_v4 }
 0x5c7   :  { %v6810_v31 = vpop.eup %6809  ;;  %6829 = vrcp.f32 %v4400_v51  ;;  %v4421_v63 = vadd.f32 1.0, %v6808_v38  ;;  %v3763_v51 = vsub.f32 0.0, %v3567_v0  ;;  %v8725_v38 = vld [vmem:[#allocation29_spill] sm:$0xff]  ;;  %v3798_v9 = vsub.f32 0.0, %v3588_v26 }
 0x5c8   :  { %v6812_v47 = vpop.eup %6811  ;;  %6831 = vrcp.f32 %v4349_v57  ;;  %v4350_v40 = vadd.f32 1.0, %v6810_v31  ;;  %v3355_v57 = vadd.f32 %v8725_v38, %v8317_v20  ;;  %v8726_v31 = vld [vmem:[#allocation30_spill] sm:$0xff]  ;;  %v3998_v43 = vmul.f32 1.442695, %v3692_v3 }
 0x5c9   :  { %v6814_v6 = vpop.eup %6813  ;;  %6833 = vrcp.f32 %v4421_v63  ;;  %v4407_v28 = vadd.f32 1.0, %v6812_v47  ;;  %v3591_v55 = vadd.f32 %v8726_v31, %v8324_v13  ;;  %v3699_v18 = vsub.f32 0.0, %v3353_v33 }
 0x5ca   :  { %v6816_v11 = vpop.eup %6815  ;;  %6835 = vrcp.f32 %v4350_v40  ;;  %v4356_v62 = vadd.f32 1.0, %v6814_v6  ;;  %v4140_v47 = vmul.f32 1.442695, %v3763_v51  ;;  %v3784_v40 = vsub.f32 0.0, %v3580_v45 }
 0x5cb   :  { %v6818_v46 = vpop.eup %6817  ;;  %4783 = vst [vmem:[#allocation11 + $0x1a8] sm:$0xff] %v6816_v11  ;;  %6837 = vrcp.f32 %v4407_v28  ;;  %v4010_v5 = vmul.f32 1.442695, %v3698_v44  ;;  %v4210_v28 = vmul.f32 1.442695, %v3798_v9  ;;  %v3805_v4 = vsub.f32 0.0, %v3591_v55 }
 0x5cc   :  { %v6820_v54 = vpop.eup %6819  ;;  %4841 = vst [vmem:[#allocation11 + $0x378] sm:$0xff] %v6818_v46  ;;  %6839 = vrcp.f32 %v4356_v62  ;;  %v4182_v62 = vmul.f32 1.442695, %v3784_v40 }
 0x5cd   :  { %v6822_v8 = vpop.eup %6821  ;;  %4784 = vst [vmem:[#allocation11 + $0x1b0] sm:$0xff] %v6820_v54  ;;  %6841 = vpow2.f32 %v4154_v53  ;;  %v3705_v53 = vsub.f32 0.0, %v3355_v57  ;;  %v8727_v54 = vld [vmem:[#allocation44_spill] sm:$0xff] }
 0x5ce   :  { %v6824_v63 = vpop.eup %6823  ;;  %4827 = vst [vmem:[#allocation11 + $0x308] sm:$0xff] %v6822_v8  ;;  %6843 = vpow2.f32 %v3984_v48  ;;  %v4012_v48 = vmul.f32 1.442695, %v3699_v18  ;;  %v8728_v57 = vld [vmem:[#allocation16_spill] sm:$0xff] }
 0x5cf   :  { %v6826_v0 = vpop.eup %6825  ;;  %4790 = vst [vmem:[#allocation11 + $0x1e0] sm:$0xff] %v6824_v63  ;;  %6845 = vpow2.f32 %v4126_v23  ;;  %v4024_v33 = vmul.f32 1.442695, %v3705_v53  ;;  %v4224_v23 = vmul.f32 1.442695, %v3805_v4  ;;  %v3583_v8 = vadd.f32 %v8728_v57, %v8324_v13 }
 0x5d0   :  { %v6828_v61 = vpop.eup %6827  ;;  %4862 = vst [vmem:[#allocation11 + $0x420] sm:$0xff] %v6826_v0  ;;  %6847 = vpow2.f32 %v3996_v37  ;;  %v3357_v37 = vadd.f32 %v8727_v54, %v8352_v22  ;;  %v3361_v53 = vadd.f32 %v8334_v60, %v8317_v20  ;;  %v3604_v4 = vadd.f32 %v8336_v29, %v8324_v13 }
 0x5d1   :  { %v6830_v6 = vpop.eup %6829  ;;  %4791 = vst [vmem:[#allocation11 + $0x1e8] sm:$0xff] %v6828_v61  ;;  %6849 = vpow2.f32 %v4168_v1  ;;  %v3791_v40 = vsub.f32 0.0, %v3583_v8  ;;  %v3596_v60 = vadd.f32 %v8340_v7, %v8324_v13  ;;  %v3365_v29 = vadd.f32 %v8342_v58, %v8317_v20 }
 0x5d2   :  { %v6832_v26 = vpop.eup %6831  ;;  %4848 = vst [vmem:[#allocation11 + $0x3b0] sm:$0xff] %v6830_v6  ;;  %6851 = vpow2.f32 %v3998_v43  ;;  %v3706_v18 = vsub.f32 0.0, %v3357_v37  ;;  %v3367_v7 = vadd.f32 %v8347_v41, %v8352_v22  ;;  %v3599_v58 = vadd.f32 %v8349_v10, %v8324_v13 }
 0x5d3   :  { %v6834_v11 = vpop.eup %6833  ;;  %4797 = vst [vmem:[#allocation11 + $0x218] sm:$0xff] %v6832_v26  ;;  %6853 = vpow2.f32 %v4140_v47 }
 0x5d4   :  { %v6836_v3 = vpop.eup %6835  ;;  %4869 = vst [vmem:[#allocation11 + $0x458] sm:$0xff] %v6834_v11  ;;  %6855 = vpow2.f32 %v4010_v5  ;;  %v4026_v11 = vmul.f32 1.442695, %v3706_v18  ;;  %v3720_v10 = vsub.f32 0.0, %v3367_v7 }
 0x5d5   :  { %v6838_v46 = vpop.eup %6837  ;;  %4798 = vst [vmem:[#allocation11 + $0x220] sm:$0xff] %v6836_v3  ;;  %6857 = vpow2.f32 %v4210_v28 }
 0x5d6   :  { %v6840_v51 = vpop.eup %6839  ;;  %4855 = vst [vmem:[#allocation11 + $0x3e8] sm:$0xff] %v6838_v46  ;;  %6859 = vpow2.f32 %v4012_v48  ;;  %v4196_v46 = vmul.f32 1.442695, %v3791_v40 }
 0x5d7   :  { %v6842_v45 = vpop.eup %6841  ;;  %4804 = vst [vmem:[#allocation11 + $0x250] sm:$0xff] %v6840_v51  ;;  %6861 = vpow2.f32 %v4182_v62  ;;  %v3363_v62 = vadd.f32 %v8338_v14, %v8352_v22  ;;  %v3607_v14 = vadd.f32 %v8344_v19, %v8324_v13  ;;  %v3371_v19 = vadd.f32 %v8354_v50, %v8317_v20 }
 0x5d8   :  { %v6844_v44 = vpop.eup %6843  ;;  %v4442_v38 = vadd.f32 1.0, %v6842_v45  ;;  %6863 = vpow2.f32 %v4024_v33  ;;  %v3712_v45 = vsub.f32 0.0, %v3361_v53  ;;  %v3819_v53 = vsub.f32 0.0, %v3599_v58 }
 0x5d9   :  { %v6846_v1 = vpop.eup %6845  ;;  %v4357_v9 = vadd.f32 1.0, %v6844_v44  ;;  %6865 = vpow2.f32 %v4224_v23  ;;  %v3826_v44 = vsub.f32 0.0, %v3604_v4  ;;  %v3713_v8 = vsub.f32 0.0, %v3363_v62 }
 0x5da   :  { %v6848_v31 = vpop.eup %6847  ;;  %6867 = vrcp.f32 %v4442_v38  ;;  %v4428_v55 = vadd.f32 1.0, %v6846_v1  ;;  %v3833_v41 = vsub.f32 0.0, %v3607_v14  ;;  %v3726_v4 = vsub.f32 0.0, %v3371_v19 }
 0x5db   :  { %v6850_v63 = vpop.eup %6849  ;;  %6869 = vrcp.f32 %v4357_v9  ;;  %v4363_v43 = vadd.f32 1.0, %v6848_v31  ;;  %v3812_v31 = vsub.f32 0.0, %v3596_v60  ;;  %v4040_v13 = vmul.f32 1.442695, %v3713_v8 }
 0x5dc   :  { %v6852_v0 = vpop.eup %6851  ;;  %6871 = vrcp.f32 %v4428_v55  ;;  %v4449_v47 = vadd.f32 1.0, %v6850_v63  ;;  %v4038_v63 = vmul.f32 1.442695, %v3712_v45  ;;  %v4054_v62 = vmul.f32 1.442695, %v3720_v10 }
 0x5dd   :  { %v6854_v61 = vpop.eup %6853  ;;  %6873 = vrcp.f32 %v4363_v43  ;;  %v4364_v5 = vadd.f32 1.0, %v6852_v0  ;;  %v3719_v43 = vsub.f32 0.0, %v3365_v29  ;;  %v4266_v0 = vmul.f32 1.442695, %v3826_v44  ;;  %v8729_v44 = vld [vmem:[#allocation31_spill] sm:$0xff] }
 0x5de   :  { %v6856_v6 = vpop.eup %6855  ;;  %6875 = vrcp.f32 %v4449_v47  ;;  %v4435_v28 = vadd.f32 1.0, %v6854_v61  ;;  %v3373_v47 = vadd.f32 %v8358_v24, %v8352_v22  ;;  %v3375_v61 = vadd.f32 %v8360_v32, %v8317_v20 }
 0x5df   :  { %v6858_v26 = vpop.eup %6857  ;;  %6877 = vrcp.f32 %v4364_v5  ;;  %v4370_v48 = vadd.f32 1.0, %v6856_v6  ;;  %v4238_v50 = vmul.f32 1.442695, %v3812_v31  ;;  %v4280_v24 = vmul.f32 1.442695, %v3833_v41 }
 0x5e0   :  { %v6860_v3 = vpop.eup %6859  ;;  %6879 = vrcp.f32 %v4435_v28  ;;  %v4470_v33 = vadd.f32 1.0, %v6858_v26  ;;  %v4052_v28 = vmul.f32 1.442695, %v3719_v43  ;;  %v3733_v32 = vsub.f32 0.0, %v3375_v61 }
 0x5e1   :  { %v6862_v23 = vpop.eup %6861  ;;  %6881 = vrcp.f32 %v4370_v48  ;;  %v4371_v51 = vadd.f32 1.0, %v6860_v3  ;;  %v3727_v48 = vsub.f32 0.0, %v3373_v47  ;;  %v4066_v60 = vmul.f32 1.442695, %v3726_v4 }
 0x5e2   :  { %v6864_v54 = vpop.eup %6863  ;;  %6883 = vrcp.f32 %v4470_v33  ;;  %v4456_v37 = vadd.f32 1.0, %v6862_v23  ;;  %v4252_v33 = vmul.f32 1.442695, %v3819_v53  ;;  %v4080_v29 = vmul.f32 1.442695, %v3733_v32 }
 0x5e3   :  { %v6866_v38 = vpop.eup %6865  ;;  %6885 = vrcp.f32 %v4371_v51  ;;  %v4377_v57 = vadd.f32 1.0, %v6864_v54  ;;  %v4068_v51 = vmul.f32 1.442695, %v3727_v48  ;;  %v3377_v14 = vadd.f32 %v8729_v44, %v8352_v22 }
 0x5e4   :  { %v6868_v1 = vpop.eup %6867  ;;  %6887 = vrcp.f32 %v4456_v37  ;;  %v4477_v9 = vadd.f32 1.0, %v6866_v38  ;;  %v3405_v44 = vadd.f32 %v8418_v27, %v8317_v20 }
 0x5e5   :  { %v6870_v55 = vpop.eup %6869  ;;  %4890 = vst [vmem:[#allocation11 + $0x500] sm:$0xff] %v6868_v1  ;;  %6889 = vrcp.f32 %v4377_v57  ;;  %v3381_v1 = vadd.f32 %v8388_v25, %v8317_v20 }
 0x5e6   :  { %v6872_v18 = vpop.eup %6871  ;;  %4805 = vst [vmem:[#allocation11 + $0x258] sm:$0xff] %v6870_v55  ;;  %6891 = vrcp.f32 %v4477_v9 }
 0x5e7   :  { %v6874_v40 = vpop.eup %6873  ;;  %4876 = vst [vmem:[#allocation11 + $0x490] sm:$0xff] %v6872_v18  ;;  %6893 = vpow2.f32 %v4026_v11  ;;  %v3383_v18 = vadd.f32 %v8390_v16, %v8352_v22  ;;  %v3740_v47 = vsub.f32 0.0, %v3381_v1 }
 0x5e8   :  { %v6876_v5 = vpop.eup %6875  ;;  %4811 = vst [vmem:[#allocation11 + $0x288] sm:$0xff] %v6874_v40  ;;  %6895 = vpow2.f32 %v4196_v46 }
 0x5e9   :  { %v6878_v6 = vpop.eup %6877  ;;  %4897 = vst [vmem:[#allocation11 + $0x538] sm:$0xff] %v6876_v5  ;;  %6897 = vpow2.f32 %v4038_v63  ;;  %v3734_v63 = vsub.f32 0.0, %v3377_v14 }
 0x5ea   :  { %v6880_v26 = vpop.eup %6879  ;;  %4812 = vst [vmem:[#allocation11 + $0x290] sm:$0xff] %v6878_v6  ;;  %6899 = vpow2.f32 %v4266_v0  ;;  %v3741_v6 = vsub.f32 0.0, %v3383_v18 }
 0x5eb   :  { %v6882_v11 = vpop.eup %6881  ;;  %4883 = vst [vmem:[#allocation11 + $0x4c8] sm:$0xff] %v6880_v26  ;;  %6901 = vpow2.f32 %v4040_v13  ;;  %v3385_v13 = vadd.f32 %v8392_v56, %v8317_v20  ;;  %v4082_v5 = vmul.f32 1.442695, %v3734_v63  ;;  %v3393_v56 = vadd.f32 %v8398_v36, %v8352_v22 }
 0x5ec   :  { %v6884_v3 = vpop.eup %6883  ;;  %4818 = vst [vmem:[#allocation11 + $0x2c0] sm:$0xff] %v6882_v11  ;;  %6903 = vpow2.f32 %v4238_v50  ;;  %v3387_v50 = vadd.f32 %v8394_v15, %v8352_v22  ;;  %v3395_v15 = vadd.f32 %v8402_v59, %v8317_v20  ;;  %v3401_v36 = vadd.f32 %v8410_v34, %v8317_v20 }
 0x5ed   :  { %v6886_v46 = vpop.eup %6885  ;;  %4918 = vst [vmem:[#allocation11 + $0x5e0] sm:$0xff] %v6884_v3  ;;  %6905 = vpow2.f32 %v4052_v28  ;;  %v3391_v28 = vadd.f32 %v8396_v17, %v8317_v20  ;;  %v3397_v17 = vadd.f32 %v8404_v21, %v8352_v22  ;;  %v3403_v59 = vadd.f32 %v8414_v52, %v8352_v22 }
 0x5ee   :  { %v6888_v23 = vpop.eup %6887  ;;  %4819 = vst [vmem:[#allocation11 + $0x2c8] sm:$0xff] %v6886_v46  ;;  %6907 = vpow2.f32 %v4280_v24  ;;  %v4094_v24 = vmul.f32 1.442695, %v3740_v47  ;;  %v3761_v21 = vsub.f32 0.0, %v3395_v15 }
 0x5ef   :  { %v6890_v45 = vpop.eup %6889  ;;  %4904 = vst [vmem:[#allocation11 + $0x570] sm:$0xff] %v6888_v23  ;;  %6909 = vpow2.f32 %v4054_v62  ;;  %v3747_v62 = vsub.f32 0.0, %v3385_v13  ;;  %v3754_v23 = vsub.f32 0.0, %v3391_v28  ;;  %v3413_v28 = vadd.f32 %v8438_v39, %v8352_v22 }
 0x5f0   :  { %v6892_v54 = vpop.eup %6891  ;;  %4825 = vst [vmem:[#allocation11 + $0x2f8] sm:$0xff] %v6890_v45  ;;  %6911 = vpow2.f32 %v4252_v33  ;;  %v3748_v33 = vsub.f32 0.0, %v3387_v50  ;;  %v4096_v45 = vmul.f32 1.442695, %v3741_v6  ;;  %v4136_v27 = vmul.f32 1.442695, %v3761_v21 }
 0x5f1   :  { %v6894_v37 = vpop.eup %6893  ;;  %4925 = vst [vmem:[#allocation11 + $0x618] sm:$0xff] %v6892_v54  ;;  %6913 = vpow2.f32 %v4066_v60  ;;  %v4122_v52 = vmul.f32 1.442695, %v3754_v23 }
 0x5f2   :  { %v6896_v38 = vpop.eup %6895  ;;  %v4378_v57 = vadd.f32 1.0, %v6894_v37  ;;  %6915 = vpow2.f32 %v4068_v51  ;;  %v4108_v37 = vmul.f32 1.442695, %v3747_v62  ;;  %v4110_v34 = vmul.f32 1.442695, %v3748_v33 }
 0x5f3   :  { %v6898_v8 = vpop.eup %6897  ;;  %v4463_v7 = vadd.f32 1.0, %v6896_v38  ;;  %6917 = vpow2.f32 %v4080_v29  ;;  %v3755_v29 = vsub.f32 0.0, %v3393_v56  ;;  %v3762_v38 = vsub.f32 0.0, %v3397_v17 }
 0x5f4   :  { %v6900_v9 = vpop.eup %6899  ;;  %6919 = vrcp.f32 %v4378_v57  ;;  %v4384_v31 = vadd.f32 1.0, %v6898_v8  ;;  %v3407_v57 = vadd.f32 %v8422_v35, %v8352_v22  ;;  %v3417_v17 = vadd.f32 %v8444_v2, %v8352_v22  ;;  %v8730_v2 = vld [vmem:[#allocation32_spill] sm:$0xff] }
 0x5f5   :  { %v6902_v58 = vpop.eup %6901  ;;  %6921 = vrcp.f32 %v4463_v7  ;;  %v4498_v55 = vadd.f32 1.0, %v6900_v9  ;;  %v3768_v7 = vsub.f32 0.0, %v3401_v36  ;;  %v4124_v9 = vmul.f32 1.442695, %v3755_v29 }
 0x5f6   :  { %v6904_v43 = vpop.eup %6903  ;;  %6923 = vrcp.f32 %v4384_v31  ;;  %v4385_v19 = vadd.f32 1.0, %v6902_v58  ;;  %v3769_v31 = vsub.f32 0.0, %v3403_v59  ;;  %v3776_v35 = vsub.f32 0.0, %v3407_v57 }
 0x5f7   :  { %v6906_v0 = vpop.eup %6905  ;;  %6925 = vrcp.f32 %v4498_v55  ;;  %v4484_v41 = vadd.f32 1.0, %v6904_v43  ;;  %v3775_v55 = vsub.f32 0.0, %v3405_v44  ;;  %v4138_v43 = vmul.f32 1.442695, %v3762_v38 }
 0x5f8   :  { %v6908_v40 = vpop.eup %6907  ;;  %6927 = vrcp.f32 %v4385_v19  ;;  %v4391_v25 = vadd.f32 1.0, %v6906_v0  ;;  %v4150_v18 = vmul.f32 1.442695, %v3768_v7  ;;  %v4166_v13 = vmul.f32 1.442695, %v3776_v35  ;;  %v8734_v35 = vld [vmem:[#allocation36_spill] sm:$0xff] }
 0x5f9   :  { %v6910_v10 = vpop.eup %6909  ;;  %6929 = vrcp.f32 %v4484_v41  ;;  %v4505_v61 = vadd.f32 1.0, %v6908_v40  ;;  %v4152_v41 = vmul.f32 1.442695, %v3769_v31  ;;  %v4164_v40 = vmul.f32 1.442695, %v3775_v55 }
 0x5fa   :  { %v6912_v53 = vpop.eup %6911  ;;  %6931 = vrcp.f32 %v4391_v25  ;;  %v4392_v16 = vadd.f32 1.0, %v6910_v10  ;;  %v3421_v36 = vadd.f32 %v8446_v42, %v8317_v20  ;;  %v3423_v29 = vadd.f32 %v8448_v12, %v8352_v22  ;;  %v8731_v42 = vld [vmem:[#allocation33_spill] sm:$0xff]  ;;  %v8732_v12 = vld [vmem:[#allocation34_spill] sm:$0xff] }
 0x5fb   :  { %v6914_v4 = vpop.eup %6913  ;;  %6933 = vrcp.f32 %v4505_v61  ;;  %v4491_v26 = vadd.f32 1.0, %v6912_v53  ;;  %v3425_v21 = vadd.f32 %v8730_v2, %v8317_v20  ;;  %v3427_v38 = vadd.f32 %v8731_v42, %v8352_v22  ;;  %v8737_v2 = vld [vmem:[#allocation39_spill] sm:$0xff] }
 0x5fc   :  { %v6916_v48 = vpop.eup %6915  ;;  %6935 = vrcp.f32 %v4392_v16  ;;  %v4398_v11 = vadd.f32 1.0, %v6914_v4  ;;  %v3431_v7 = vadd.f32 %v8732_v12, %v8317_v20  ;;  %v3797_v31 = vsub.f32 0.0, %v3423_v29 }
 0x5fd   :  { %v6918_v32 = vpop.eup %6917  ;;  %6937 = vrcp.f32 %v4491_v26  ;;  %v4399_v3 = vadd.f32 1.0, %v6916_v48 }
 0x5fe   :  { %v6920_v46 = vpop.eup %6919  ;;  %6939 = vrcp.f32 %v4398_v11  ;;  %v4405_v60 = vadd.f32 1.0, %v6918_v32 }
 0x5ff   :  { %v6922_v51 = vpop.eup %6921  ;;  %4826 = vst [vmem:[#allocation11 + $0x300] sm:$0xff] %v6920_v46  ;;  %6941 = vrcp.f32 %v4399_v3  ;;  %v3783_v3 = vsub.f32 0.0, %v3413_v28 }
 0x600   :  { %v6924_v54 = vpop.eup %6923  ;;  %4911 = vst [vmem:[#allocation11 + $0x5a8] sm:$0xff] %v6922_v51  ;;  %6943 = vrcp.f32 %v4405_v60 }
 0x601   :  { %v6926_v14 = vpop.eup %6925  ;;  %4832 = vst [vmem:[#allocation11 + $0x330] sm:$0xff] %v6924_v54  ;;  %6945 = vpow2.f32 %v4082_v5  ;;  %v3411_v5 = vadd.f32 %v8434_v49, %v8317_v20  ;;  %v3415_v49 = vadd.f32 %v8442_v30, %v8317_v20 }
 0x602   :  { %v6928_v8 = vpop.eup %6927  ;;  %4946 = vst [vmem:[#allocation11 + $0x6c0] sm:$0xff] %v6926_v14  ;;  %6947 = vpow2.f32 %v4094_v24 }
 0x603   :  { %v6930_v1 = vpop.eup %6929  ;;  %4833 = vst [vmem:[#allocation11 + $0x338] sm:$0xff] %v6928_v8  ;;  %6949 = vpow2.f32 %v4096_v45  ;;  %v3782_v48 = vsub.f32 0.0, %v3411_v5  ;;  %v3789_v45 = vsub.f32 0.0, %v3415_v49 }
 0x604   :  { %v6932_v58 = vpop.eup %6931  ;;  %4932 = vst [vmem:[#allocation11 + $0x650] sm:$0xff] %v6930_v1  ;;  %6951 = vpow2.f32 %v4108_v37  ;;  %v4180_v37 = vmul.f32 1.442695, %v3783_v3 }
 0x605   :  { %v6934_v63 = vpop.eup %6933  ;;  %4839 = vst [vmem:[#allocation11 + $0x368] sm:$0xff] %v6932_v58  ;;  %6953 = vpow2.f32 %v4110_v34  ;;  %v4178_v23 = vmul.f32 1.442695, %v3782_v48  ;;  %v3790_v34 = vsub.f32 0.0, %v3417_v17  ;;  %v8733_v58 = vld [vmem:[#allocation35_spill] sm:$0xff] }
 0x606   :  { %v6936_v19 = vpop.eup %6935  ;;  %4953 = vst [vmem:[#allocation11 + $0x6f8] sm:$0xff] %v6934_v63  ;;  %6955 = vpow2.f32 %v4122_v52  ;;  %v3796_v52 = vsub.f32 0.0, %v3421_v36  ;;  %v4192_v63 = vmul.f32 1.442695, %v3789_v45 }
 0x607   :  { %v6938_v0 = vpop.eup %6937  ;;  %4840 = vst [vmem:[#allocation11 + $0x370] sm:$0xff] %v6936_v19  ;;  %6957 = vpow2.f32 %v4124_v9  ;;  %v3435_v19 = vadd.f32 %v8734_v35, %v8317_v20 }
 0x608   :  { %v6940_v47 = vpop.eup %6939  ;;  %4939 = vst [vmem:[#allocation11 + $0x688] sm:$0xff] %v6938_v0  ;;  %6959 = vpow2.f32 %v4136_v27  ;;  %v3433_v27 = vadd.f32 %v8733_v58, %v8352_v22  ;;  %v4194_v0 = vmul.f32 1.442695, %v3790_v34  ;;  %v8738_v34 = vld [vmem:[#allocation40_spill] sm:$0xff] }
 0x609   :  { %v6942_v25 = vpop.eup %6941  ;;  %4846 = vst [vmem:[#allocation11 + $0x3a0] sm:$0xff] %v6940_v47  ;;  %6961 = vpow2.f32 %v4138_v43  ;;  %v3803_v43 = vsub.f32 0.0, %v3425_v21  ;;  %v8735_v47 = vld [vmem:[#allocation37_spill] sm:$0xff]  ;;  %v3443_v21 = vadd.f32 %v8737_v2, %v8352_v22  ;;  %v3445_v42 = vadd.f32 %v8738_v34, %v8317_v20 }
 0x60a   :  { %v6944_v10 = vpop.eup %6943  ;;  %4847 = vst [vmem:[#allocation11 + $0x3a8] sm:$0xff] %v6942_v25  ;;  %6963 = vpow2.f32 %v4150_v18 }
 0x60b   :  { %v6946_v61 = vpop.eup %6945  ;;  %4853 = vst [vmem:[#allocation11 + $0x3d8] sm:$0xff] %v6944_v10  ;;  %6965 = vpow2.f32 %v4152_v41  ;;  %v3804_v41 = vsub.f32 0.0, %v3427_v38  ;;  %v3810_v10 = vsub.f32 0.0, %v3431_v7  ;;  %v4220_v28 = vmul.f32 1.442695, %v3803_v43 }
 0x60c   :  { %v6948_v50 = vpop.eup %6947  ;;  %v4406_v53 = vadd.f32 1.0, %v6946_v61  ;;  %6967 = vpow2.f32 %v4164_v40  ;;  %v3437_v40 = vadd.f32 %v8735_v47, %v8352_v22  ;;  %v8736_v61 = vld [vmem:[#allocation38_spill] sm:$0xff] }
 0x60d   :  { %v6950_v16 = vpop.eup %6949  ;;  %v4412_v6 = vadd.f32 1.0, %v6948_v50  ;;  %6969 = vpow2.f32 %v4166_v13  ;;  %v4206_v13 = vmul.f32 1.442695, %v3796_v52  ;;  %v3441_v5 = vadd.f32 %v8736_v61, %v8317_v20 }
 0x60e   :  { %v6952_v4 = vpop.eup %6951  ;;  %6971 = vrcp.f32 %v4406_v53  ;;  %v4413_v26 = vadd.f32 1.0, %v6950_v16  ;;  %v4208_v53 = vmul.f32 1.442695, %v3797_v31  ;;  %v3811_v16 = vsub.f32 0.0, %v3433_v27 }
 0x60f   :  { %v6954_v24 = vpop.eup %6953  ;;  %6973 = vrcp.f32 %v4412_v6  ;;  %v4419_v56 = vadd.f32 1.0, %v6952_v4  ;;  %v3817_v4 = vsub.f32 0.0, %v3435_v19  ;;  %v3825_v31 = vsub.f32 0.0, %v3443_v21 }
 0x610   :  { %v6956_v11 = vpop.eup %6955  ;;  %6975 = vrcp.f32 %v4413_v26  ;;  %v4420_v62 = vadd.f32 1.0, %v6954_v24  ;;  %v4222_v24 = vmul.f32 1.442695, %v3804_v41 }
 0x611   :  { %v6958_v15 = vpop.eup %6957  ;;  %6977 = vrcp.f32 %v4419_v56  ;;  %v4426_v32 = vadd.f32 1.0, %v6956_v11  ;;  %v3818_v56 = vsub.f32 0.0, %v3437_v40  ;;  %v4234_v11 = vmul.f32 1.442695, %v3810_v10 }
 0x612   :  { %v6960_v33 = vpop.eup %6959  ;;  %6979 = vrcp.f32 %v4420_v62  ;;  %v4427_v39 = vadd.f32 1.0, %v6958_v15  ;;  %v3824_v62 = vsub.f32 0.0, %v3441_v5  ;;  %v4236_v15 = vmul.f32 1.442695, %v3811_v16 }
 0x613   :  { %v6962_v46 = vpop.eup %6961  ;;  %6981 = vrcp.f32 %v4426_v32  ;;  %v4433_v60 = vadd.f32 1.0, %v6960_v33  ;;  %v4248_v3 = vmul.f32 1.442695, %v3817_v4 }
 0x614   :  { %v6964_v51 = vpop.eup %6963  ;;  %6983 = vrcp.f32 %v4427_v39  ;;  %v4434_v30 = vadd.f32 1.0, %v6962_v46  ;;  %v4250_v39 = vmul.f32 1.442695, %v3818_v56  ;;  %v4262_v46 = vmul.f32 1.442695, %v3824_v62 }
 0x615   :  { %v6966_v59 = vpop.eup %6965  ;;  %6985 = vrcp.f32 %v4433_v60  ;;  %v4440_v54 = vadd.f32 1.0, %v6964_v51 }
 0x616   :  { %v6968_v44 = vpop.eup %6967  ;;  %6987 = vrcp.f32 %v4434_v30  ;;  %v4441_v14 = vadd.f32 1.0, %v6966_v59 }
 0x617   :  { %v6970_v57 = vpop.eup %6969  ;;  %6989 = vrcp.f32 %v4440_v54  ;;  %v4447_v8 = vadd.f32 1.0, %v6968_v44 }
 0x618   :  { %v6972_v1 = vpop.eup %6971  ;;  %6991 = vrcp.f32 %v4441_v14  ;;  %v4448_v9 = vadd.f32 1.0, %v6970_v57 }
 0x619   :  { %v6974_v55 = vpop.eup %6973  ;;  %4854 = vst [vmem:[#allocation11 + $0x3e0] sm:$0xff] %v6972_v1  ;;  %6993 = vrcp.f32 %v4447_v8  ;;  %v8739_v8 = vld [vmem:[#allocation17_spill] sm:$0xff] }
 0x61a   :  { %v6976_v18 = vpop.eup %6975  ;;  %4860 = vst [vmem:[#allocation11 + $0x410] sm:$0xff] %v6974_v55  ;;  %6995 = vrcp.f32 %v4448_v9  ;;  %v3447_v52 = vadd.f32 %v8739_v8, %v8352_v22  ;;  %v3831_v55 = vsub.f32 0.0, %v3445_v42 }
 0x61b   :  { %v6978_v25 = vpop.eup %6977  ;;  %4861 = vst [vmem:[#allocation11 + $0x418] sm:$0xff] %v6976_v18  ;;  %6997 = vpow2.f32 %v4178_v23 }
 0x61c   :  { %v6980_v50 = vpop.eup %6979  ;;  %4867 = vst [vmem:[#allocation11 + $0x448] sm:$0xff] %v6978_v25  ;;  %6999 = vpow2.f32 %v4180_v37  ;;  %v3832_v43 = vsub.f32 0.0, %v3447_v52  ;;  %v4276_v40 = vmul.f32 1.442695, %v3831_v55 }
 0x61d   :  { %v6982_v6 = vpop.eup %6981  ;;  %4868 = vst [vmem:[#allocation11 + $0x450] sm:$0xff] %v6980_v50  ;;  %7001 = vpow2.f32 %v4192_v63 }
 0x61e   :  { %v6984_v26 = vpop.eup %6983  ;;  %4874 = vst [vmem:[#allocation11 + $0x480] sm:$0xff] %v6982_v6  ;;  %7003 = vpow2.f32 %v4194_v0  ;;  %v4264_v0 = vmul.f32 1.442695, %v3825_v31 }
 0x61f   :  { %v6986_v48 = vpop.eup %6985  ;;  %4875 = vst [vmem:[#allocation11 + $0x488] sm:$0xff] %v6984_v26  ;;  %7005 = vpow2.f32 %v4206_v13  ;;  %v4278_v13 = vmul.f32 1.442695, %v3832_v43 }
 0x620   :  { %v6988_v49 = vpop.eup %6987  ;;  %4881 = vst [vmem:[#allocation11 + $0x4b8] sm:$0xff] %v6986_v48  ;;  %7007 = vpow2.f32 %v4208_v53 }
 0x621   :  { %v6990_v32 = vpop.eup %6989  ;;  %4882 = vst [vmem:[#allocation11 + $0x4c0] sm:$0xff] %v6988_v49  ;;  %7009 = vpow2.f32 %v4220_v28 }
 0x622   :  { %v6992_v33 = vpop.eup %6991  ;;  %4888 = vst [vmem:[#allocation11 + $0x4f0] sm:$0xff] %v6990_v32  ;;  %7011 = vpow2.f32 %v4222_v24 }
 0x623   :  { %v6994_v17 = vpop.eup %6993  ;;  %4889 = vst [vmem:[#allocation11 + $0x4f8] sm:$0xff] %v6992_v33  ;;  %7013 = vpow2.f32 %v4234_v11 }
 0x624   :  { %v6996_v60 = vpop.eup %6995  ;;  %4895 = vst [vmem:[#allocation11 + $0x528] sm:$0xff] %v6994_v17  ;;  %7015 = vpow2.f32 %v4236_v15 }
 0x625   :  { %v6998_v23 = vpop.eup %6997  ;;  %4896 = vst [vmem:[#allocation11 + $0x530] sm:$0xff] %v6996_v60  ;;  %7017 = vpow2.f32 %v4248_v3 }
 0x626   :  { %v7000_v36 = vpop.eup %6999  ;;  %v4454_v51 = vadd.f32 1.0, %v6998_v23  ;;  %7019 = vpow2.f32 %v4250_v39 }
 0x627   :  { %v7002_v30 = vpop.eup %7001  ;;  %v4455_v45 = vadd.f32 1.0, %v7000_v36  ;;  %7021 = vpow2.f32 %v4262_v46 }
 0x628   :  { %v7004_v29 = vpop.eup %7003  ;;  %7023 = vrcp.f32 %v4454_v51  ;;  %v4461_v59 = vadd.f32 1.0, %v7002_v30 }
 0x629   :  { %v7006_v54 = vpop.eup %7005  ;;  %7025 = vrcp.f32 %v4455_v45  ;;  %v4462_v37 = vadd.f32 1.0, %v7004_v29 }
 0x62a   :  { %v7008_v44 = vpop.eup %7007  ;;  %7027 = vrcp.f32 %v4461_v59  ;;  %v4468_v14 = vadd.f32 1.0, %v7006_v54 }
 0x62b   :  { %v7010_v38 = vpop.eup %7009  ;;  %7029 = vrcp.f32 %v4462_v37  ;;  %v4469_v57 = vadd.f32 1.0, %v7008_v44 }
 0x62c   :  { %v7012_v12 = vpop.eup %7011  ;;  %7031 = vrcp.f32 %v4468_v14  ;;  %v4475_v7 = vadd.f32 1.0, %v7010_v38 }
 0x62d   :  { %v7014_v1 = vpop.eup %7013  ;;  %7033 = vrcp.f32 %v4469_v57  ;;  %v4476_v9 = vadd.f32 1.0, %v7012_v12 }
 0x62e   :  { %v7016_v58 = vpop.eup %7015  ;;  %7035 = vrcp.f32 %v4475_v7  ;;  %v4482_v27 = vadd.f32 1.0, %v7014_v1 }
 0x62f   :  { %v7018_v63 = vpop.eup %7017  ;;  %7037 = vrcp.f32 %v4476_v9  ;;  %v4483_v20 = vadd.f32 1.0, %v7016_v58 }
 0x630   :  { %v7020_v35 = vpop.eup %7019  ;;  %7039 = vrcp.f32 %v4482_v27  ;;  %v4489_v19 = vadd.f32 1.0, %v7018_v63 }
 0x631   :  { %v7022_v18 = vpop.eup %7021  ;;  %7041 = vrcp.f32 %v4483_v20  ;;  %v4490_v22 = vadd.f32 1.0, %v7020_v35 }
 0x632   :  { %v7024_v41 = vpop.eup %7023  ;;  %7043 = vrcp.f32 %v4489_v19  ;;  %v4496_v47 = vadd.f32 1.0, %v7022_v18 }
 0x633   :  { %v7026_v25 = vpop.eup %7025  ;;  %4902 = vst [vmem:[#allocation11 + $0x560] sm:$0xff] %v7024_v41  ;;  %7045 = vrcp.f32 %v4490_v22 }
 0x634   :  { %v7028_v10 = vpop.eup %7027  ;;  %4903 = vst [vmem:[#allocation11 + $0x568] sm:$0xff] %v7026_v25  ;;  %7047 = vrcp.f32 %v4496_v47 }
 0x635   :  { %v7030_v61 = vpop.eup %7029  ;;  %4909 = vst [vmem:[#allocation11 + $0x598] sm:$0xff] %v7028_v10  ;;  %7049 = vpow2.f32 %v4264_v0 }
 0x636   :  { %v7032_v5 = vpop.eup %7031  ;;  %4910 = vst [vmem:[#allocation11 + $0x5a0] sm:$0xff] %v7030_v61  ;;  %7051 = vpow2.f32 %v4276_v40 }
 0x637   :  { %v7034_v50 = vpop.eup %7033  ;;  %4916 = vst [vmem:[#allocation11 + $0x5d0] sm:$0xff] %v7032_v5  ;;  %7053 = vpow2.f32 %v4278_v13 }
 0x638   :  { %v7036_v53 = vpop.eup %7035  ;;  %4917 = vst [vmem:[#allocation11 + $0x5d8] sm:$0xff] %v7034_v50 }
 0x639   :  { %v7038_v16 = vpop.eup %7037  ;;  %4923 = vst [vmem:[#allocation11 + $0x608] sm:$0xff] %v7036_v53 }
 0x63a   :  { %v7040_v6 = vpop.eup %7039  ;;  %4924 = vst [vmem:[#allocation11 + $0x610] sm:$0xff] %v7038_v16 }
 0x63b   :  { %v7042_v28 = vpop.eup %7041  ;;  %4930 = vst [vmem:[#allocation11 + $0x640] sm:$0xff] %v7040_v6 }
 0x63c   :  { %v7044_v4 = vpop.eup %7043  ;;  %4931 = vst [vmem:[#allocation11 + $0x648] sm:$0xff] %v7042_v28 }
 0x63d   :  { %v7046_v26 = vpop.eup %7045  ;;  %4937 = vst [vmem:[#allocation11 + $0x678] sm:$0xff] %v7044_v4 }
 0x63e   :  { %v7048_v24 = vpop.eup %7047  ;;  %4938 = vst [vmem:[#allocation11 + $0x680] sm:$0xff] %v7046_v26 }
 0x63f   :  { %v7050_v56 = vpop.eup %7049  ;;  %4944 = vst [vmem:[#allocation11 + $0x6b0] sm:$0xff] %v7048_v24 }
 0x640   :  { %v7052_v48 = vpop.eup %7051  ;;  %v4497_v11 = vadd.f32 1.0, %v7050_v56 }
 0x641   :  { %v7054_v62 = vpop.eup %7053  ;;  %v4503_v49 = vadd.f32 1.0, %v7052_v48 }
 0x642   :  { %7055 = vrcp.f32 %v4497_v11  ;;  %v4504_v15 = vadd.f32 1.0, %v7054_v62 }
 0x643   :  { %7057 = vrcp.f32 %v4503_v49 }
 0x644   :  { %7059 = vrcp.f32 %v4504_v15 }
 0x64c   :  { %v7056_v32 = vpop.eup %7055 }
 0x64d   :  { %v7058_v3 = vpop.eup %7057  ;;  %4945 = vst [vmem:[#allocation11 + $0x6b8] sm:$0xff] %v7056_v32 }
 0x64e   :  { %v7060_v33 = vpop.eup %7059  ;;  %4951 = vst [vmem:[#allocation11 + $0x6e8] sm:$0xff] %v7058_v3 }
 0x64f   :  { %4952 = vst [vmem:[#allocation11 + $0x6f0] sm:$0xff] %v7060_v33 }
 0x650   :  { %7183 = shalt.err (!%p7180_p2)
}
 0x651   :  { %s7184_s16 = scalar_lea.hbm %s8627_s9, 28672 }
 0x652   :  { %p7185_p3 = scmp.ne.s32.totalorder %s8627_s9, %s7184_s16  ;;  %p7188_p4 = scmp.lt.u32.totalorder %s7184_s16, %s8627_s9 }
 0x654   :  { %p7190_p5 = pnand %p7188_p4, %p7185_p3 }
 0x656   :  { %7193 = shalt.err (!%p7190_p5)
}
 0x657   :  { %s7213_s21 = smov 896   ;;  %s7214_s22 = smov 56  }
 0x658   :  { %4965 = dma.vmem_to_hbm [thread:$0]  %s4960_s1, 28672, %s8627_s9, [#allocation4], %s7213_s21, %s7213_s21, %s7214_s22  }
 0x659   :  { %7200 = dma.done.wait [#allocation4], 28672  }
 0x65a   :  { %7201 = vsyncadd [#allocation4], 4294938624 }
 0x65b   :  { %4969 = vsyncpa [#allocation3], 1 }
 0x65c   :  { %4970 = vsyncpa [#allocation6], 1 }
 0x65d   :  { %4971 = vsyncpa [#allocation9], 1 }
 0x65e   :  { %4972 = vsyncpa [#allocation4], 1 }

</bundles_post_ra>
